<compile_context>
chip_gen: v6e
topology: v6e:2x2x1
jax: 0.10.0
libtpu: 0.0.40
codegen_flags: <defaults>
</compile_context>

<pallas_src>
import math
import functools

import jax
import jax.numpy as jnp
from jax.experimental import pallas as pl
from jax.experimental.pallas import tpu as pltpu

F32 = jnp.float32
NEG_INF = -1e20          # ParlAI neginf(float32) for the knowledge-piece mask
CAUSAL_NEG = -1e30       # additive causal-mask fill
MM_DTYPE = jnp.float32   # flip to jnp.bfloat16 to halve MXU passes on v6e/v7x
                         # (all elementwise math stays f32 either way)


def _mm(a, b):
    """2-D matmul on the MXU with f32 accumulation."""
    return jnp.dot(a.astype(MM_DTYPE), b.astype(MM_DTYPE),
                   preferred_element_type=F32)


def _mm_nt(a, b):
    """a @ b.T on the MXU with f32 accumulation."""
    return jax.lax.dot_general(a.astype(MM_DTYPE), b.astype(MM_DTYPE),
                               (((1,), (1,)), ((), ())),
                               preferred_element_type=F32)


# ----------------------------------------------------------------------------
# The fused kernel: one grid step == one batch element (L episode turns).
# ----------------------------------------------------------------------------
def mike_fused_kernel(ctx_ref, kp_ref, kmask_ref, onehot_ref, amask_ref,
                      wk_cat_ref, bk_cat_ref, sel_w_ref, sel_b_ref,
                      start_ref, turn_ref,
                      wqkv_ref, bqkv_ref, wo_ref, bo_ref,
                      w1_ref, b1_ref, w2_ref, b2_ref,
                      ln_ref, enorm_ref, wf_ref, bf_ref,
                      dists_ref, atts_ref, prob_ref,
                      *, L, K, H, nhead, n_layers):
    hd = H // nhead
    scale = 1.0 / math.sqrt(hd)

    ctx = ctx_ref[...]                        # (L, H)
    kp3 = kp_ref[...]                         # (L, K, H)
    kp2 = kp3.reshape(L * K, H)
    kmask = kmask_ref[...]                    # (L, K) 1.0 = valid
    onehot = onehot_ref[...]                  # (L, K) one-hot(knowledge_label)
    amask = amask_ref[...]                    # (L, L) additive causal mask

    # project_k for BOTH selectors in one MXU pass (weights packed (H, 2H)).
    kpro_all = _mm(kp2, wk_cat_ref[...]) + bk_cat_ref[...]        # (L*K, 2H)
    kpro_u = kpro_all[:, :H].reshape(L, K, H)
    kpro_s = kpro_all[:, H:].reshape(L, K, H)

    def selector(si, q_raw, kpro):
        wq = sel_w_ref[2 * si + 0]
        wv = sel_w_ref[2 * si + 1]
        bq = sel_b_ref[2 * si + 0]
        bv = sel_b_ref[2 * si + 1]
        q = _mm(q_raw, wq) + bq                                   # (L, H)
        # score[l,k] = <kpro[l,k,:], q[l,:]>   (batched MXU dot, no lane reduce)
        score = jnp.einsum('lqe,lke->lqk', q[:, None, :], kpro,
                           preferred_element_type=F32).reshape(L, K)
        score = jnp.where(kmask > 0.0, score, NEG_INF)
        m = jnp.max(score, axis=-1, keepdims=True)
        e = jnp.exp(score - m)
        dist = e / jnp.sum(e, axis=-1, keepdims=True)
        # att = (dist @ kp) @ Wv + bv  -- exact (dist rows sum to 1) and K x
        # cheaper than projecting all L*K knowledge rows through Wv.
        cv = jnp.einsum('lqk,lkh->lqh', dist[:, None, :], kp3,
                        preferred_element_type=F32).reshape(L, H)
        att = _mm(cv, wv) + bv
        return att, dist, score

    def layer_norm(x, g, b):
        mu = jnp.mean(x, axis=-1, keepdims=True)
        xc = x - mu
        var = jnp.mean(xc * xc, axis=-1, keepdims=True)
        return xc * jax.lax.rsqrt(var + 1e-5) * g + b

    def encoder_layer(x, u):
        qkv = _mm(x, wqkv_ref[u]) + bqkv_ref[u]                   # (L, 3H)
        wo = wo_ref[u]
        attn = jnp.zeros((L, H), F32)
        for h in range(nhead):
            c0 = h * hd
            qh = qkv[:, c0:c0 + hd] * scale
            kh = qkv[:, H + c0:H + c0 + hd]
            vh = qkv[:, 2 * H + c0:2 * H + c0 + hd]
            s = _mm_nt(qh, kh) + amask                            # (L, L)
            m = jnp.max(s, axis=-1, keepdims=True)
            e = jnp.exp(s - m)
            p = e / jnp.sum(e, axis=-1, keepdims=True)
            # head output accumulated through its Wo slab -> no concatenates
            attn = attn + _mm(_mm(p, vh), wo[c0:c0 + hd, :])
        attn = attn + bo_ref[u]
        src = layer_norm(x + attn, ln_ref[4 * u + 0], ln_ref[4 * u + 1])
        ff = _mm(src, w1_ref[u]) + b1_ref[u]
        # TODO(synk): PyTorch F.gelu is the exact erf GELU; tanh approx used here.
        ff = jax.nn.gelu(ff, approximate=True)
        ff = _mm(ff, w2_ref[u]) + b2_ref[u]
        return layer_norm(src + ff, ln_ref[4 * u + 2], ln_ref[4 * u + 3])

    def transformer(si, x):
        for layer in range(n_layers):
            x = encoder_layer(x, si * n_layers + layer)
        return layer_norm(x, enorm_ref[2 * si + 0], enorm_ref[2 * si + 1])

    # knowledge_pooling_use gather done in-kernel via one-hot matmul.
    kp_use = jnp.einsum('lqk,lkh->lqh', onehot[:, None, :], kp3,
                        preferred_element_type=F32).reshape(L, H)

    def build_input(si):
        shifted = jnp.concatenate([start_ref[si], kp_use[:L - 1, :]], axis=0)
        return shifted + turn_ref[si]                             # (L, H)

    # ---- UserInitiativeSelector --------------------------------------------
    u_att, u_dist, u_score = selector(0, ctx, kpro_u)

    # ---- SystemInitiativeSelector ------------------------------------------
    sys_state = transformer(0, build_input(0))
    s_att, s_dist, s_score = selector(1, sys_state, kpro_s)

    # ---- StudentInitiativeDiscriminator head (Wf pre-split -> no 5H concat) -
    stu_state = transformer(1, build_input(1))
    pro = (_mm(stu_state, wf_ref[0]) + _mm(ctx, wf_ref[1])
           + _mm(u_att, wf_ref[2]) + _mm(s_att, wf_ref[3]) + bf_ref[...])
    prob = jax.nn.sigmoid(pro)                                    # (L, 1)

    # ---- final probability mixing ------------------------------------------
    final = u_dist * prob + s_dist * (1.0 - prob)

    dists_ref[0] = u_score
    dists_ref[1] = s_score
    dists_ref[2] = u_dist
    dists_ref[3] = s_dist
    dists_ref[4] = final
    atts_ref[0] = u_att
    atts_ref[1] = s_att
    prob_ref[0] = prob
    prob_ref[1] = pro


# ----------------------------------------------------------------------------
# BlockSpec helpers
# ----------------------------------------------------------------------------
def _batch_block_spec(shape):
    """Slice the leading batch dim (squeezed away in the kernel)."""
    rest = tuple(shape[1:])
    nrest = len(rest)
    return pl.BlockSpec((None,) + rest, lambda b, _n=nrest: (b,) + (0,) * _n)


def _whole_block_spec(arr):
    """Whole array resident in VMEM, same block for every grid step."""
    nd = arr.ndim
    return pl.BlockSpec(arr.shape, lambda b, _n=nd: (0,) * _n)


# ----------------------------------------------------------------------------
# Wrapper-side weight packing (layer-stacked, selector-packed, Wf pre-split).
# ----------------------------------------------------------------------------
def pack_params(params, H):
    user, system, student = params["user"], params["system"], params["student"]

    wk_cat = jnp.concatenate([user["wk"], system["wk"]], axis=1)      # (H, 2H)
    bk_cat = jnp.concatenate([user["bk"], system["bk"]], axis=1)      # (1, 2H)
    sel_w = jnp.stack([user["wq"], user["wv"], system["ws"], system["wv"]])
    sel_b = jnp.stack([user["bq"], user["bv"], system["bs"], system["bv"]])

    start_all = jnp.stack([system["start_emb"], student["start_emb"]])  # (2,1,H)
    turn_all = jnp.stack([system["turn_emb"], student["turn_emb"]])     # (2,L,H)

    layers = list(system["xf"]["layers"]) + list(student["xf"]["layers"])

    def stk(name):
        return jnp.stack([ly[name] for ly in layers])

    wqkv_all, bqkv_all = stk("wqkv"), stk("bqkv")
    wo_all, bo_all = stk("wo"), stk("bo")
    w1_all, b1_all = stk("w1"), stk("b1")
    w2_all, b2_all = stk("w2"), stk("b2")
    ln_all = jnp.stack([ly[name] for ly in layers
                        for name in ("ln1g", "ln1b", "ln2g", "ln2b")])
    enorm_all = jnp.stack([system["xf"]["norm_g"], system["xf"]["norm_b"],
                           student["xf"]["norm_g"], student["xf"]["norm_b"]])

    wf = student["wf"]                                                 # (5H, 1)
    wf_pack = jnp.stack([wf[0 * H:1 * H],
                         wf[1 * H:2 * H],
                         wf[2 * H:3 * H] + wf[4 * H:5 * H],   # ua + (ua - sa) part
                         wf[3 * H:4 * H] - wf[4 * H:5 * H]])  # sa - (ua - sa) part
    bf = student["bf"]                                                 # (1, 1)

    return [wk_cat, bk_cat, sel_w, sel_b, start_all, turn_all,
            wqkv_all, bqkv_all, wo_all, bo_all,
            w1_all, b1_all, w2_all, b2_all,
            ln_all, enorm_all, wf_pack, bf]


# ----------------------------------------------------------------------------
# Top-level entry: mixed_initiative_knowledge_selection_layer (inference path)
# ----------------------------------------------------------------------------
@functools.partial(jax.jit, static_argnames=("nhead",))
def mike_knowledge_selection(context_pooling, knowledge_pooling,
                             knowledge_piece_mask, episode_mask,
                             knowledge_label, params, nhead):
    B, L = episode_mask.shape
    N, K, H = knowledge_pooling.shape
    n_layers = len(params["system"]["xf"]["layers"])

    # batch-major views so one grid step = one batch element
    ctx_b = context_pooling.reshape(B, L, H)
    kp_b = knowledge_pooling.reshape(B, L, K, H)
    kmask_b = knowledge_piece_mask.reshape(B, L, K).astype(F32)
    onehot_b = jax.nn.one_hot(knowledge_label.reshape(B, L), K, dtype=F32)

    idx = jnp.arange(L)
    amask = jnp.where(idx[None, :] <= idx[:, None], 0.0, CAUSAL_NEG).astype(F32)

    data_ops = [ctx_b, kp_b, kmask_b, onehot_b]
    weight_ops = pack_params(params, H)
    operands = data_ops + [amask] + weight_ops

    in_specs = ([_batch_block_spec(a.shape) for a in data_ops]
                + [_whole_block_spec(amask)]
                + [_whole_block_spec(a) for a in weight_ops])

    out_shapes = (jax.ShapeDtypeStruct((B, 5, L, K), F32),   # scores / dists / final
                  jax.ShapeDtypeStruct((B, 2, L, H), F32),   # attention vectors
                  jax.ShapeDtypeStruct((B, 2, L, 1), F32))   # prob / pro
    out_specs = (pl.BlockSpec((None, 5, L, K), lambda b: (b, 0, 0, 0)),
                 pl.BlockSpec((None, 2, L, H), lambda b: (b, 0, 0, 0)),
                 pl.BlockSpec((None, 2, L, 1), lambda b: (b, 0, 0, 0)))

    kernel = functools.partial(mike_fused_kernel, L=L, K=K, H=H,
                               nhead=nhead, n_layers=n_layers)

    dists, atts, probs = pl.pallas_call(
        kernel,
        grid=(B,),
        out_shape=out_shapes,
        in_specs=in_specs,
        out_specs=out_specs,
        compiler_params=pltpu.CompilerParams(
            dimension_semantics=("parallel",)),   # v7x: one batch per TC
    )(*operands)

    u_score = dists[:, 0].reshape(N, K)
    s_score = dists[:, 1].reshape(N, K)
    u_dist = dists[:, 2].reshape(N, K)
    s_dist = dists[:, 3].reshape(N, K)
    final_dist = dists[:, 4].reshape(N, K)
    u_att = atts[:, 0].reshape(N, H)
    s_att = atts[:, 1].reshape(N, H)
    s_user_prob = probs[:, 0].reshape(N, 1)
    s_state_pro = probs[:, 1].reshape(N, 1)
    knowledge_ids = jnp.argmax(final_dist, axis=1)       # inference path

    return {
        "final_dist": final_dist,
        "user_initiative_dist": u_dist,
        "system_initiative_dist": s_dist,
        "user_initiative_score": u_score,
        "system_initiative_score": s_score,
        "user_attention_vector": u_att,
        "system_attention_vector": s_att,
        "s_user_prob": s_user_prob,
        "s_state_pro": s_state_pro,
        "knowledge_ids": knowledge_ids,
    }


# ----------------------------------------------------------------------------
# Deterministic parameter construction
# ----------------------------------------------------------------------------
def _lin(key, din, dout, scale=0.05):
    kw, kb = jax.random.split(key)
    return (scale * jax.random.normal(kw, (din, dout), F32),
            scale * jax.random.normal(kb, (1, dout), F32))


def _xf_layer(key, H, FF):
    ks = jax.random.split(key, 4)
    wqkv, bqkv = _lin(ks[0], H, 3 * H)
    wo, bo = _lin(ks[1], H, H)
    w1, b1 = _lin(ks[2], H, FF)
    w2, b2 = _lin(ks[3], FF, H)
    return dict(wqkv=wqkv, bqkv=bqkv, wo=wo, bo=bo, w1=w1, b1=b1, w2=w2, b2=b2,
                ln1g=jnp.ones((1, H), F32), ln1b=jnp.zeros((1, H), F32),
                ln2g=jnp.ones((1, H), F32), ln2b=jnp.zeros((1, H), F32))


def _xf_stack(key, H, FF, n_layers):
    keys = jax.random.split(key, n_layers)
    return dict(layers=[_xf_layer(k, H, FF) for k in keys],
                norm_g=jnp.ones((1, H), F32), norm_b=jnp.zeros((1, H), F32))


def init_params(key, H, FF, L, n_layers):
    k = jax.random.split(key, 16)
    # UserInitiativeSelector: project_c / project_k / project_v
    wc, bc = _lin(k[0], H, H)
    wku, bku = _lin(k[1], H, H)
    wvu, bvu = _lin(k[2], H, H)
    user = dict(wq=wc, bq=bc, wk=wku, bk=bku, wv=wvu, bv=bvu)

    # SystemInitiativeSelector
    ws, bs = _lin(k[3], H, H)
    wks, bks = _lin(k[4], H, H)
    wvs, bvs = _lin(k[5], H, H)
    system = dict(ws=ws, bs=bs, wk=wks, bk=bks, wv=wvs, bv=bvs,
                  start_emb=0.05 * jax.random.normal(k[6], (1, H), F32),
                  turn_emb=0.05 * jax.random.normal(k[7], (L, H), F32),
                  xf=_xf_stack(k[8], H, FF, n_layers))

    # StudentInitiativeDiscriminator
    wf, bf = _lin(k[9], 5 * H, 1)
    student = dict(wf=wf, bf=bf,
                   start_emb=0.05 * jax.random.normal(k[10], (1, H), F32),
                   turn_emb=0.05 * jax.random.normal(k[11], (L, H), F32),
                   xf=_xf_stack(k[12], H, FF, n_layers))

    return dict(user=user, system=system, student=student)


# ----------------------------------------------------------------------------
if __name__ == "__main__":
    B, L, K = 2, 4, 8                      # batch, max_episode_length, max_knowledge_pool
    H, FF, NHEAD, NLAYERS = 32, 64, 4, 2   # hidden/embedding, ffn, k_n_heads, k_n_layers
    N = B * L

    root = jax.random.PRNGKey(0)
    kp_key, ctx_key, mask_key, lbl_key, prm_key = jax.random.split(root, 5)

    context_pooling = jax.random.normal(ctx_key, (N, H), F32)
    knowledge_pooling = jax.random.normal(kp_key, (N, K, H), F32)
    knowledge_piece_mask = jax.random.bernoulli(mask_key, 0.8, (B, L, K))
    knowledge_piece_mask = knowledge_piece_mask.at[..., 0].set(True)   # >=1 valid piece
    episode_mask = jnp.ones((B, L), dtype=bool)
    knowledge_label = jax.random.randint(lbl_key, (B, L), 0, K, jnp.int32)

    params = init_params(prm_key, H, FF, L, NLAYERS)

    out = mike_knowledge_selection(context_pooling, knowledge_pooling,
                                   knowledge_piece_mask, episode_mask,
                                   knowledge_label, params, nhead=NHEAD)
    out = jax.block_until_ready(out)

    # sanity checks
    assert out["final_dist"].shape == (N, K)
    assert out["s_user_prob"].shape == (N, 1)
    assert out["knowledge_ids"].shape == (N,)
    assert jnp.allclose(jnp.sum(out["user_initiative_dist"], axis=1), 1.0, atol=1e-4)
    assert jnp.allclose(jnp.sum(out["system_initiative_dist"], axis=1), 1.0, atol=1e-4)
    assert jnp.allclose(jnp.sum(out["final_dist"], axis=1), 1.0, atol=1e-4)
    mix = (out["user_initiative_dist"] * out["s_user_prob"]
           + out["system_initiative_dist"] * (1.0 - out["s_user_prob"]))
    assert jnp.allclose(out["final_dist"], mix, atol=1e-5)
    assert bool(jnp.all(jnp.isfinite(out["system_attention_vector"])))

    print("KERNEL_OK")
</pallas_src>

<mosaic_0001>
module attributes {stable_mosaic.version = 11 : i64} {
  func.func @mike_fused_kernel(%arg0: i32, %arg1: memref<1x4x32xf32, #tpu.memory_space<vmem>>, %arg2: memref<1x4x8x32xf32, #tpu.memory_space<vmem>>, %arg3: memref<1x4x8xf32, #tpu.memory_space<vmem>>, %arg4: memref<1x4x8xf32, #tpu.memory_space<vmem>>, %arg5: memref<4x4xf32, #tpu.memory_space<vmem>>, %arg6: memref<32x64xf32, #tpu.memory_space<vmem>>, %arg7: memref<1x64xf32, #tpu.memory_space<vmem>>, %arg8: memref<4x32x32xf32, #tpu.memory_space<vmem>>, %arg9: memref<4x1x32xf32, #tpu.memory_space<vmem>>, %arg10: memref<2x1x32xf32, #tpu.memory_space<vmem>>, %arg11: memref<2x4x32xf32, #tpu.memory_space<vmem>>, %arg12: memref<4x32x96xf32, #tpu.memory_space<vmem>>, %arg13: memref<4x1x96xf32, #tpu.memory_space<vmem>>, %arg14: memref<4x32x32xf32, #tpu.memory_space<vmem>>, %arg15: memref<4x1x32xf32, #tpu.memory_space<vmem>>, %arg16: memref<4x32x64xf32, #tpu.memory_space<vmem>>, %arg17: memref<4x1x64xf32, #tpu.memory_space<vmem>>, %arg18: memref<4x64x32xf32, #tpu.memory_space<vmem>>, %arg19: memref<4x1x32xf32, #tpu.memory_space<vmem>>, %arg20: memref<16x1x32xf32, #tpu.memory_space<vmem>>, %arg21: memref<4x1x32xf32, #tpu.memory_space<vmem>>, %arg22: memref<4x32x1xf32, #tpu.memory_space<vmem>>, %arg23: memref<1x1xf32, #tpu.memory_space<vmem>>, %arg24: memref<1x5x4x8xf32, #tpu.memory_space<vmem>>, %arg25: memref<1x2x4x32xf32, #tpu.memory_space<vmem>>, %arg26: memref<1x2x4x1xf32, #tpu.memory_space<vmem>>) attributes {dimension_semantics = [#tpu.dimension_semantics<parallel>], iteration_bounds = array<i64: 2>, scalar_prefetch = 0 : i64, scratch_operands = 0 : i64, tpu.core_type = #tpu.core_type<tc>, window_params = [{transform_indices = @transform_0, window_bounds = array<i64: 1, 4, 32>}, {transform_indices = @transform_1, window_bounds = array<i64: 1, 4, 8, 32>}, {transform_indices = @transform_2, window_bounds = array<i64: 1, 4, 8>}, {transform_indices = @transform_3, window_bounds = array<i64: 1, 4, 8>}, {pipeline_mode = #tpu.pipeline_mode<synchronous>, transform_indices = @transform_4, window_bounds = array<i64: 4, 4>}, {pipeline_mode = #tpu.pipeline_mode<synchronous>, transform_indices = @transform_5, window_bounds = array<i64: 32, 64>}, {pipeline_mode = #tpu.pipeline_mode<synchronous>, transform_indices = @transform_6, window_bounds = array<i64: 1, 64>}, {pipeline_mode = #tpu.pipeline_mode<synchronous>, transform_indices = @transform_7, window_bounds = array<i64: 4, 32, 32>}, {pipeline_mode = #tpu.pipeline_mode<synchronous>, transform_indices = @transform_8, window_bounds = array<i64: 4, 1, 32>}, {pipeline_mode = #tpu.pipeline_mode<synchronous>, transform_indices = @transform_9, window_bounds = array<i64: 2, 1, 32>}, {pipeline_mode = #tpu.pipeline_mode<synchronous>, transform_indices = @transform_10, window_bounds = array<i64: 2, 4, 32>}, {pipeline_mode = #tpu.pipeline_mode<synchronous>, transform_indices = @transform_11, window_bounds = array<i64: 4, 32, 96>}, {pipeline_mode = #tpu.pipeline_mode<synchronous>, transform_indices = @transform_12, window_bounds = array<i64: 4, 1, 96>}, {pipeline_mode = #tpu.pipeline_mode<synchronous>, transform_indices = @transform_13, window_bounds = array<i64: 4, 32, 32>}, {pipeline_mode = #tpu.pipeline_mode<synchronous>, transform_indices = @transform_14, window_bounds = array<i64: 4, 1, 32>}, {pipeline_mode = #tpu.pipeline_mode<synchronous>, transform_indices = @transform_15, window_bounds = array<i64: 4, 32, 64>}, {pipeline_mode = #tpu.pipeline_mode<synchronous>, transform_indices = @transform_16, window_bounds = array<i64: 4, 1, 64>}, {pipeline_mode = #tpu.pipeline_mode<synchronous>, transform_indices = @transform_17, window_bounds = array<i64: 4, 64, 32>}, {pipeline_mode = #tpu.pipeline_mode<synchronous>, transform_indices = @transform_18, window_bounds = array<i64: 4, 1, 32>}, {pipeline_mode = #tpu.pipeline_mode<synchronous>, transform_indices = @transform_19, window_bounds = array<i64: 16, 1, 32>}, {pipeline_mode = #tpu.pipeline_mode<synchronous>, transform_indices = @transform_20, window_bounds = array<i64: 4, 1, 32>}, {pipeline_mode = #tpu.pipeline_mode<synchronous>, transform_indices = @transform_21, window_bounds = array<i64: 4, 32, 1>}, {pipeline_mode = #tpu.pipeline_mode<synchronous>, transform_indices = @transform_22, window_bounds = array<i64: 1, 1>}, {transform_indices = @transform_23, window_bounds = array<i64: 1, 5, 4, 8>}, {transform_indices = @transform_24, window_bounds = array<i64: 1, 2, 4, 32>}, {transform_indices = @transform_25, window_bounds = array<i64: 1, 2, 4, 1>}]} {
    %c0 = arith.constant 0 : index
    %c0_0 = arith.constant 0 : index
    %c0_1 = arith.constant 0 : index
    %0 = vector.load %arg1[%c0, %c0_0, %c0_1] : memref<1x4x32xf32, #tpu.memory_space<vmem>>, vector<1x4x32xf32>
    %1 = vector.shape_cast %0 : vector<1x4x32xf32> to vector<4x32xf32>
    %c0_2 = arith.constant 0 : index
    %c0_3 = arith.constant 0 : index
    %c0_4 = arith.constant 0 : index
    %c0_5 = arith.constant 0 : index
    %2 = vector.load %arg2[%c0_2, %c0_3, %c0_4, %c0_5] : memref<1x4x8x32xf32, #tpu.memory_space<vmem>>, vector<1x4x8x32xf32>
    %3 = vector.shape_cast %2 : vector<1x4x8x32xf32> to vector<4x8x32xf32>
    %4 = vector.shape_cast %3 : vector<4x8x32xf32> to vector<32x32xf32>
    %c0_6 = arith.constant 0 : index
    %c0_7 = arith.constant 0 : index
    %c0_8 = arith.constant 0 : index
    %5 = vector.load %arg3[%c0_6, %c0_7, %c0_8] : memref<1x4x8xf32, #tpu.memory_space<vmem>>, vector<1x4x8xf32>
    %6 = vector.shape_cast %5 : vector<1x4x8xf32> to vector<4x8xf32>
    %c0_9 = arith.constant 0 : index
    %c0_10 = arith.constant 0 : index
    %c0_11 = arith.constant 0 : index
    %7 = vector.load %arg4[%c0_9, %c0_10, %c0_11] : memref<1x4x8xf32, #tpu.memory_space<vmem>>, vector<1x4x8xf32>
    %8 = vector.shape_cast %7 : vector<1x4x8xf32> to vector<4x8xf32>
    %c0_12 = arith.constant 0 : index
    %c0_13 = arith.constant 0 : index
    %9 = vector.load %arg5[%c0_12, %c0_13] : memref<4x4xf32, #tpu.memory_space<vmem>>, vector<4x4xf32>
    %c0_14 = arith.constant 0 : index
    %c0_15 = arith.constant 0 : index
    %10 = vector.load %arg6[%c0_14, %c0_15] : memref<32x64xf32, #tpu.memory_space<vmem>>, vector<32x64xf32>
    %cst = arith.constant dense<0.000000e+00> : vector<32x64xf32>
    %11 = tpu.matmul %4, %10, %cst {dimension_numbers = #tpu.dot_dimension_numbers<[1], [0], [0], [1], [0, 0, 1, 1], [], []>} : vector<32x32xf32>, vector<32x64xf32>, vector<32x64xf32> -> vector<32x64xf32>
    %c0_16 = arith.constant 0 : index
    %c0_17 = arith.constant 0 : index
    %12 = vector.load %arg7[%c0_16, %c0_17] : memref<1x64xf32, #tpu.memory_space<vmem>>, vector<1x64xf32>
    %13 = vector.broadcast %12 : vector<1x64xf32> to vector<32x64xf32>
    %14 = arith.addf %11, %13 : vector<32x64xf32>
    %15 = vector.extract_strided_slice %14 {offsets = [0, 0], sizes = [32, 32], strides = [1, 1]} : vector<32x64xf32> to vector<32x32xf32>
    %16 = vector.shape_cast %15 : vector<32x32xf32> to vector<4x8x32xf32>
    %17 = vector.extract_strided_slice %14 {offsets = [0, 32], sizes = [32, 32], strides = [1, 1]} : vector<32x64xf32> to vector<32x32xf32>
    %18 = vector.shape_cast %17 : vector<32x32xf32> to vector<4x8x32xf32>
    %19 = vector.shape_cast %8 : vector<4x8xf32> to vector<4x1x8xf32>
    "tpu.trace_start"() <{level = 10 : i32, message = "lqk,lkh->lqh"}> : () -> ()
    %cst_18 = arith.constant dense<0.000000e+00> : vector<4x1x32xf32>
    %20 = tpu.matmul %19, %3, %cst_18 {dimension_numbers = #tpu.dot_dimension_numbers<[2], [1], [1], [2], [0, 0, 0, 1, 1, 2], [0], [0]>} : vector<4x1x8xf32>, vector<4x8x32xf32>, vector<4x1x32xf32> -> vector<4x1x32xf32>
    "tpu.trace_stop"() : () -> ()
    %21 = vector.shape_cast %20 : vector<4x1x32xf32> to vector<4x32xf32>
    %c0_19 = arith.constant 0 : index
    %c0_20 = arith.constant 0 : index
    %c0_21 = arith.constant 0 : index
    %22 = vector.load %arg8[%c0_19, %c0_20, %c0_21] : memref<4x32x32xf32, #tpu.memory_space<vmem>>, vector<1x32x32xf32>
    %23 = vector.shape_cast %22 : vector<1x32x32xf32> to vector<32x32xf32>
    %c1 = arith.constant 1 : index
    %c0_22 = arith.constant 0 : index
    %c0_23 = arith.constant 0 : index
    %24 = vector.load %arg8[%c1, %c0_22, %c0_23] : memref<4x32x32xf32, #tpu.memory_space<vmem>>, vector<1x32x32xf32>
    %25 = vector.shape_cast %24 : vector<1x32x32xf32> to vector<32x32xf32>
    %c0_24 = arith.constant 0 : index
    %c0_25 = arith.constant 0 : index
    %c0_26 = arith.constant 0 : index
    %26 = vector.load %arg9[%c0_24, %c0_25, %c0_26] : memref<4x1x32xf32, #tpu.memory_space<vmem>>, vector<1x1x32xf32>
    %27 = vector.shape_cast %26 : vector<1x1x32xf32> to vector<1x32xf32>
    %c1_27 = arith.constant 1 : index
    %c0_28 = arith.constant 0 : index
    %c0_29 = arith.constant 0 : index
    %28 = vector.load %arg9[%c1_27, %c0_28, %c0_29] : memref<4x1x32xf32, #tpu.memory_space<vmem>>, vector<1x1x32xf32>
    %29 = vector.shape_cast %28 : vector<1x1x32xf32> to vector<1x32xf32>
    %cst_30 = arith.constant dense<0.000000e+00> : vector<4x32xf32>
    %30 = tpu.matmul %1, %23, %cst_30 {dimension_numbers = #tpu.dot_dimension_numbers<[1], [0], [0], [1], [0, 0, 1, 1], [], []>} : vector<4x32xf32>, vector<32x32xf32>, vector<4x32xf32> -> vector<4x32xf32>
    %31 = vector.broadcast %27 : vector<1x32xf32> to vector<4x32xf32>
    %32 = arith.addf %30, %31 : vector<4x32xf32>
    %33 = vector.shape_cast %32 : vector<4x32xf32> to vector<4x1x32xf32>
    "tpu.trace_start"() <{level = 10 : i32, message = "lqe,lke->lqk"}> : () -> ()
    %cst_31 = arith.constant dense<0.000000e+00> : vector<4x1x8xf32>
    %34 = tpu.matmul %33, %16, %cst_31 {dimension_numbers = #tpu.dot_dimension_numbers<[2], [2], [1], [1], [0, 0, 0, 1, 1, 1], [0], [0]>} : vector<4x1x32xf32>, vector<4x8x32xf32>, vector<4x1x8xf32> -> vector<4x1x8xf32>
    "tpu.trace_stop"() : () -> ()
    %35 = vector.shape_cast %34 : vector<4x1x8xf32> to vector<4x8xf32>
    %cst_32 = arith.constant 0.000000e+00 : f32
    %36 = vector.broadcast %cst_32 : f32 to vector<4x8xf32>
    %37 = arith.cmpf ogt, %6, %36 : vector<4x8xf32>
    %cst_33 = arith.constant -1.000000e+20 : f32
    %38 = vector.broadcast %cst_33 : f32 to vector<4x8xf32>
    %39 = arith.select %37, %35, %38 : vector<4x8xi1>, vector<4x8xf32>
    %cst_34 = arith.constant dense<0xFF800000> : vector<4xf32>
    %40 = vector.multi_reduction <maximumf>, %39, %cst_34 [1] : vector<4x8xf32> to vector<4xf32>
    %41 = vector.shape_cast %40 : vector<4xf32> to vector<4x1xf32>
    %42 = vector.broadcast %41 : vector<4x1xf32> to vector<4x8xf32>
    %43 = arith.subf %39, %42 : vector<4x8xf32>
    %44 = math.exp %43 : vector<4x8xf32>
    %cst_35 = arith.constant dense<0.000000e+00> : vector<4xf32>
    %45 = vector.multi_reduction <add>, %44, %cst_35 [1] : vector<4x8xf32> to vector<4xf32>
    %46 = vector.shape_cast %45 : vector<4xf32> to vector<4x1xf32>
    %47 = vector.broadcast %46 : vector<4x1xf32> to vector<4x8xf32>
    %48 = arith.divf %44, %47 : vector<4x8xf32>
    %49 = vector.shape_cast %48 : vector<4x8xf32> to vector<4x1x8xf32>
    "tpu.trace_start"() <{level = 10 : i32, message = "lqk,lkh->lqh"}> : () -> ()
    %cst_36 = arith.constant dense<0.000000e+00> : vector<4x1x32xf32>
    %50 = tpu.matmul %49, %3, %cst_36 {dimension_numbers = #tpu.dot_dimension_numbers<[2], [1], [1], [2], [0, 0, 0, 1, 1, 2], [0], [0]>} : vector<4x1x8xf32>, vector<4x8x32xf32>, vector<4x1x32xf32> -> vector<4x1x32xf32>
    "tpu.trace_stop"() : () -> ()
    %51 = vector.shape_cast %50 : vector<4x1x32xf32> to vector<4x32xf32>
    %cst_37 = arith.constant dense<0.000000e+00> : vector<4x32xf32>
    %52 = tpu.matmul %51, %25, %cst_37 {dimension_numbers = #tpu.dot_dimension_numbers<[1], [0], [0], [1], [0, 0, 1, 1], [], []>} : vector<4x32xf32>, vector<32x32xf32>, vector<4x32xf32> -> vector<4x32xf32>
    %53 = vector.broadcast %29 : vector<1x32xf32> to vector<4x32xf32>
    %54 = arith.addf %52, %53 : vector<4x32xf32>
    %c0_38 = arith.constant 0 : index
    %c0_39 = arith.constant 0 : index
    %c0_40 = arith.constant 0 : index
    %55 = vector.load %arg10[%c0_38, %c0_39, %c0_40] : memref<2x1x32xf32, #tpu.memory_space<vmem>>, vector<1x1x32xf32>
    %56 = vector.shape_cast %55 : vector<1x1x32xf32> to vector<1x32xf32>
    %57 = vector.extract_strided_slice %21 {offsets = [0, 0], sizes = [3, 32], strides = [1, 1]} : vector<4x32xf32> to vector<3x32xf32>
    %58 = tpu.concatenate %56, %57 in 0 : vector<1x32xf32>, vector<3x32xf32> -> vector<4x32xf32>
    %c0_41 = arith.constant 0 : index
    %c0_42 = arith.constant 0 : index
    %c0_43 = arith.constant 0 : index
    %59 = vector.load %arg11[%c0_41, %c0_42, %c0_43] : memref<2x4x32xf32, #tpu.memory_space<vmem>>, vector<1x4x32xf32>
    %60 = vector.shape_cast %59 : vector<1x4x32xf32> to vector<4x32xf32>
    %61 = arith.addf %58, %60 : vector<4x32xf32>
    %c0_44 = arith.constant 0 : index
    %c0_45 = arith.constant 0 : index
    %c0_46 = arith.constant 0 : index
    %62 = vector.load %arg12[%c0_44, %c0_45, %c0_46] : memref<4x32x96xf32, #tpu.memory_space<vmem>>, vector<1x32x96xf32>
    %63 = vector.shape_cast %62 : vector<1x32x96xf32> to vector<32x96xf32>
    %cst_47 = arith.constant dense<0.000000e+00> : vector<4x96xf32>
    %64 = tpu.matmul %61, %63, %cst_47 {dimension_numbers = #tpu.dot_dimension_numbers<[1], [0], [0], [1], [0, 0, 1, 1], [], []>} : vector<4x32xf32>, vector<32x96xf32>, vector<4x96xf32> -> vector<4x96xf32>
    %c0_48 = arith.constant 0 : index
    %c0_49 = arith.constant 0 : index
    %c0_50 = arith.constant 0 : index
    %65 = vector.load %arg13[%c0_48, %c0_49, %c0_50] : memref<4x1x96xf32, #tpu.memory_space<vmem>>, vector<1x1x96xf32>
    %66 = vector.shape_cast %65 : vector<1x1x96xf32> to vector<1x96xf32>
    %67 = vector.broadcast %66 : vector<1x96xf32> to vector<4x96xf32>
    %68 = arith.addf %64, %67 : vector<4x96xf32>
    %c0_51 = arith.constant 0 : index
    %c0_52 = arith.constant 0 : index
    %c0_53 = arith.constant 0 : index
    %69 = vector.load %arg14[%c0_51, %c0_52, %c0_53] : memref<4x32x32xf32, #tpu.memory_space<vmem>>, vector<1x32x32xf32>
    %70 = vector.shape_cast %69 : vector<1x32x32xf32> to vector<32x32xf32>
    %cst_54 = arith.constant 0.000000e+00 : f32
    %71 = vector.broadcast %cst_54 : f32 to vector<4x32xf32>
    %72 = vector.extract_strided_slice %68 {offsets = [0, 0], sizes = [4, 8], strides = [1, 1]} : vector<4x96xf32> to vector<4x8xf32>
    %cst_55 = arith.constant 0.353553385 : f32
    %73 = vector.broadcast %cst_55 : f32 to vector<4x8xf32>
    %74 = arith.mulf %72, %73 : vector<4x8xf32>
    %75 = vector.extract_strided_slice %68 {offsets = [0, 32], sizes = [4, 8], strides = [1, 1]} : vector<4x96xf32> to vector<4x8xf32>
    %76 = vector.extract_strided_slice %68 {offsets = [0, 64], sizes = [4, 8], strides = [1, 1]} : vector<4x96xf32> to vector<4x8xf32>
    %cst_56 = arith.constant dense<0.000000e+00> : vector<4x4xf32>
    %77 = tpu.matmul %74, %75, %cst_56 {dimension_numbers = #tpu.dot_dimension_numbers<[1], [1], [0], [0], [0, 0, 1, 0], [], []>} : vector<4x8xf32>, vector<4x8xf32>, vector<4x4xf32> -> vector<4x4xf32>
    %78 = arith.addf %77, %9 : vector<4x4xf32>
    %cst_57 = arith.constant dense<0xFF800000> : vector<4xf32>
    %79 = vector.multi_reduction <maximumf>, %78, %cst_57 [1] : vector<4x4xf32> to vector<4xf32>
    %80 = vector.shape_cast %79 : vector<4xf32> to vector<4x1xf32>
    %81 = vector.broadcast %80 : vector<4x1xf32> to vector<4x4xf32>
    %82 = arith.subf %78, %81 : vector<4x4xf32>
    %83 = math.exp %82 : vector<4x4xf32>
    %cst_58 = arith.constant dense<0.000000e+00> : vector<4xf32>
    %84 = vector.multi_reduction <add>, %83, %cst_58 [1] : vector<4x4xf32> to vector<4xf32>
    %85 = vector.shape_cast %84 : vector<4xf32> to vector<4x1xf32>
    %86 = vector.broadcast %85 : vector<4x1xf32> to vector<4x4xf32>
    %87 = arith.divf %83, %86 : vector<4x4xf32>
    %cst_59 = arith.constant dense<0.000000e+00> : vector<4x8xf32>
    %88 = tpu.matmul %87, %76, %cst_59 {dimension_numbers = #tpu.dot_dimension_numbers<[1], [0], [0], [1], [0, 0, 1, 1], [], []>} : vector<4x4xf32>, vector<4x8xf32>, vector<4x8xf32> -> vector<4x8xf32>
    %89 = vector.extract_strided_slice %70 {offsets = [0, 0], sizes = [8, 32], strides = [1, 1]} : vector<32x32xf32> to vector<8x32xf32>
    %cst_60 = arith.constant dense<0.000000e+00> : vector<4x32xf32>
    %90 = tpu.matmul %88, %89, %cst_60 {dimension_numbers = #tpu.dot_dimension_numbers<[1], [0], [0], [1], [0, 0, 1, 1], [], []>} : vector<4x8xf32>, vector<8x32xf32>, vector<4x32xf32> -> vector<4x32xf32>
    %91 = arith.addf %71, %90 : vector<4x32xf32>
    %92 = vector.extract_strided_slice %68 {offsets = [0, 8], sizes = [4, 8], strides = [1, 1]} : vector<4x96xf32> to vector<4x8xf32>
    %cst_61 = arith.constant 0.353553385 : f32
    %93 = vector.broadcast %cst_61 : f32 to vector<4x8xf32>
    %94 = arith.mulf %92, %93 : vector<4x8xf32>
    %95 = vector.extract_strided_slice %68 {offsets = [0, 40], sizes = [4, 8], strides = [1, 1]} : vector<4x96xf32> to vector<4x8xf32>
    %96 = vector.extract_strided_slice %68 {offsets = [0, 72], sizes = [4, 8], strides = [1, 1]} : vector<4x96xf32> to vector<4x8xf32>
    %cst_62 = arith.constant dense<0.000000e+00> : vector<4x4xf32>
    %97 = tpu.matmul %94, %95, %cst_62 {dimension_numbers = #tpu.dot_dimension_numbers<[1], [1], [0], [0], [0, 0, 1, 0], [], []>} : vector<4x8xf32>, vector<4x8xf32>, vector<4x4xf32> -> vector<4x4xf32>
    %98 = arith.addf %97, %9 : vector<4x4xf32>
    %cst_63 = arith.constant dense<0xFF800000> : vector<4xf32>
    %99 = vector.multi_reduction <maximumf>, %98, %cst_63 [1] : vector<4x4xf32> to vector<4xf32>
    %100 = vector.shape_cast %99 : vector<4xf32> to vector<4x1xf32>
    %101 = vector.broadcast %100 : vector<4x1xf32> to vector<4x4xf32>
    %102 = arith.subf %98, %101 : vector<4x4xf32>
    %103 = math.exp %102 : vector<4x4xf32>
    %cst_64 = arith.constant dense<0.000000e+00> : vector<4xf32>
    %104 = vector.multi_reduction <add>, %103, %cst_64 [1] : vector<4x4xf32> to vector<4xf32>
    %105 = vector.shape_cast %104 : vector<4xf32> to vector<4x1xf32>
    %106 = vector.broadcast %105 : vector<4x1xf32> to vector<4x4xf32>
    %107 = arith.divf %103, %106 : vector<4x4xf32>
    %cst_65 = arith.constant dense<0.000000e+00> : vector<4x8xf32>
    %108 = tpu.matmul %107, %96, %cst_65 {dimension_numbers = #tpu.dot_dimension_numbers<[1], [0], [0], [1], [0, 0, 1, 1], [], []>} : vector<4x4xf32>, vector<4x8xf32>, vector<4x8xf32> -> vector<4x8xf32>
    %109 = vector.extract_strided_slice %70 {offsets = [8, 0], sizes = [8, 32], strides = [1, 1]} : vector<32x32xf32> to vector<8x32xf32>
    %cst_66 = arith.constant dense<0.000000e+00> : vector<4x32xf32>
    %110 = tpu.matmul %108, %109, %cst_66 {dimension_numbers = #tpu.dot_dimension_numbers<[1], [0], [0], [1], [0, 0, 1, 1], [], []>} : vector<4x8xf32>, vector<8x32xf32>, vector<4x32xf32> -> vector<4x32xf32>
    %111 = arith.addf %91, %110 : vector<4x32xf32>
    %112 = vector.extract_strided_slice %68 {offsets = [0, 16], sizes = [4, 8], strides = [1, 1]} : vector<4x96xf32> to vector<4x8xf32>
    %cst_67 = arith.constant 0.353553385 : f32
    %113 = vector.broadcast %cst_67 : f32 to vector<4x8xf32>
    %114 = arith.mulf %112, %113 : vector<4x8xf32>
    %115 = vector.extract_strided_slice %68 {offsets = [0, 48], sizes = [4, 8], strides = [1, 1]} : vector<4x96xf32> to vector<4x8xf32>
    %116 = vector.extract_strided_slice %68 {offsets = [0, 80], sizes = [4, 8], strides = [1, 1]} : vector<4x96xf32> to vector<4x8xf32>
    %cst_68 = arith.constant dense<0.000000e+00> : vector<4x4xf32>
    %117 = tpu.matmul %114, %115, %cst_68 {dimension_numbers = #tpu.dot_dimension_numbers<[1], [1], [0], [0], [0, 0, 1, 0], [], []>} : vector<4x8xf32>, vector<4x8xf32>, vector<4x4xf32> -> vector<4x4xf32>
    %118 = arith.addf %117, %9 : vector<4x4xf32>
    %cst_69 = arith.constant dense<0xFF800000> : vector<4xf32>
    %119 = vector.multi_reduction <maximumf>, %118, %cst_69 [1] : vector<4x4xf32> to vector<4xf32>
    %120 = vector.shape_cast %119 : vector<4xf32> to vector<4x1xf32>
    %121 = vector.broadcast %120 : vector<4x1xf32> to vector<4x4xf32>
    %122 = arith.subf %118, %121 : vector<4x4xf32>
    %123 = math.exp %122 : vector<4x4xf32>
    %cst_70 = arith.constant dense<0.000000e+00> : vector<4xf32>
    %124 = vector.multi_reduction <add>, %123, %cst_70 [1] : vector<4x4xf32> to vector<4xf32>
    %125 = vector.shape_cast %124 : vector<4xf32> to vector<4x1xf32>
    %126 = vector.broadcast %125 : vector<4x1xf32> to vector<4x4xf32>
    %127 = arith.divf %123, %126 : vector<4x4xf32>
    %cst_71 = arith.constant dense<0.000000e+00> : vector<4x8xf32>
    %128 = tpu.matmul %127, %116, %cst_71 {dimension_numbers = #tpu.dot_dimension_numbers<[1], [0], [0], [1], [0, 0, 1, 1], [], []>} : vector<4x4xf32>, vector<4x8xf32>, vector<4x8xf32> -> vector<4x8xf32>
    %129 = vector.extract_strided_slice %70 {offsets = [16, 0], sizes = [8, 32], strides = [1, 1]} : vector<32x32xf32> to vector<8x32xf32>
    %cst_72 = arith.constant dense<0.000000e+00> : vector<4x32xf32>
    %130 = tpu.matmul %128, %129, %cst_72 {dimension_numbers = #tpu.dot_dimension_numbers<[1], [0], [0], [1], [0, 0, 1, 1], [], []>} : vector<4x8xf32>, vector<8x32xf32>, vector<4x32xf32> -> vector<4x32xf32>
    %131 = arith.addf %111, %130 : vector<4x32xf32>
    %132 = vector.extract_strided_slice %68 {offsets = [0, 24], sizes = [4, 8], strides = [1, 1]} : vector<4x96xf32> to vector<4x8xf32>
    %cst_73 = arith.constant 0.353553385 : f32
    %133 = vector.broadcast %cst_73 : f32 to vector<4x8xf32>
    %134 = arith.mulf %132, %133 : vector<4x8xf32>
    %135 = vector.extract_strided_slice %68 {offsets = [0, 56], sizes = [4, 8], strides = [1, 1]} : vector<4x96xf32> to vector<4x8xf32>
    %136 = vector.extract_strided_slice %68 {offsets = [0, 88], sizes = [4, 8], strides = [1, 1]} : vector<4x96xf32> to vector<4x8xf32>
    %cst_74 = arith.constant dense<0.000000e+00> : vector<4x4xf32>
    %137 = tpu.matmul %134, %135, %cst_74 {dimension_numbers = #tpu.dot_dimension_numbers<[1], [1], [0], [0], [0, 0, 1, 0], [], []>} : vector<4x8xf32>, vector<4x8xf32>, vector<4x4xf32> -> vector<4x4xf32>
    %138 = arith.addf %137, %9 : vector<4x4xf32>
    %cst_75 = arith.constant dense<0xFF800000> : vector<4xf32>
    %139 = vector.multi_reduction <maximumf>, %138, %cst_75 [1] : vector<4x4xf32> to vector<4xf32>
    %140 = vector.shape_cast %139 : vector<4xf32> to vector<4x1xf32>
    %141 = vector.broadcast %140 : vector<4x1xf32> to vector<4x4xf32>
    %142 = arith.subf %138, %141 : vector<4x4xf32>
    %143 = math.exp %142 : vector<4x4xf32>
    %cst_76 = arith.constant dense<0.000000e+00> : vector<4xf32>
    %144 = vector.multi_reduction <add>, %143, %cst_76 [1] : vector<4x4xf32> to vector<4xf32>
    %145 = vector.shape_cast %144 : vector<4xf32> to vector<4x1xf32>
    %146 = vector.broadcast %145 : vector<4x1xf32> to vector<4x4xf32>
    %147 = arith.divf %143, %146 : vector<4x4xf32>
    %cst_77 = arith.constant dense<0.000000e+00> : vector<4x8xf32>
    %148 = tpu.matmul %147, %136, %cst_77 {dimension_numbers = #tpu.dot_dimension_numbers<[1], [0], [0], [1], [0, 0, 1, 1], [], []>} : vector<4x4xf32>, vector<4x8xf32>, vector<4x8xf32> -> vector<4x8xf32>
    %149 = vector.extract_strided_slice %70 {offsets = [24, 0], sizes = [8, 32], strides = [1, 1]} : vector<32x32xf32> to vector<8x32xf32>
    %cst_78 = arith.constant dense<0.000000e+00> : vector<4x32xf32>
    %150 = tpu.matmul %148, %149, %cst_78 {dimension_numbers = #tpu.dot_dimension_numbers<[1], [0], [0], [1], [0, 0, 1, 1], [], []>} : vector<4x8xf32>, vector<8x32xf32>, vector<4x32xf32> -> vector<4x32xf32>
    %151 = arith.addf %131, %150 : vector<4x32xf32>
    %c0_79 = arith.constant 0 : index
    %c0_80 = arith.constant 0 : index
    %c0_81 = arith.constant 0 : index
    %152 = vector.load %arg15[%c0_79, %c0_80, %c0_81] : memref<4x1x32xf32, #tpu.memory_space<vmem>>, vector<1x1x32xf32>
    %153 = vector.shape_cast %152 : vector<1x1x32xf32> to vector<1x32xf32>
    %154 = vector.broadcast %153 : vector<1x32xf32> to vector<4x32xf32>
    %155 = arith.addf %151, %154 : vector<4x32xf32>
    %156 = arith.addf %61, %155 : vector<4x32xf32>
    %c0_82 = arith.constant 0 : index
    %c0_83 = arith.constant 0 : index
    %c0_84 = arith.constant 0 : index
    %157 = vector.load %arg20[%c0_82, %c0_83, %c0_84] : memref<16x1x32xf32, #tpu.memory_space<vmem>>, vector<1x1x32xf32>
    %158 = vector.shape_cast %157 : vector<1x1x32xf32> to vector<1x32xf32>
    %c1_85 = arith.constant 1 : index
    %c0_86 = arith.constant 0 : index
    %c0_87 = arith.constant 0 : index
    %159 = vector.load %arg20[%c1_85, %c0_86, %c0_87] : memref<16x1x32xf32, #tpu.memory_space<vmem>>, vector<1x1x32xf32>
    %160 = vector.shape_cast %159 : vector<1x1x32xf32> to vector<1x32xf32>
    %cst_88 = arith.constant dense<0.000000e+00> : vector<4xf32>
    %161 = vector.multi_reduction <add>, %156, %cst_88 [1] : vector<4x32xf32> to vector<4xf32>
    %162 = vector.shape_cast %161 : vector<4xf32> to vector<4x1xf32>
    %cst_89 = arith.constant 3.200000e+01 : f32
    %163 = vector.broadcast %cst_89 : f32 to vector<4x1xf32>
    %164 = arith.divf %162, %163 : vector<4x1xf32>
    %165 = vector.broadcast %164 : vector<4x1xf32> to vector<4x32xf32>
    %166 = arith.subf %156, %165 : vector<4x32xf32>
    %167 = arith.mulf %166, %166 : vector<4x32xf32>
    %cst_90 = arith.constant dense<0.000000e+00> : vector<4xf32>
    %168 = vector.multi_reduction <add>, %167, %cst_90 [1] : vector<4x32xf32> to vector<4xf32>
    %169 = vector.shape_cast %168 : vector<4xf32> to vector<4x1xf32>
    %cst_91 = arith.constant 3.200000e+01 : f32
    %170 = vector.broadcast %cst_91 : f32 to vector<4x1xf32>
    %171 = arith.divf %169, %170 : vector<4x1xf32>
    %cst_92 = arith.constant 9.99999974E-6 : f32
    %172 = vector.broadcast %cst_92 : f32 to vector<4x1xf32>
    %173 = arith.addf %171, %172 : vector<4x1xf32>
    %174 = math.rsqrt %173 : vector<4x1xf32>
    %175 = vector.broadcast %174 : vector<4x1xf32> to vector<4x32xf32>
    %176 = arith.mulf %166, %175 : vector<4x32xf32>
    %177 = vector.broadcast %158 : vector<1x32xf32> to vector<4x32xf32>
    %178 = arith.mulf %176, %177 : vector<4x32xf32>
    %179 = vector.broadcast %160 : vector<1x32xf32> to vector<4x32xf32>
    %180 = arith.addf %178, %179 : vector<4x32xf32>
    %c0_93 = arith.constant 0 : index
    %c0_94 = arith.constant 0 : index
    %c0_95 = arith.constant 0 : index
    %181 = vector.load %arg16[%c0_93, %c0_94, %c0_95] : memref<4x32x64xf32, #tpu.memory_space<vmem>>, vector<1x32x64xf32>
    %182 = vector.shape_cast %181 : vector<1x32x64xf32> to vector<32x64xf32>
    %cst_96 = arith.constant dense<0.000000e+00> : vector<4x64xf32>
    %183 = tpu.matmul %180, %182, %cst_96 {dimension_numbers = #tpu.dot_dimension_numbers<[1], [0], [0], [1], [0, 0, 1, 1], [], []>} : vector<4x32xf32>, vector<32x64xf32>, vector<4x64xf32> -> vector<4x64xf32>
    %c0_97 = arith.constant 0 : index
    %c0_98 = arith.constant 0 : index
    %c0_99 = arith.constant 0 : index
    %184 = vector.load %arg17[%c0_97, %c0_98, %c0_99] : memref<4x1x64xf32, #tpu.memory_space<vmem>>, vector<1x1x64xf32>
    %185 = vector.shape_cast %184 : vector<1x1x64xf32> to vector<1x64xf32>
    %186 = vector.broadcast %185 : vector<1x64xf32> to vector<4x64xf32>
    %187 = arith.addf %183, %186 : vector<4x64xf32>
    %188 = arith.mulf %187, %187 : vector<4x64xf32>
    %189 = arith.mulf %187, %188 : vector<4x64xf32>
    %cst_100 = arith.constant 4.471500e-02 : f32
    %190 = vector.broadcast %cst_100 : f32 to vector<4x64xf32>
    %191 = arith.mulf %190, %189 : vector<4x64xf32>
    %192 = arith.addf %187, %191 : vector<4x64xf32>
    %cst_101 = arith.constant 0.797884583 : f32
    %193 = vector.broadcast %cst_101 : f32 to vector<4x64xf32>
    %194 = arith.mulf %193, %192 : vector<4x64xf32>
    %195 = math.tanh %194 : vector<4x64xf32>
    %cst_102 = arith.constant 1.000000e+00 : f32
    %196 = vector.broadcast %cst_102 : f32 to vector<4x64xf32>
    %197 = arith.addf %196, %195 : vector<4x64xf32>
    %cst_103 = arith.constant 5.000000e-01 : f32
    %198 = vector.broadcast %cst_103 : f32 to vector<4x64xf32>
    %199 = arith.mulf %198, %197 : vector<4x64xf32>
    %200 = arith.mulf %187, %199 : vector<4x64xf32>
    %c0_104 = arith.constant 0 : index
    %c0_105 = arith.constant 0 : index
    %c0_106 = arith.constant 0 : index
    %201 = vector.load %arg18[%c0_104, %c0_105, %c0_106] : memref<4x64x32xf32, #tpu.memory_space<vmem>>, vector<1x64x32xf32>
    %202 = vector.shape_cast %201 : vector<1x64x32xf32> to vector<64x32xf32>
    %cst_107 = arith.constant dense<0.000000e+00> : vector<4x32xf32>
    %203 = tpu.matmul %200, %202, %cst_107 {dimension_numbers = #tpu.dot_dimension_numbers<[1], [0], [0], [1], [0, 0, 1, 1], [], []>} : vector<4x64xf32>, vector<64x32xf32>, vector<4x32xf32> -> vector<4x32xf32>
    %c0_108 = arith.constant 0 : index
    %c0_109 = arith.constant 0 : index
    %c0_110 = arith.constant 0 : index
    %204 = vector.load %arg19[%c0_108, %c0_109, %c0_110] : memref<4x1x32xf32, #tpu.memory_space<vmem>>, vector<1x1x32xf32>
    %205 = vector.shape_cast %204 : vector<1x1x32xf32> to vector<1x32xf32>
    %206 = vector.broadcast %205 : vector<1x32xf32> to vector<4x32xf32>
    %207 = arith.addf %203, %206 : vector<4x32xf32>
    %208 = arith.addf %180, %207 : vector<4x32xf32>
    %c2 = arith.constant 2 : index
    %c0_111 = arith.constant 0 : index
    %c0_112 = arith.constant 0 : index
    %209 = vector.load %arg20[%c2, %c0_111, %c0_112] : memref<16x1x32xf32, #tpu.memory_space<vmem>>, vector<1x1x32xf32>
    %210 = vector.shape_cast %209 : vector<1x1x32xf32> to vector<1x32xf32>
    %c3 = arith.constant 3 : index
    %c0_113 = arith.constant 0 : index
    %c0_114 = arith.constant 0 : index
    %211 = vector.load %arg20[%c3, %c0_113, %c0_114] : memref<16x1x32xf32, #tpu.memory_space<vmem>>, vector<1x1x32xf32>
    %212 = vector.shape_cast %211 : vector<1x1x32xf32> to vector<1x32xf32>
    %cst_115 = arith.constant dense<0.000000e+00> : vector<4xf32>
    %213 = vector.multi_reduction <add>, %208, %cst_115 [1] : vector<4x32xf32> to vector<4xf32>
    %214 = vector.shape_cast %213 : vector<4xf32> to vector<4x1xf32>
    %cst_116 = arith.constant 3.200000e+01 : f32
    %215 = vector.broadcast %cst_116 : f32 to vector<4x1xf32>
    %216 = arith.divf %214, %215 : vector<4x1xf32>
    %217 = vector.broadcast %216 : vector<4x1xf32> to vector<4x32xf32>
    %218 = arith.subf %208, %217 : vector<4x32xf32>
    %219 = arith.mulf %218, %218 : vector<4x32xf32>
    %cst_117 = arith.constant dense<0.000000e+00> : vector<4xf32>
    %220 = vector.multi_reduction <add>, %219, %cst_117 [1] : vector<4x32xf32> to vector<4xf32>
    %221 = vector.shape_cast %220 : vector<4xf32> to vector<4x1xf32>
    %cst_118 = arith.constant 3.200000e+01 : f32
    %222 = vector.broadcast %cst_118 : f32 to vector<4x1xf32>
    %223 = arith.divf %221, %222 : vector<4x1xf32>
    %cst_119 = arith.constant 9.99999974E-6 : f32
    %224 = vector.broadcast %cst_119 : f32 to vector<4x1xf32>
    %225 = arith.addf %223, %224 : vector<4x1xf32>
    %226 = math.rsqrt %225 : vector<4x1xf32>
    %227 = vector.broadcast %226 : vector<4x1xf32> to vector<4x32xf32>
    %228 = arith.mulf %218, %227 : vector<4x32xf32>
    %229 = vector.broadcast %210 : vector<1x32xf32> to vector<4x32xf32>
    %230 = arith.mulf %228, %229 : vector<4x32xf32>
    %231 = vector.broadcast %212 : vector<1x32xf32> to vector<4x32xf32>
    %232 = arith.addf %230, %231 : vector<4x32xf32>
    %c1_120 = arith.constant 1 : index
    %c0_121 = arith.constant 0 : index
    %c0_122 = arith.constant 0 : index
    %233 = vector.load %arg12[%c1_120, %c0_121, %c0_122] : memref<4x32x96xf32, #tpu.memory_space<vmem>>, vector<1x32x96xf32>
    %234 = vector.shape_cast %233 : vector<1x32x96xf32> to vector<32x96xf32>
    %cst_123 = arith.constant dense<0.000000e+00> : vector<4x96xf32>
    %235 = tpu.matmul %232, %234, %cst_123 {dimension_numbers = #tpu.dot_dimension_numbers<[1], [0], [0], [1], [0, 0, 1, 1], [], []>} : vector<4x32xf32>, vector<32x96xf32>, vector<4x96xf32> -> vector<4x96xf32>
    %c1_124 = arith.constant 1 : index
    %c0_125 = arith.constant 0 : index
    %c0_126 = arith.constant 0 : index
    %236 = vector.load %arg13[%c1_124, %c0_125, %c0_126] : memref<4x1x96xf32, #tpu.memory_space<vmem>>, vector<1x1x96xf32>
    %237 = vector.shape_cast %236 : vector<1x1x96xf32> to vector<1x96xf32>
    %238 = vector.broadcast %237 : vector<1x96xf32> to vector<4x96xf32>
    %239 = arith.addf %235, %238 : vector<4x96xf32>
    %c1_127 = arith.constant 1 : index
    %c0_128 = arith.constant 0 : index
    %c0_129 = arith.constant 0 : index
    %240 = vector.load %arg14[%c1_127, %c0_128, %c0_129] : memref<4x32x32xf32, #tpu.memory_space<vmem>>, vector<1x32x32xf32>
    %241 = vector.shape_cast %240 : vector<1x32x32xf32> to vector<32x32xf32>
    %cst_130 = arith.constant 0.000000e+00 : f32
    %242 = vector.broadcast %cst_130 : f32 to vector<4x32xf32>
    %243 = vector.extract_strided_slice %239 {offsets = [0, 0], sizes = [4, 8], strides = [1, 1]} : vector<4x96xf32> to vector<4x8xf32>
    %cst_131 = arith.constant 0.353553385 : f32
    %244 = vector.broadcast %cst_131 : f32 to vector<4x8xf32>
    %245 = arith.mulf %243, %244 : vector<4x8xf32>
    %246 = vector.extract_strided_slice %239 {offsets = [0, 32], sizes = [4, 8], strides = [1, 1]} : vector<4x96xf32> to vector<4x8xf32>
    %247 = vector.extract_strided_slice %239 {offsets = [0, 64], sizes = [4, 8], strides = [1, 1]} : vector<4x96xf32> to vector<4x8xf32>
    %cst_132 = arith.constant dense<0.000000e+00> : vector<4x4xf32>
    %248 = tpu.matmul %245, %246, %cst_132 {dimension_numbers = #tpu.dot_dimension_numbers<[1], [1], [0], [0], [0, 0, 1, 0], [], []>} : vector<4x8xf32>, vector<4x8xf32>, vector<4x4xf32> -> vector<4x4xf32>
    %249 = arith.addf %248, %9 : vector<4x4xf32>
    %cst_133 = arith.constant dense<0xFF800000> : vector<4xf32>
    %250 = vector.multi_reduction <maximumf>, %249, %cst_133 [1] : vector<4x4xf32> to vector<4xf32>
    %251 = vector.shape_cast %250 : vector<4xf32> to vector<4x1xf32>
    %252 = vector.broadcast %251 : vector<4x1xf32> to vector<4x4xf32>
    %253 = arith.subf %249, %252 : vector<4x4xf32>
    %254 = math.exp %253 : vector<4x4xf32>
    %cst_134 = arith.constant dense<0.000000e+00> : vector<4xf32>
    %255 = vector.multi_reduction <add>, %254, %cst_134 [1] : vector<4x4xf32> to vector<4xf32>
    %256 = vector.shape_cast %255 : vector<4xf32> to vector<4x1xf32>
    %257 = vector.broadcast %256 : vector<4x1xf32> to vector<4x4xf32>
    %258 = arith.divf %254, %257 : vector<4x4xf32>
    %cst_135 = arith.constant dense<0.000000e+00> : vector<4x8xf32>
    %259 = tpu.matmul %258, %247, %cst_135 {dimension_numbers = #tpu.dot_dimension_numbers<[1], [0], [0], [1], [0, 0, 1, 1], [], []>} : vector<4x4xf32>, vector<4x8xf32>, vector<4x8xf32> -> vector<4x8xf32>
    %260 = vector.extract_strided_slice %241 {offsets = [0, 0], sizes = [8, 32], strides = [1, 1]} : vector<32x32xf32> to vector<8x32xf32>
    %cst_136 = arith.constant dense<0.000000e+00> : vector<4x32xf32>
    %261 = tpu.matmul %259, %260, %cst_136 {dimension_numbers = #tpu.dot_dimension_numbers<[1], [0], [0], [1], [0, 0, 1, 1], [], []>} : vector<4x8xf32>, vector<8x32xf32>, vector<4x32xf32> -> vector<4x32xf32>
    %262 = arith.addf %242, %261 : vector<4x32xf32>
    %263 = vector.extract_strided_slice %239 {offsets = [0, 8], sizes = [4, 8], strides = [1, 1]} : vector<4x96xf32> to vector<4x8xf32>
    %cst_137 = arith.constant 0.353553385 : f32
    %264 = vector.broadcast %cst_137 : f32 to vector<4x8xf32>
    %265 = arith.mulf %263, %264 : vector<4x8xf32>
    %266 = vector.extract_strided_slice %239 {offsets = [0, 40], sizes = [4, 8], strides = [1, 1]} : vector<4x96xf32> to vector<4x8xf32>
    %267 = vector.extract_strided_slice %239 {offsets = [0, 72], sizes = [4, 8], strides = [1, 1]} : vector<4x96xf32> to vector<4x8xf32>
    %cst_138 = arith.constant dense<0.000000e+00> : vector<4x4xf32>
    %268 = tpu.matmul %265, %266, %cst_138 {dimension_numbers = #tpu.dot_dimension_numbers<[1], [1], [0], [0], [0, 0, 1, 0], [], []>} : vector<4x8xf32>, vector<4x8xf32>, vector<4x4xf32> -> vector<4x4xf32>
    %269 = arith.addf %268, %9 : vector<4x4xf32>
    %cst_139 = arith.constant dense<0xFF800000> : vector<4xf32>
    %270 = vector.multi_reduction <maximumf>, %269, %cst_139 [1] : vector<4x4xf32> to vector<4xf32>
    %271 = vector.shape_cast %270 : vector<4xf32> to vector<4x1xf32>
    %272 = vector.broadcast %271 : vector<4x1xf32> to vector<4x4xf32>
    %273 = arith.subf %269, %272 : vector<4x4xf32>
    %274 = math.exp %273 : vector<4x4xf32>
    %cst_140 = arith.constant dense<0.000000e+00> : vector<4xf32>
    %275 = vector.multi_reduction <add>, %274, %cst_140 [1] : vector<4x4xf32> to vector<4xf32>
    %276 = vector.shape_cast %275 : vector<4xf32> to vector<4x1xf32>
    %277 = vector.broadcast %276 : vector<4x1xf32> to vector<4x4xf32>
    %278 = arith.divf %274, %277 : vector<4x4xf32>
    %cst_141 = arith.constant dense<0.000000e+00> : vector<4x8xf32>
    %279 = tpu.matmul %278, %267, %cst_141 {dimension_numbers = #tpu.dot_dimension_numbers<[1], [0], [0], [1], [0, 0, 1, 1], [], []>} : vector<4x4xf32>, vector<4x8xf32>, vector<4x8xf32> -> vector<4x8xf32>
    %280 = vector.extract_strided_slice %241 {offsets = [8, 0], sizes = [8, 32], strides = [1, 1]} : vector<32x32xf32> to vector<8x32xf32>
    %cst_142 = arith.constant dense<0.000000e+00> : vector<4x32xf32>
    %281 = tpu.matmul %279, %280, %cst_142 {dimension_numbers = #tpu.dot_dimension_numbers<[1], [0], [0], [1], [0, 0, 1, 1], [], []>} : vector<4x8xf32>, vector<8x32xf32>, vector<4x32xf32> -> vector<4x32xf32>
    %282 = arith.addf %262, %281 : vector<4x32xf32>
    %283 = vector.extract_strided_slice %239 {offsets = [0, 16], sizes = [4, 8], strides = [1, 1]} : vector<4x96xf32> to vector<4x8xf32>
    %cst_143 = arith.constant 0.353553385 : f32
    %284 = vector.broadcast %cst_143 : f32 to vector<4x8xf32>
    %285 = arith.mulf %283, %284 : vector<4x8xf32>
    %286 = vector.extract_strided_slice %239 {offsets = [0, 48], sizes = [4, 8], strides = [1, 1]} : vector<4x96xf32> to vector<4x8xf32>
    %287 = vector.extract_strided_slice %239 {offsets = [0, 80], sizes = [4, 8], strides = [1, 1]} : vector<4x96xf32> to vector<4x8xf32>
    %cst_144 = arith.constant dense<0.000000e+00> : vector<4x4xf32>
    %288 = tpu.matmul %285, %286, %cst_144 {dimension_numbers = #tpu.dot_dimension_numbers<[1], [1], [0], [0], [0, 0, 1, 0], [], []>} : vector<4x8xf32>, vector<4x8xf32>, vector<4x4xf32> -> vector<4x4xf32>
    %289 = arith.addf %288, %9 : vector<4x4xf32>
    %cst_145 = arith.constant dense<0xFF800000> : vector<4xf32>
    %290 = vector.multi_reduction <maximumf>, %289, %cst_145 [1] : vector<4x4xf32> to vector<4xf32>
    %291 = vector.shape_cast %290 : vector<4xf32> to vector<4x1xf32>
    %292 = vector.broadcast %291 : vector<4x1xf32> to vector<4x4xf32>
    %293 = arith.subf %289, %292 : vector<4x4xf32>
    %294 = math.exp %293 : vector<4x4xf32>
    %cst_146 = arith.constant dense<0.000000e+00> : vector<4xf32>
    %295 = vector.multi_reduction <add>, %294, %cst_146 [1] : vector<4x4xf32> to vector<4xf32>
    %296 = vector.shape_cast %295 : vector<4xf32> to vector<4x1xf32>
    %297 = vector.broadcast %296 : vector<4x1xf32> to vector<4x4xf32>
    %298 = arith.divf %294, %297 : vector<4x4xf32>
    %cst_147 = arith.constant dense<0.000000e+00> : vector<4x8xf32>
    %299 = tpu.matmul %298, %287, %cst_147 {dimension_numbers = #tpu.dot_dimension_numbers<[1], [0], [0], [1], [0, 0, 1, 1], [], []>} : vector<4x4xf32>, vector<4x8xf32>, vector<4x8xf32> -> vector<4x8xf32>
    %300 = vector.extract_strided_slice %241 {offsets = [16, 0], sizes = [8, 32], strides = [1, 1]} : vector<32x32xf32> to vector<8x32xf32>
    %cst_148 = arith.constant dense<0.000000e+00> : vector<4x32xf32>
    %301 = tpu.matmul %299, %300, %cst_148 {dimension_numbers = #tpu.dot_dimension_numbers<[1], [0], [0], [1], [0, 0, 1, 1], [], []>} : vector<4x8xf32>, vector<8x32xf32>, vector<4x32xf32> -> vector<4x32xf32>
    %302 = arith.addf %282, %301 : vector<4x32xf32>
    %303 = vector.extract_strided_slice %239 {offsets = [0, 24], sizes = [4, 8], strides = [1, 1]} : vector<4x96xf32> to vector<4x8xf32>
    %cst_149 = arith.constant 0.353553385 : f32
    %304 = vector.broadcast %cst_149 : f32 to vector<4x8xf32>
    %305 = arith.mulf %303, %304 : vector<4x8xf32>
    %306 = vector.extract_strided_slice %239 {offsets = [0, 56], sizes = [4, 8], strides = [1, 1]} : vector<4x96xf32> to vector<4x8xf32>
    %307 = vector.extract_strided_slice %239 {offsets = [0, 88], sizes = [4, 8], strides = [1, 1]} : vector<4x96xf32> to vector<4x8xf32>
    %cst_150 = arith.constant dense<0.000000e+00> : vector<4x4xf32>
    %308 = tpu.matmul %305, %306, %cst_150 {dimension_numbers = #tpu.dot_dimension_numbers<[1], [1], [0], [0], [0, 0, 1, 0], [], []>} : vector<4x8xf32>, vector<4x8xf32>, vector<4x4xf32> -> vector<4x4xf32>
    %309 = arith.addf %308, %9 : vector<4x4xf32>
    %cst_151 = arith.constant dense<0xFF800000> : vector<4xf32>
    %310 = vector.multi_reduction <maximumf>, %309, %cst_151 [1] : vector<4x4xf32> to vector<4xf32>
    %311 = vector.shape_cast %310 : vector<4xf32> to vector<4x1xf32>
    %312 = vector.broadcast %311 : vector<4x1xf32> to vector<4x4xf32>
    %313 = arith.subf %309, %312 : vector<4x4xf32>
    %314 = math.exp %313 : vector<4x4xf32>
    %cst_152 = arith.constant dense<0.000000e+00> : vector<4xf32>
    %315 = vector.multi_reduction <add>, %314, %cst_152 [1] : vector<4x4xf32> to vector<4xf32>
    %316 = vector.shape_cast %315 : vector<4xf32> to vector<4x1xf32>
    %317 = vector.broadcast %316 : vector<4x1xf32> to vector<4x4xf32>
    %318 = arith.divf %314, %317 : vector<4x4xf32>
    %cst_153 = arith.constant dense<0.000000e+00> : vector<4x8xf32>
    %319 = tpu.matmul %318, %307, %cst_153 {dimension_numbers = #tpu.dot_dimension_numbers<[1], [0], [0], [1], [0, 0, 1, 1], [], []>} : vector<4x4xf32>, vector<4x8xf32>, vector<4x8xf32> -> vector<4x8xf32>
    %320 = vector.extract_strided_slice %241 {offsets = [24, 0], sizes = [8, 32], strides = [1, 1]} : vector<32x32xf32> to vector<8x32xf32>
    %cst_154 = arith.constant dense<0.000000e+00> : vector<4x32xf32>
    %321 = tpu.matmul %319, %320, %cst_154 {dimension_numbers = #tpu.dot_dimension_numbers<[1], [0], [0], [1], [0, 0, 1, 1], [], []>} : vector<4x8xf32>, vector<8x32xf32>, vector<4x32xf32> -> vector<4x32xf32>
    %322 = arith.addf %302, %321 : vector<4x32xf32>
    %c1_155 = arith.constant 1 : index
    %c0_156 = arith.constant 0 : index
    %c0_157 = arith.constant 0 : index
    %323 = vector.load %arg15[%c1_155, %c0_156, %c0_157] : memref<4x1x32xf32, #tpu.memory_space<vmem>>, vector<1x1x32xf32>
    %324 = vector.shape_cast %323 : vector<1x1x32xf32> to vector<1x32xf32>
    %325 = vector.broadcast %324 : vector<1x32xf32> to vector<4x32xf32>
    %326 = arith.addf %322, %325 : vector<4x32xf32>
    %327 = arith.addf %232, %326 : vector<4x32xf32>
    %c4 = arith.constant 4 : index
    %c0_158 = arith.constant 0 : index
    %c0_159 = arith.constant 0 : index
    %328 = vector.load %arg20[%c4, %c0_158, %c0_159] : memref<16x1x32xf32, #tpu.memory_space<vmem>>, vector<1x1x32xf32>
    %329 = vector.shape_cast %328 : vector<1x1x32xf32> to vector<1x32xf32>
    %c5 = arith.constant 5 : index
    %c0_160 = arith.constant 0 : index
    %c0_161 = arith.constant 0 : index
    %330 = vector.load %arg20[%c5, %c0_160, %c0_161] : memref<16x1x32xf32, #tpu.memory_space<vmem>>, vector<1x1x32xf32>
    %331 = vector.shape_cast %330 : vector<1x1x32xf32> to vector<1x32xf32>
    %cst_162 = arith.constant dense<0.000000e+00> : vector<4xf32>
    %332 = vector.multi_reduction <add>, %327, %cst_162 [1] : vector<4x32xf32> to vector<4xf32>
    %333 = vector.shape_cast %332 : vector<4xf32> to vector<4x1xf32>
    %cst_163 = arith.constant 3.200000e+01 : f32
    %334 = vector.broadcast %cst_163 : f32 to vector<4x1xf32>
    %335 = arith.divf %333, %334 : vector<4x1xf32>
    %336 = vector.broadcast %335 : vector<4x1xf32> to vector<4x32xf32>
    %337 = arith.subf %327, %336 : vector<4x32xf32>
    %338 = arith.mulf %337, %337 : vector<4x32xf32>
    %cst_164 = arith.constant dense<0.000000e+00> : vector<4xf32>
    %339 = vector.multi_reduction <add>, %338, %cst_164 [1] : vector<4x32xf32> to vector<4xf32>
    %340 = vector.shape_cast %339 : vector<4xf32> to vector<4x1xf32>
    %cst_165 = arith.constant 3.200000e+01 : f32
    %341 = vector.broadcast %cst_165 : f32 to vector<4x1xf32>
    %342 = arith.divf %340, %341 : vector<4x1xf32>
    %cst_166 = arith.constant 9.99999974E-6 : f32
    %343 = vector.broadcast %cst_166 : f32 to vector<4x1xf32>
    %344 = arith.addf %342, %343 : vector<4x1xf32>
    %345 = math.rsqrt %344 : vector<4x1xf32>
    %346 = vector.broadcast %345 : vector<4x1xf32> to vector<4x32xf32>
    %347 = arith.mulf %337, %346 : vector<4x32xf32>
    %348 = vector.broadcast %329 : vector<1x32xf32> to vector<4x32xf32>
    %349 = arith.mulf %347, %348 : vector<4x32xf32>
    %350 = vector.broadcast %331 : vector<1x32xf32> to vector<4x32xf32>
    %351 = arith.addf %349, %350 : vector<4x32xf32>
    %c1_167 = arith.constant 1 : index
    %c0_168 = arith.constant 0 : index
    %c0_169 = arith.constant 0 : index
    %352 = vector.load %arg16[%c1_167, %c0_168, %c0_169] : memref<4x32x64xf32, #tpu.memory_space<vmem>>, vector<1x32x64xf32>
    %353 = vector.shape_cast %352 : vector<1x32x64xf32> to vector<32x64xf32>
    %cst_170 = arith.constant dense<0.000000e+00> : vector<4x64xf32>
    %354 = tpu.matmul %351, %353, %cst_170 {dimension_numbers = #tpu.dot_dimension_numbers<[1], [0], [0], [1], [0, 0, 1, 1], [], []>} : vector<4x32xf32>, vector<32x64xf32>, vector<4x64xf32> -> vector<4x64xf32>
    %c1_171 = arith.constant 1 : index
    %c0_172 = arith.constant 0 : index
    %c0_173 = arith.constant 0 : index
    %355 = vector.load %arg17[%c1_171, %c0_172, %c0_173] : memref<4x1x64xf32, #tpu.memory_space<vmem>>, vector<1x1x64xf32>
    %356 = vector.shape_cast %355 : vector<1x1x64xf32> to vector<1x64xf32>
    %357 = vector.broadcast %356 : vector<1x64xf32> to vector<4x64xf32>
    %358 = arith.addf %354, %357 : vector<4x64xf32>
    %359 = arith.mulf %358, %358 : vector<4x64xf32>
    %360 = arith.mulf %358, %359 : vector<4x64xf32>
    %cst_174 = arith.constant 4.471500e-02 : f32
    %361 = vector.broadcast %cst_174 : f32 to vector<4x64xf32>
    %362 = arith.mulf %361, %360 : vector<4x64xf32>
    %363 = arith.addf %358, %362 : vector<4x64xf32>
    %cst_175 = arith.constant 0.797884583 : f32
    %364 = vector.broadcast %cst_175 : f32 to vector<4x64xf32>
    %365 = arith.mulf %364, %363 : vector<4x64xf32>
    %366 = math.tanh %365 : vector<4x64xf32>
    %cst_176 = arith.constant 1.000000e+00 : f32
    %367 = vector.broadcast %cst_176 : f32 to vector<4x64xf32>
    %368 = arith.addf %367, %366 : vector<4x64xf32>
    %cst_177 = arith.constant 5.000000e-01 : f32
    %369 = vector.broadcast %cst_177 : f32 to vector<4x64xf32>
    %370 = arith.mulf %369, %368 : vector<4x64xf32>
    %371 = arith.mulf %358, %370 : vector<4x64xf32>
    %c1_178 = arith.constant 1 : index
    %c0_179 = arith.constant 0 : index
    %c0_180 = arith.constant 0 : index
    %372 = vector.load %arg18[%c1_178, %c0_179, %c0_180] : memref<4x64x32xf32, #tpu.memory_space<vmem>>, vector<1x64x32xf32>
    %373 = vector.shape_cast %372 : vector<1x64x32xf32> to vector<64x32xf32>
    %cst_181 = arith.constant dense<0.000000e+00> : vector<4x32xf32>
    %374 = tpu.matmul %371, %373, %cst_181 {dimension_numbers = #tpu.dot_dimension_numbers<[1], [0], [0], [1], [0, 0, 1, 1], [], []>} : vector<4x64xf32>, vector<64x32xf32>, vector<4x32xf32> -> vector<4x32xf32>
    %c1_182 = arith.constant 1 : index
    %c0_183 = arith.constant 0 : index
    %c0_184 = arith.constant 0 : index
    %375 = vector.load %arg19[%c1_182, %c0_183, %c0_184] : memref<4x1x32xf32, #tpu.memory_space<vmem>>, vector<1x1x32xf32>
    %376 = vector.shape_cast %375 : vector<1x1x32xf32> to vector<1x32xf32>
    %377 = vector.broadcast %376 : vector<1x32xf32> to vector<4x32xf32>
    %378 = arith.addf %374, %377 : vector<4x32xf32>
    %379 = arith.addf %351, %378 : vector<4x32xf32>
    %c6 = arith.constant 6 : index
    %c0_185 = arith.constant 0 : index
    %c0_186 = arith.constant 0 : index
    %380 = vector.load %arg20[%c6, %c0_185, %c0_186] : memref<16x1x32xf32, #tpu.memory_space<vmem>>, vector<1x1x32xf32>
    %381 = vector.shape_cast %380 : vector<1x1x32xf32> to vector<1x32xf32>
    %c7 = arith.constant 7 : index
    %c0_187 = arith.constant 0 : index
    %c0_188 = arith.constant 0 : index
    %382 = vector.load %arg20[%c7, %c0_187, %c0_188] : memref<16x1x32xf32, #tpu.memory_space<vmem>>, vector<1x1x32xf32>
    %383 = vector.shape_cast %382 : vector<1x1x32xf32> to vector<1x32xf32>
    %cst_189 = arith.constant dense<0.000000e+00> : vector<4xf32>
    %384 = vector.multi_reduction <add>, %379, %cst_189 [1] : vector<4x32xf32> to vector<4xf32>
    %385 = vector.shape_cast %384 : vector<4xf32> to vector<4x1xf32>
    %cst_190 = arith.constant 3.200000e+01 : f32
    %386 = vector.broadcast %cst_190 : f32 to vector<4x1xf32>
    %387 = arith.divf %385, %386 : vector<4x1xf32>
    %388 = vector.broadcast %387 : vector<4x1xf32> to vector<4x32xf32>
    %389 = arith.subf %379, %388 : vector<4x32xf32>
    %390 = arith.mulf %389, %389 : vector<4x32xf32>
    %cst_191 = arith.constant dense<0.000000e+00> : vector<4xf32>
    %391 = vector.multi_reduction <add>, %390, %cst_191 [1] : vector<4x32xf32> to vector<4xf32>
    %392 = vector.shape_cast %391 : vector<4xf32> to vector<4x1xf32>
    %cst_192 = arith.constant 3.200000e+01 : f32
    %393 = vector.broadcast %cst_192 : f32 to vector<4x1xf32>
    %394 = arith.divf %392, %393 : vector<4x1xf32>
    %cst_193 = arith.constant 9.99999974E-6 : f32
    %395 = vector.broadcast %cst_193 : f32 to vector<4x1xf32>
    %396 = arith.addf %394, %395 : vector<4x1xf32>
    %397 = math.rsqrt %396 : vector<4x1xf32>
    %398 = vector.broadcast %397 : vector<4x1xf32> to vector<4x32xf32>
    %399 = arith.mulf %389, %398 : vector<4x32xf32>
    %400 = vector.broadcast %381 : vector<1x32xf32> to vector<4x32xf32>
    %401 = arith.mulf %399, %400 : vector<4x32xf32>
    %402 = vector.broadcast %383 : vector<1x32xf32> to vector<4x32xf32>
    %403 = arith.addf %401, %402 : vector<4x32xf32>
    %c0_194 = arith.constant 0 : index
    %c0_195 = arith.constant 0 : index
    %c0_196 = arith.constant 0 : index
    %404 = vector.load %arg21[%c0_194, %c0_195, %c0_196] : memref<4x1x32xf32, #tpu.memory_space<vmem>>, vector<1x1x32xf32>
    %405 = vector.shape_cast %404 : vector<1x1x32xf32> to vector<1x32xf32>
    %c1_197 = arith.constant 1 : index
    %c0_198 = arith.constant 0 : index
    %c0_199 = arith.constant 0 : index
    %406 = vector.load %arg21[%c1_197, %c0_198, %c0_199] : memref<4x1x32xf32, #tpu.memory_space<vmem>>, vector<1x1x32xf32>
    %407 = vector.shape_cast %406 : vector<1x1x32xf32> to vector<1x32xf32>
    %cst_200 = arith.constant dense<0.000000e+00> : vector<4xf32>
    %408 = vector.multi_reduction <add>, %403, %cst_200 [1] : vector<4x32xf32> to vector<4xf32>
    %409 = vector.shape_cast %408 : vector<4xf32> to vector<4x1xf32>
    %cst_201 = arith.constant 3.200000e+01 : f32
    %410 = vector.broadcast %cst_201 : f32 to vector<4x1xf32>
    %411 = arith.divf %409, %410 : vector<4x1xf32>
    %412 = vector.broadcast %411 : vector<4x1xf32> to vector<4x32xf32>
    %413 = arith.subf %403, %412 : vector<4x32xf32>
    %414 = arith.mulf %413, %413 : vector<4x32xf32>
    %cst_202 = arith.constant dense<0.000000e+00> : vector<4xf32>
    %415 = vector.multi_reduction <add>, %414, %cst_202 [1] : vector<4x32xf32> to vector<4xf32>
    %416 = vector.shape_cast %415 : vector<4xf32> to vector<4x1xf32>
    %cst_203 = arith.constant 3.200000e+01 : f32
    %417 = vector.broadcast %cst_203 : f32 to vector<4x1xf32>
    %418 = arith.divf %416, %417 : vector<4x1xf32>
    %cst_204 = arith.constant 9.99999974E-6 : f32
    %419 = vector.broadcast %cst_204 : f32 to vector<4x1xf32>
    %420 = arith.addf %418, %419 : vector<4x1xf32>
    %421 = math.rsqrt %420 : vector<4x1xf32>
    %422 = vector.broadcast %421 : vector<4x1xf32> to vector<4x32xf32>
    %423 = arith.mulf %413, %422 : vector<4x32xf32>
    %424 = vector.broadcast %405 : vector<1x32xf32> to vector<4x32xf32>
    %425 = arith.mulf %423, %424 : vector<4x32xf32>
    %426 = vector.broadcast %407 : vector<1x32xf32> to vector<4x32xf32>
    %427 = arith.addf %425, %426 : vector<4x32xf32>
    %c2_205 = arith.constant 2 : index
    %c0_206 = arith.constant 0 : index
    %c0_207 = arith.constant 0 : index
    %428 = vector.load %arg8[%c2_205, %c0_206, %c0_207] : memref<4x32x32xf32, #tpu.memory_space<vmem>>, vector<1x32x32xf32>
    %429 = vector.shape_cast %428 : vector<1x32x32xf32> to vector<32x32xf32>
    %c3_208 = arith.constant 3 : index
    %c0_209 = arith.constant 0 : index
    %c0_210 = arith.constant 0 : index
    %430 = vector.load %arg8[%c3_208, %c0_209, %c0_210] : memref<4x32x32xf32, #tpu.memory_space<vmem>>, vector<1x32x32xf32>
    %431 = vector.shape_cast %430 : vector<1x32x32xf32> to vector<32x32xf32>
    %c2_211 = arith.constant 2 : index
    %c0_212 = arith.constant 0 : index
    %c0_213 = arith.constant 0 : index
    %432 = vector.load %arg9[%c2_211, %c0_212, %c0_213] : memref<4x1x32xf32, #tpu.memory_space<vmem>>, vector<1x1x32xf32>
    %433 = vector.shape_cast %432 : vector<1x1x32xf32> to vector<1x32xf32>
    %c3_214 = arith.constant 3 : index
    %c0_215 = arith.constant 0 : index
    %c0_216 = arith.constant 0 : index
    %434 = vector.load %arg9[%c3_214, %c0_215, %c0_216] : memref<4x1x32xf32, #tpu.memory_space<vmem>>, vector<1x1x32xf32>
    %435 = vector.shape_cast %434 : vector<1x1x32xf32> to vector<1x32xf32>
    %cst_217 = arith.constant dense<0.000000e+00> : vector<4x32xf32>
    %436 = tpu.matmul %427, %429, %cst_217 {dimension_numbers = #tpu.dot_dimension_numbers<[1], [0], [0], [1], [0, 0, 1, 1], [], []>} : vector<4x32xf32>, vector<32x32xf32>, vector<4x32xf32> -> vector<4x32xf32>
    %437 = vector.broadcast %433 : vector<1x32xf32> to vector<4x32xf32>
    %438 = arith.addf %436, %437 : vector<4x32xf32>
    %439 = vector.shape_cast %438 : vector<4x32xf32> to vector<4x1x32xf32>
    "tpu.trace_start"() <{level = 10 : i32, message = "lqe,lke->lqk"}> : () -> ()
    %cst_218 = arith.constant dense<0.000000e+00> : vector<4x1x8xf32>
    %440 = tpu.matmul %439, %18, %cst_218 {dimension_numbers = #tpu.dot_dimension_numbers<[2], [2], [1], [1], [0, 0, 0, 1, 1, 1], [0], [0]>} : vector<4x1x32xf32>, vector<4x8x32xf32>, vector<4x1x8xf32> -> vector<4x1x8xf32>
    "tpu.trace_stop"() : () -> ()
    %441 = vector.shape_cast %440 : vector<4x1x8xf32> to vector<4x8xf32>
    %cst_219 = arith.constant 0.000000e+00 : f32
    %442 = vector.broadcast %cst_219 : f32 to vector<4x8xf32>
    %443 = arith.cmpf ogt, %6, %442 : vector<4x8xf32>
    %cst_220 = arith.constant -1.000000e+20 : f32
    %444 = vector.broadcast %cst_220 : f32 to vector<4x8xf32>
    %445 = arith.select %443, %441, %444 : vector<4x8xi1>, vector<4x8xf32>
    %cst_221 = arith.constant dense<0xFF800000> : vector<4xf32>
    %446 = vector.multi_reduction <maximumf>, %445, %cst_221 [1] : vector<4x8xf32> to vector<4xf32>
    %447 = vector.shape_cast %446 : vector<4xf32> to vector<4x1xf32>
    %448 = vector.broadcast %447 : vector<4x1xf32> to vector<4x8xf32>
    %449 = arith.subf %445, %448 : vector<4x8xf32>
    %450 = math.exp %449 : vector<4x8xf32>
    %cst_222 = arith.constant dense<0.000000e+00> : vector<4xf32>
    %451 = vector.multi_reduction <add>, %450, %cst_222 [1] : vector<4x8xf32> to vector<4xf32>
    %452 = vector.shape_cast %451 : vector<4xf32> to vector<4x1xf32>
    %453 = vector.broadcast %452 : vector<4x1xf32> to vector<4x8xf32>
    %454 = arith.divf %450, %453 : vector<4x8xf32>
    %455 = vector.shape_cast %454 : vector<4x8xf32> to vector<4x1x8xf32>
    "tpu.trace_start"() <{level = 10 : i32, message = "lqk,lkh->lqh"}> : () -> ()
    %cst_223 = arith.constant dense<0.000000e+00> : vector<4x1x32xf32>
    %456 = tpu.matmul %455, %3, %cst_223 {dimension_numbers = #tpu.dot_dimension_numbers<[2], [1], [1], [2], [0, 0, 0, 1, 1, 2], [0], [0]>} : vector<4x1x8xf32>, vector<4x8x32xf32>, vector<4x1x32xf32> -> vector<4x1x32xf32>
    "tpu.trace_stop"() : () -> ()
    %457 = vector.shape_cast %456 : vector<4x1x32xf32> to vector<4x32xf32>
    %cst_224 = arith.constant dense<0.000000e+00> : vector<4x32xf32>
    %458 = tpu.matmul %457, %431, %cst_224 {dimension_numbers = #tpu.dot_dimension_numbers<[1], [0], [0], [1], [0, 0, 1, 1], [], []>} : vector<4x32xf32>, vector<32x32xf32>, vector<4x32xf32> -> vector<4x32xf32>
    %459 = vector.broadcast %435 : vector<1x32xf32> to vector<4x32xf32>
    %460 = arith.addf %458, %459 : vector<4x32xf32>
    %c1_225 = arith.constant 1 : index
    %c0_226 = arith.constant 0 : index
    %c0_227 = arith.constant 0 : index
    %461 = vector.load %arg10[%c1_225, %c0_226, %c0_227] : memref<2x1x32xf32, #tpu.memory_space<vmem>>, vector<1x1x32xf32>
    %462 = vector.shape_cast %461 : vector<1x1x32xf32> to vector<1x32xf32>
    %463 = vector.extract_strided_slice %21 {offsets = [0, 0], sizes = [3, 32], strides = [1, 1]} : vector<4x32xf32> to vector<3x32xf32>
    %464 = tpu.concatenate %462, %463 in 0 : vector<1x32xf32>, vector<3x32xf32> -> vector<4x32xf32>
    %c1_228 = arith.constant 1 : index
    %c0_229 = arith.constant 0 : index
    %c0_230 = arith.constant 0 : index
    %465 = vector.load %arg11[%c1_228, %c0_229, %c0_230] : memref<2x4x32xf32, #tpu.memory_space<vmem>>, vector<1x4x32xf32>
    %466 = vector.shape_cast %465 : vector<1x4x32xf32> to vector<4x32xf32>
    %467 = arith.addf %464, %466 : vector<4x32xf32>
    %c2_231 = arith.constant 2 : index
    %c0_232 = arith.constant 0 : index
    %c0_233 = arith.constant 0 : index
    %468 = vector.load %arg12[%c2_231, %c0_232, %c0_233] : memref<4x32x96xf32, #tpu.memory_space<vmem>>, vector<1x32x96xf32>
    %469 = vector.shape_cast %468 : vector<1x32x96xf32> to vector<32x96xf32>
    %cst_234 = arith.constant dense<0.000000e+00> : vector<4x96xf32>
    %470 = tpu.matmul %467, %469, %cst_234 {dimension_numbers = #tpu.dot_dimension_numbers<[1], [0], [0], [1], [0, 0, 1, 1], [], []>} : vector<4x32xf32>, vector<32x96xf32>, vector<4x96xf32> -> vector<4x96xf32>
    %c2_235 = arith.constant 2 : index
    %c0_236 = arith.constant 0 : index
    %c0_237 = arith.constant 0 : index
    %471 = vector.load %arg13[%c2_235, %c0_236, %c0_237] : memref<4x1x96xf32, #tpu.memory_space<vmem>>, vector<1x1x96xf32>
    %472 = vector.shape_cast %471 : vector<1x1x96xf32> to vector<1x96xf32>
    %473 = vector.broadcast %472 : vector<1x96xf32> to vector<4x96xf32>
    %474 = arith.addf %470, %473 : vector<4x96xf32>
    %c2_238 = arith.constant 2 : index
    %c0_239 = arith.constant 0 : index
    %c0_240 = arith.constant 0 : index
    %475 = vector.load %arg14[%c2_238, %c0_239, %c0_240] : memref<4x32x32xf32, #tpu.memory_space<vmem>>, vector<1x32x32xf32>
    %476 = vector.shape_cast %475 : vector<1x32x32xf32> to vector<32x32xf32>
    %cst_241 = arith.constant 0.000000e+00 : f32
    %477 = vector.broadcast %cst_241 : f32 to vector<4x32xf32>
    %478 = vector.extract_strided_slice %474 {offsets = [0, 0], sizes = [4, 8], strides = [1, 1]} : vector<4x96xf32> to vector<4x8xf32>
    %cst_242 = arith.constant 0.353553385 : f32
    %479 = vector.broadcast %cst_242 : f32 to vector<4x8xf32>
    %480 = arith.mulf %478, %479 : vector<4x8xf32>
    %481 = vector.extract_strided_slice %474 {offsets = [0, 32], sizes = [4, 8], strides = [1, 1]} : vector<4x96xf32> to vector<4x8xf32>
    %482 = vector.extract_strided_slice %474 {offsets = [0, 64], sizes = [4, 8], strides = [1, 1]} : vector<4x96xf32> to vector<4x8xf32>
    %cst_243 = arith.constant dense<0.000000e+00> : vector<4x4xf32>
    %483 = tpu.matmul %480, %481, %cst_243 {dimension_numbers = #tpu.dot_dimension_numbers<[1], [1], [0], [0], [0, 0, 1, 0], [], []>} : vector<4x8xf32>, vector<4x8xf32>, vector<4x4xf32> -> vector<4x4xf32>
    %484 = arith.addf %483, %9 : vector<4x4xf32>
    %cst_244 = arith.constant dense<0xFF800000> : vector<4xf32>
    %485 = vector.multi_reduction <maximumf>, %484, %cst_244 [1] : vector<4x4xf32> to vector<4xf32>
    %486 = vector.shape_cast %485 : vector<4xf32> to vector<4x1xf32>
    %487 = vector.broadcast %486 : vector<4x1xf32> to vector<4x4xf32>
    %488 = arith.subf %484, %487 : vector<4x4xf32>
    %489 = math.exp %488 : vector<4x4xf32>
    %cst_245 = arith.constant dense<0.000000e+00> : vector<4xf32>
    %490 = vector.multi_reduction <add>, %489, %cst_245 [1] : vector<4x4xf32> to vector<4xf32>
    %491 = vector.shape_cast %490 : vector<4xf32> to vector<4x1xf32>
    %492 = vector.broadcast %491 : vector<4x1xf32> to vector<4x4xf32>
    %493 = arith.divf %489, %492 : vector<4x4xf32>
    %cst_246 = arith.constant dense<0.000000e+00> : vector<4x8xf32>
    %494 = tpu.matmul %493, %482, %cst_246 {dimension_numbers = #tpu.dot_dimension_numbers<[1], [0], [0], [1], [0, 0, 1, 1], [], []>} : vector<4x4xf32>, vector<4x8xf32>, vector<4x8xf32> -> vector<4x8xf32>
    %495 = vector.extract_strided_slice %476 {offsets = [0, 0], sizes = [8, 32], strides = [1, 1]} : vector<32x32xf32> to vector<8x32xf32>
    %cst_247 = arith.constant dense<0.000000e+00> : vector<4x32xf32>
    %496 = tpu.matmul %494, %495, %cst_247 {dimension_numbers = #tpu.dot_dimension_numbers<[1], [0], [0], [1], [0, 0, 1, 1], [], []>} : vector<4x8xf32>, vector<8x32xf32>, vector<4x32xf32> -> vector<4x32xf32>
    %497 = arith.addf %477, %496 : vector<4x32xf32>
    %498 = vector.extract_strided_slice %474 {offsets = [0, 8], sizes = [4, 8], strides = [1, 1]} : vector<4x96xf32> to vector<4x8xf32>
    %cst_248 = arith.constant 0.353553385 : f32
    %499 = vector.broadcast %cst_248 : f32 to vector<4x8xf32>
    %500 = arith.mulf %498, %499 : vector<4x8xf32>
    %501 = vector.extract_strided_slice %474 {offsets = [0, 40], sizes = [4, 8], strides = [1, 1]} : vector<4x96xf32> to vector<4x8xf32>
    %502 = vector.extract_strided_slice %474 {offsets = [0, 72], sizes = [4, 8], strides = [1, 1]} : vector<4x96xf32> to vector<4x8xf32>
    %cst_249 = arith.constant dense<0.000000e+00> : vector<4x4xf32>
    %503 = tpu.matmul %500, %501, %cst_249 {dimension_numbers = #tpu.dot_dimension_numbers<[1], [1], [0], [0], [0, 0, 1, 0], [], []>} : vector<4x8xf32>, vector<4x8xf32>, vector<4x4xf32> -> vector<4x4xf32>
    %504 = arith.addf %503, %9 : vector<4x4xf32>
    %cst_250 = arith.constant dense<0xFF800000> : vector<4xf32>
    %505 = vector.multi_reduction <maximumf>, %504, %cst_250 [1] : vector<4x4xf32> to vector<4xf32>
    %506 = vector.shape_cast %505 : vector<4xf32> to vector<4x1xf32>
    %507 = vector.broadcast %506 : vector<4x1xf32> to vector<4x4xf32>
    %508 = arith.subf %504, %507 : vector<4x4xf32>
    %509 = math.exp %508 : vector<4x4xf32>
    %cst_251 = arith.constant dense<0.000000e+00> : vector<4xf32>
    %510 = vector.multi_reduction <add>, %509, %cst_251 [1] : vector<4x4xf32> to vector<4xf32>
    %511 = vector.shape_cast %510 : vector<4xf32> to vector<4x1xf32>
    %512 = vector.broadcast %511 : vector<4x1xf32> to vector<4x4xf32>
    %513 = arith.divf %509, %512 : vector<4x4xf32>
    %cst_252 = arith.constant dense<0.000000e+00> : vector<4x8xf32>
    %514 = tpu.matmul %513, %502, %cst_252 {dimension_numbers = #tpu.dot_dimension_numbers<[1], [0], [0], [1], [0, 0, 1, 1], [], []>} : vector<4x4xf32>, vector<4x8xf32>, vector<4x8xf32> -> vector<4x8xf32>
    %515 = vector.extract_strided_slice %476 {offsets = [8, 0], sizes = [8, 32], strides = [1, 1]} : vector<32x32xf32> to vector<8x32xf32>
    %cst_253 = arith.constant dense<0.000000e+00> : vector<4x32xf32>
    %516 = tpu.matmul %514, %515, %cst_253 {dimension_numbers = #tpu.dot_dimension_numbers<[1], [0], [0], [1], [0, 0, 1, 1], [], []>} : vector<4x8xf32>, vector<8x32xf32>, vector<4x32xf32> -> vector<4x32xf32>
    %517 = arith.addf %497, %516 : vector<4x32xf32>
    %518 = vector.extract_strided_slice %474 {offsets = [0, 16], sizes = [4, 8], strides = [1, 1]} : vector<4x96xf32> to vector<4x8xf32>
    %cst_254 = arith.constant 0.353553385 : f32
    %519 = vector.broadcast %cst_254 : f32 to vector<4x8xf32>
    %520 = arith.mulf %518, %519 : vector<4x8xf32>
    %521 = vector.extract_strided_slice %474 {offsets = [0, 48], sizes = [4, 8], strides = [1, 1]} : vector<4x96xf32> to vector<4x8xf32>
    %522 = vector.extract_strided_slice %474 {offsets = [0, 80], sizes = [4, 8], strides = [1, 1]} : vector<4x96xf32> to vector<4x8xf32>
    %cst_255 = arith.constant dense<0.000000e+00> : vector<4x4xf32>
    %523 = tpu.matmul %520, %521, %cst_255 {dimension_numbers = #tpu.dot_dimension_numbers<[1], [1], [0], [0], [0, 0, 1, 0], [], []>} : vector<4x8xf32>, vector<4x8xf32>, vector<4x4xf32> -> vector<4x4xf32>
    %524 = arith.addf %523, %9 : vector<4x4xf32>
    %cst_256 = arith.constant dense<0xFF800000> : vector<4xf32>
    %525 = vector.multi_reduction <maximumf>, %524, %cst_256 [1] : vector<4x4xf32> to vector<4xf32>
    %526 = vector.shape_cast %525 : vector<4xf32> to vector<4x1xf32>
    %527 = vector.broadcast %526 : vector<4x1xf32> to vector<4x4xf32>
    %528 = arith.subf %524, %527 : vector<4x4xf32>
    %529 = math.exp %528 : vector<4x4xf32>
    %cst_257 = arith.constant dense<0.000000e+00> : vector<4xf32>
    %530 = vector.multi_reduction <add>, %529, %cst_257 [1] : vector<4x4xf32> to vector<4xf32>
    %531 = vector.shape_cast %530 : vector<4xf32> to vector<4x1xf32>
    %532 = vector.broadcast %531 : vector<4x1xf32> to vector<4x4xf32>
    %533 = arith.divf %529, %532 : vector<4x4xf32>
    %cst_258 = arith.constant dense<0.000000e+00> : vector<4x8xf32>
    %534 = tpu.matmul %533, %522, %cst_258 {dimension_numbers = #tpu.dot_dimension_numbers<[1], [0], [0], [1], [0, 0, 1, 1], [], []>} : vector<4x4xf32>, vector<4x8xf32>, vector<4x8xf32> -> vector<4x8xf32>
    %535 = vector.extract_strided_slice %476 {offsets = [16, 0], sizes = [8, 32], strides = [1, 1]} : vector<32x32xf32> to vector<8x32xf32>
    %cst_259 = arith.constant dense<0.000000e+00> : vector<4x32xf32>
    %536 = tpu.matmul %534, %535, %cst_259 {dimension_numbers = #tpu.dot_dimension_numbers<[1], [0], [0], [1], [0, 0, 1, 1], [], []>} : vector<4x8xf32>, vector<8x32xf32>, vector<4x32xf32> -> vector<4x32xf32>
    %537 = arith.addf %517, %536 : vector<4x32xf32>
    %538 = vector.extract_strided_slice %474 {offsets = [0, 24], sizes = [4, 8], strides = [1, 1]} : vector<4x96xf32> to vector<4x8xf32>
    %cst_260 = arith.constant 0.353553385 : f32
    %539 = vector.broadcast %cst_260 : f32 to vector<4x8xf32>
    %540 = arith.mulf %538, %539 : vector<4x8xf32>
    %541 = vector.extract_strided_slice %474 {offsets = [0, 56], sizes = [4, 8], strides = [1, 1]} : vector<4x96xf32> to vector<4x8xf32>
    %542 = vector.extract_strided_slice %474 {offsets = [0, 88], sizes = [4, 8], strides = [1, 1]} : vector<4x96xf32> to vector<4x8xf32>
    %cst_261 = arith.constant dense<0.000000e+00> : vector<4x4xf32>
    %543 = tpu.matmul %540, %541, %cst_261 {dimension_numbers = #tpu.dot_dimension_numbers<[1], [1], [0], [0], [0, 0, 1, 0], [], []>} : vector<4x8xf32>, vector<4x8xf32>, vector<4x4xf32> -> vector<4x4xf32>
    %544 = arith.addf %543, %9 : vector<4x4xf32>
    %cst_262 = arith.constant dense<0xFF800000> : vector<4xf32>
    %545 = vector.multi_reduction <maximumf>, %544, %cst_262 [1] : vector<4x4xf32> to vector<4xf32>
    %546 = vector.shape_cast %545 : vector<4xf32> to vector<4x1xf32>
    %547 = vector.broadcast %546 : vector<4x1xf32> to vector<4x4xf32>
    %548 = arith.subf %544, %547 : vector<4x4xf32>
    %549 = math.exp %548 : vector<4x4xf32>
    %cst_263 = arith.constant dense<0.000000e+00> : vector<4xf32>
    %550 = vector.multi_reduction <add>, %549, %cst_263 [1] : vector<4x4xf32> to vector<4xf32>
    %551 = vector.shape_cast %550 : vector<4xf32> to vector<4x1xf32>
    %552 = vector.broadcast %551 : vector<4x1xf32> to vector<4x4xf32>
    %553 = arith.divf %549, %552 : vector<4x4xf32>
    %cst_264 = arith.constant dense<0.000000e+00> : vector<4x8xf32>
    %554 = tpu.matmul %553, %542, %cst_264 {dimension_numbers = #tpu.dot_dimension_numbers<[1], [0], [0], [1], [0, 0, 1, 1], [], []>} : vector<4x4xf32>, vector<4x8xf32>, vector<4x8xf32> -> vector<4x8xf32>
    %555 = vector.extract_strided_slice %476 {offsets = [24, 0], sizes = [8, 32], strides = [1, 1]} : vector<32x32xf32> to vector<8x32xf32>
    %cst_265 = arith.constant dense<0.000000e+00> : vector<4x32xf32>
    %556 = tpu.matmul %554, %555, %cst_265 {dimension_numbers = #tpu.dot_dimension_numbers<[1], [0], [0], [1], [0, 0, 1, 1], [], []>} : vector<4x8xf32>, vector<8x32xf32>, vector<4x32xf32> -> vector<4x32xf32>
    %557 = arith.addf %537, %556 : vector<4x32xf32>
    %c2_266 = arith.constant 2 : index
    %c0_267 = arith.constant 0 : index
    %c0_268 = arith.constant 0 : index
    %558 = vector.load %arg15[%c2_266, %c0_267, %c0_268] : memref<4x1x32xf32, #tpu.memory_space<vmem>>, vector<1x1x32xf32>
    %559 = vector.shape_cast %558 : vector<1x1x32xf32> to vector<1x32xf32>
    %560 = vector.broadcast %559 : vector<1x32xf32> to vector<4x32xf32>
    %561 = arith.addf %557, %560 : vector<4x32xf32>
    %562 = arith.addf %467, %561 : vector<4x32xf32>
    %c8 = arith.constant 8 : index
    %c0_269 = arith.constant 0 : index
    %c0_270 = arith.constant 0 : index
    %563 = vector.load %arg20[%c8, %c0_269, %c0_270] : memref<16x1x32xf32, #tpu.memory_space<vmem>>, vector<1x1x32xf32>
    %564 = vector.shape_cast %563 : vector<1x1x32xf32> to vector<1x32xf32>
    %c9 = arith.constant 9 : index
    %c0_271 = arith.constant 0 : index
    %c0_272 = arith.constant 0 : index
    %565 = vector.load %arg20[%c9, %c0_271, %c0_272] : memref<16x1x32xf32, #tpu.memory_space<vmem>>, vector<1x1x32xf32>
    %566 = vector.shape_cast %565 : vector<1x1x32xf32> to vector<1x32xf32>
    %cst_273 = arith.constant dense<0.000000e+00> : vector<4xf32>
    %567 = vector.multi_reduction <add>, %562, %cst_273 [1] : vector<4x32xf32> to vector<4xf32>
    %568 = vector.shape_cast %567 : vector<4xf32> to vector<4x1xf32>
    %cst_274 = arith.constant 3.200000e+01 : f32
    %569 = vector.broadcast %cst_274 : f32 to vector<4x1xf32>
    %570 = arith.divf %568, %569 : vector<4x1xf32>
    %571 = vector.broadcast %570 : vector<4x1xf32> to vector<4x32xf32>
    %572 = arith.subf %562, %571 : vector<4x32xf32>
    %573 = arith.mulf %572, %572 : vector<4x32xf32>
    %cst_275 = arith.constant dense<0.000000e+00> : vector<4xf32>
    %574 = vector.multi_reduction <add>, %573, %cst_275 [1] : vector<4x32xf32> to vector<4xf32>
    %575 = vector.shape_cast %574 : vector<4xf32> to vector<4x1xf32>
    %cst_276 = arith.constant 3.200000e+01 : f32
    %576 = vector.broadcast %cst_276 : f32 to vector<4x1xf32>
    %577 = arith.divf %575, %576 : vector<4x1xf32>
    %cst_277 = arith.constant 9.99999974E-6 : f32
    %578 = vector.broadcast %cst_277 : f32 to vector<4x1xf32>
    %579 = arith.addf %577, %578 : vector<4x1xf32>
    %580 = math.rsqrt %579 : vector<4x1xf32>
    %581 = vector.broadcast %580 : vector<4x1xf32> to vector<4x32xf32>
    %582 = arith.mulf %572, %581 : vector<4x32xf32>
    %583 = vector.broadcast %564 : vector<1x32xf32> to vector<4x32xf32>
    %584 = arith.mulf %582, %583 : vector<4x32xf32>
    %585 = vector.broadcast %566 : vector<1x32xf32> to vector<4x32xf32>
    %586 = arith.addf %584, %585 : vector<4x32xf32>
    %c2_278 = arith.constant 2 : index
    %c0_279 = arith.constant 0 : index
    %c0_280 = arith.constant 0 : index
    %587 = vector.load %arg16[%c2_278, %c0_279, %c0_280] : memref<4x32x64xf32, #tpu.memory_space<vmem>>, vector<1x32x64xf32>
    %588 = vector.shape_cast %587 : vector<1x32x64xf32> to vector<32x64xf32>
    %cst_281 = arith.constant dense<0.000000e+00> : vector<4x64xf32>
    %589 = tpu.matmul %586, %588, %cst_281 {dimension_numbers = #tpu.dot_dimension_numbers<[1], [0], [0], [1], [0, 0, 1, 1], [], []>} : vector<4x32xf32>, vector<32x64xf32>, vector<4x64xf32> -> vector<4x64xf32>
    %c2_282 = arith.constant 2 : index
    %c0_283 = arith.constant 0 : index
    %c0_284 = arith.constant 0 : index
    %590 = vector.load %arg17[%c2_282, %c0_283, %c0_284] : memref<4x1x64xf32, #tpu.memory_space<vmem>>, vector<1x1x64xf32>
    %591 = vector.shape_cast %590 : vector<1x1x64xf32> to vector<1x64xf32>
    %592 = vector.broadcast %591 : vector<1x64xf32> to vector<4x64xf32>
    %593 = arith.addf %589, %592 : vector<4x64xf32>
    %594 = arith.mulf %593, %593 : vector<4x64xf32>
    %595 = arith.mulf %593, %594 : vector<4x64xf32>
    %cst_285 = arith.constant 4.471500e-02 : f32
    %596 = vector.broadcast %cst_285 : f32 to vector<4x64xf32>
    %597 = arith.mulf %596, %595 : vector<4x64xf32>
    %598 = arith.addf %593, %597 : vector<4x64xf32>
    %cst_286 = arith.constant 0.797884583 : f32
    %599 = vector.broadcast %cst_286 : f32 to vector<4x64xf32>
    %600 = arith.mulf %599, %598 : vector<4x64xf32>
    %601 = math.tanh %600 : vector<4x64xf32>
    %cst_287 = arith.constant 1.000000e+00 : f32
    %602 = vector.broadcast %cst_287 : f32 to vector<4x64xf32>
    %603 = arith.addf %602, %601 : vector<4x64xf32>
    %cst_288 = arith.constant 5.000000e-01 : f32
    %604 = vector.broadcast %cst_288 : f32 to vector<4x64xf32>
    %605 = arith.mulf %604, %603 : vector<4x64xf32>
    %606 = arith.mulf %593, %605 : vector<4x64xf32>
    %c2_289 = arith.constant 2 : index
    %c0_290 = arith.constant 0 : index
    %c0_291 = arith.constant 0 : index
    %607 = vector.load %arg18[%c2_289, %c0_290, %c0_291] : memref<4x64x32xf32, #tpu.memory_space<vmem>>, vector<1x64x32xf32>
    %608 = vector.shape_cast %607 : vector<1x64x32xf32> to vector<64x32xf32>
    %cst_292 = arith.constant dense<0.000000e+00> : vector<4x32xf32>
    %609 = tpu.matmul %606, %608, %cst_292 {dimension_numbers = #tpu.dot_dimension_numbers<[1], [0], [0], [1], [0, 0, 1, 1], [], []>} : vector<4x64xf32>, vector<64x32xf32>, vector<4x32xf32> -> vector<4x32xf32>
    %c2_293 = arith.constant 2 : index
    %c0_294 = arith.constant 0 : index
    %c0_295 = arith.constant 0 : index
    %610 = vector.load %arg19[%c2_293, %c0_294, %c0_295] : memref<4x1x32xf32, #tpu.memory_space<vmem>>, vector<1x1x32xf32>
    %611 = vector.shape_cast %610 : vector<1x1x32xf32> to vector<1x32xf32>
    %612 = vector.broadcast %611 : vector<1x32xf32> to vector<4x32xf32>
    %613 = arith.addf %609, %612 : vector<4x32xf32>
    %614 = arith.addf %586, %613 : vector<4x32xf32>
    %c10 = arith.constant 10 : index
    %c0_296 = arith.constant 0 : index
    %c0_297 = arith.constant 0 : index
    %615 = vector.load %arg20[%c10, %c0_296, %c0_297] : memref<16x1x32xf32, #tpu.memory_space<vmem>>, vector<1x1x32xf32>
    %616 = vector.shape_cast %615 : vector<1x1x32xf32> to vector<1x32xf32>
    %c11 = arith.constant 11 : index
    %c0_298 = arith.constant 0 : index
    %c0_299 = arith.constant 0 : index
    %617 = vector.load %arg20[%c11, %c0_298, %c0_299] : memref<16x1x32xf32, #tpu.memory_space<vmem>>, vector<1x1x32xf32>
    %618 = vector.shape_cast %617 : vector<1x1x32xf32> to vector<1x32xf32>
    %cst_300 = arith.constant dense<0.000000e+00> : vector<4xf32>
    %619 = vector.multi_reduction <add>, %614, %cst_300 [1] : vector<4x32xf32> to vector<4xf32>
    %620 = vector.shape_cast %619 : vector<4xf32> to vector<4x1xf32>
    %cst_301 = arith.constant 3.200000e+01 : f32
    %621 = vector.broadcast %cst_301 : f32 to vector<4x1xf32>
    %622 = arith.divf %620, %621 : vector<4x1xf32>
    %623 = vector.broadcast %622 : vector<4x1xf32> to vector<4x32xf32>
    %624 = arith.subf %614, %623 : vector<4x32xf32>
    %625 = arith.mulf %624, %624 : vector<4x32xf32>
    %cst_302 = arith.constant dense<0.000000e+00> : vector<4xf32>
    %626 = vector.multi_reduction <add>, %625, %cst_302 [1] : vector<4x32xf32> to vector<4xf32>
    %627 = vector.shape_cast %626 : vector<4xf32> to vector<4x1xf32>
    %cst_303 = arith.constant 3.200000e+01 : f32
    %628 = vector.broadcast %cst_303 : f32 to vector<4x1xf32>
    %629 = arith.divf %627, %628 : vector<4x1xf32>
    %cst_304 = arith.constant 9.99999974E-6 : f32
    %630 = vector.broadcast %cst_304 : f32 to vector<4x1xf32>
    %631 = arith.addf %629, %630 : vector<4x1xf32>
    %632 = math.rsqrt %631 : vector<4x1xf32>
    %633 = vector.broadcast %632 : vector<4x1xf32> to vector<4x32xf32>
    %634 = arith.mulf %624, %633 : vector<4x32xf32>
    %635 = vector.broadcast %616 : vector<1x32xf32> to vector<4x32xf32>
    %636 = arith.mulf %634, %635 : vector<4x32xf32>
    %637 = vector.broadcast %618 : vector<1x32xf32> to vector<4x32xf32>
    %638 = arith.addf %636, %637 : vector<4x32xf32>
    %c3_305 = arith.constant 3 : index
    %c0_306 = arith.constant 0 : index
    %c0_307 = arith.constant 0 : index
    %639 = vector.load %arg12[%c3_305, %c0_306, %c0_307] : memref<4x32x96xf32, #tpu.memory_space<vmem>>, vector<1x32x96xf32>
    %640 = vector.shape_cast %639 : vector<1x32x96xf32> to vector<32x96xf32>
    %cst_308 = arith.constant dense<0.000000e+00> : vector<4x96xf32>
    %641 = tpu.matmul %638, %640, %cst_308 {dimension_numbers = #tpu.dot_dimension_numbers<[1], [0], [0], [1], [0, 0, 1, 1], [], []>} : vector<4x32xf32>, vector<32x96xf32>, vector<4x96xf32> -> vector<4x96xf32>
    %c3_309 = arith.constant 3 : index
    %c0_310 = arith.constant 0 : index
    %c0_311 = arith.constant 0 : index
    %642 = vector.load %arg13[%c3_309, %c0_310, %c0_311] : memref<4x1x96xf32, #tpu.memory_space<vmem>>, vector<1x1x96xf32>
    %643 = vector.shape_cast %642 : vector<1x1x96xf32> to vector<1x96xf32>
    %644 = vector.broadcast %643 : vector<1x96xf32> to vector<4x96xf32>
    %645 = arith.addf %641, %644 : vector<4x96xf32>
    %c3_312 = arith.constant 3 : index
    %c0_313 = arith.constant 0 : index
    %c0_314 = arith.constant 0 : index
    %646 = vector.load %arg14[%c3_312, %c0_313, %c0_314] : memref<4x32x32xf32, #tpu.memory_space<vmem>>, vector<1x32x32xf32>
    %647 = vector.shape_cast %646 : vector<1x32x32xf32> to vector<32x32xf32>
    %cst_315 = arith.constant 0.000000e+00 : f32
    %648 = vector.broadcast %cst_315 : f32 to vector<4x32xf32>
    %649 = vector.extract_strided_slice %645 {offsets = [0, 0], sizes = [4, 8], strides = [1, 1]} : vector<4x96xf32> to vector<4x8xf32>
    %cst_316 = arith.constant 0.353553385 : f32
    %650 = vector.broadcast %cst_316 : f32 to vector<4x8xf32>
    %651 = arith.mulf %649, %650 : vector<4x8xf32>
    %652 = vector.extract_strided_slice %645 {offsets = [0, 32], sizes = [4, 8], strides = [1, 1]} : vector<4x96xf32> to vector<4x8xf32>
    %653 = vector.extract_strided_slice %645 {offsets = [0, 64], sizes = [4, 8], strides = [1, 1]} : vector<4x96xf32> to vector<4x8xf32>
    %cst_317 = arith.constant dense<0.000000e+00> : vector<4x4xf32>
    %654 = tpu.matmul %651, %652, %cst_317 {dimension_numbers = #tpu.dot_dimension_numbers<[1], [1], [0], [0], [0, 0, 1, 0], [], []>} : vector<4x8xf32>, vector<4x8xf32>, vector<4x4xf32> -> vector<4x4xf32>
    %655 = arith.addf %654, %9 : vector<4x4xf32>
    %cst_318 = arith.constant dense<0xFF800000> : vector<4xf32>
    %656 = vector.multi_reduction <maximumf>, %655, %cst_318 [1] : vector<4x4xf32> to vector<4xf32>
    %657 = vector.shape_cast %656 : vector<4xf32> to vector<4x1xf32>
    %658 = vector.broadcast %657 : vector<4x1xf32> to vector<4x4xf32>
    %659 = arith.subf %655, %658 : vector<4x4xf32>
    %660 = math.exp %659 : vector<4x4xf32>
    %cst_319 = arith.constant dense<0.000000e+00> : vector<4xf32>
    %661 = vector.multi_reduction <add>, %660, %cst_319 [1] : vector<4x4xf32> to vector<4xf32>
    %662 = vector.shape_cast %661 : vector<4xf32> to vector<4x1xf32>
    %663 = vector.broadcast %662 : vector<4x1xf32> to vector<4x4xf32>
    %664 = arith.divf %660, %663 : vector<4x4xf32>
    %cst_320 = arith.constant dense<0.000000e+00> : vector<4x8xf32>
    %665 = tpu.matmul %664, %653, %cst_320 {dimension_numbers = #tpu.dot_dimension_numbers<[1], [0], [0], [1], [0, 0, 1, 1], [], []>} : vector<4x4xf32>, vector<4x8xf32>, vector<4x8xf32> -> vector<4x8xf32>
    %666 = vector.extract_strided_slice %647 {offsets = [0, 0], sizes = [8, 32], strides = [1, 1]} : vector<32x32xf32> to vector<8x32xf32>
    %cst_321 = arith.constant dense<0.000000e+00> : vector<4x32xf32>
    %667 = tpu.matmul %665, %666, %cst_321 {dimension_numbers = #tpu.dot_dimension_numbers<[1], [0], [0], [1], [0, 0, 1, 1], [], []>} : vector<4x8xf32>, vector<8x32xf32>, vector<4x32xf32> -> vector<4x32xf32>
    %668 = arith.addf %648, %667 : vector<4x32xf32>
    %669 = vector.extract_strided_slice %645 {offsets = [0, 8], sizes = [4, 8], strides = [1, 1]} : vector<4x96xf32> to vector<4x8xf32>
    %cst_322 = arith.constant 0.353553385 : f32
    %670 = vector.broadcast %cst_322 : f32 to vector<4x8xf32>
    %671 = arith.mulf %669, %670 : vector<4x8xf32>
    %672 = vector.extract_strided_slice %645 {offsets = [0, 40], sizes = [4, 8], strides = [1, 1]} : vector<4x96xf32> to vector<4x8xf32>
    %673 = vector.extract_strided_slice %645 {offsets = [0, 72], sizes = [4, 8], strides = [1, 1]} : vector<4x96xf32> to vector<4x8xf32>
    %cst_323 = arith.constant dense<0.000000e+00> : vector<4x4xf32>
    %674 = tpu.matmul %671, %672, %cst_323 {dimension_numbers = #tpu.dot_dimension_numbers<[1], [1], [0], [0], [0, 0, 1, 0], [], []>} : vector<4x8xf32>, vector<4x8xf32>, vector<4x4xf32> -> vector<4x4xf32>
    %675 = arith.addf %674, %9 : vector<4x4xf32>
    %cst_324 = arith.constant dense<0xFF800000> : vector<4xf32>
    %676 = vector.multi_reduction <maximumf>, %675, %cst_324 [1] : vector<4x4xf32> to vector<4xf32>
    %677 = vector.shape_cast %676 : vector<4xf32> to vector<4x1xf32>
    %678 = vector.broadcast %677 : vector<4x1xf32> to vector<4x4xf32>
    %679 = arith.subf %675, %678 : vector<4x4xf32>
    %680 = math.exp %679 : vector<4x4xf32>
    %cst_325 = arith.constant dense<0.000000e+00> : vector<4xf32>
    %681 = vector.multi_reduction <add>, %680, %cst_325 [1] : vector<4x4xf32> to vector<4xf32>
    %682 = vector.shape_cast %681 : vector<4xf32> to vector<4x1xf32>
    %683 = vector.broadcast %682 : vector<4x1xf32> to vector<4x4xf32>
    %684 = arith.divf %680, %683 : vector<4x4xf32>
    %cst_326 = arith.constant dense<0.000000e+00> : vector<4x8xf32>
    %685 = tpu.matmul %684, %673, %cst_326 {dimension_numbers = #tpu.dot_dimension_numbers<[1], [0], [0], [1], [0, 0, 1, 1], [], []>} : vector<4x4xf32>, vector<4x8xf32>, vector<4x8xf32> -> vector<4x8xf32>
    %686 = vector.extract_strided_slice %647 {offsets = [8, 0], sizes = [8, 32], strides = [1, 1]} : vector<32x32xf32> to vector<8x32xf32>
    %cst_327 = arith.constant dense<0.000000e+00> : vector<4x32xf32>
    %687 = tpu.matmul %685, %686, %cst_327 {dimension_numbers = #tpu.dot_dimension_numbers<[1], [0], [0], [1], [0, 0, 1, 1], [], []>} : vector<4x8xf32>, vector<8x32xf32>, vector<4x32xf32> -> vector<4x32xf32>
    %688 = arith.addf %668, %687 : vector<4x32xf32>
    %689 = vector.extract_strided_slice %645 {offsets = [0, 16], sizes = [4, 8], strides = [1, 1]} : vector<4x96xf32> to vector<4x8xf32>
    %cst_328 = arith.constant 0.353553385 : f32
    %690 = vector.broadcast %cst_328 : f32 to vector<4x8xf32>
    %691 = arith.mulf %689, %690 : vector<4x8xf32>
    %692 = vector.extract_strided_slice %645 {offsets = [0, 48], sizes = [4, 8], strides = [1, 1]} : vector<4x96xf32> to vector<4x8xf32>
    %693 = vector.extract_strided_slice %645 {offsets = [0, 80], sizes = [4, 8], strides = [1, 1]} : vector<4x96xf32> to vector<4x8xf32>
    %cst_329 = arith.constant dense<0.000000e+00> : vector<4x4xf32>
    %694 = tpu.matmul %691, %692, %cst_329 {dimension_numbers = #tpu.dot_dimension_numbers<[1], [1], [0], [0], [0, 0, 1, 0], [], []>} : vector<4x8xf32>, vector<4x8xf32>, vector<4x4xf32> -> vector<4x4xf32>
    %695 = arith.addf %694, %9 : vector<4x4xf32>
    %cst_330 = arith.constant dense<0xFF800000> : vector<4xf32>
    %696 = vector.multi_reduction <maximumf>, %695, %cst_330 [1] : vector<4x4xf32> to vector<4xf32>
    %697 = vector.shape_cast %696 : vector<4xf32> to vector<4x1xf32>
    %698 = vector.broadcast %697 : vector<4x1xf32> to vector<4x4xf32>
    %699 = arith.subf %695, %698 : vector<4x4xf32>
    %700 = math.exp %699 : vector<4x4xf32>
    %cst_331 = arith.constant dense<0.000000e+00> : vector<4xf32>
    %701 = vector.multi_reduction <add>, %700, %cst_331 [1] : vector<4x4xf32> to vector<4xf32>
    %702 = vector.shape_cast %701 : vector<4xf32> to vector<4x1xf32>
    %703 = vector.broadcast %702 : vector<4x1xf32> to vector<4x4xf32>
    %704 = arith.divf %700, %703 : vector<4x4xf32>
    %cst_332 = arith.constant dense<0.000000e+00> : vector<4x8xf32>
    %705 = tpu.matmul %704, %693, %cst_332 {dimension_numbers = #tpu.dot_dimension_numbers<[1], [0], [0], [1], [0, 0, 1, 1], [], []>} : vector<4x4xf32>, vector<4x8xf32>, vector<4x8xf32> -> vector<4x8xf32>
    %706 = vector.extract_strided_slice %647 {offsets = [16, 0], sizes = [8, 32], strides = [1, 1]} : vector<32x32xf32> to vector<8x32xf32>
    %cst_333 = arith.constant dense<0.000000e+00> : vector<4x32xf32>
    %707 = tpu.matmul %705, %706, %cst_333 {dimension_numbers = #tpu.dot_dimension_numbers<[1], [0], [0], [1], [0, 0, 1, 1], [], []>} : vector<4x8xf32>, vector<8x32xf32>, vector<4x32xf32> -> vector<4x32xf32>
    %708 = arith.addf %688, %707 : vector<4x32xf32>
    %709 = vector.extract_strided_slice %645 {offsets = [0, 24], sizes = [4, 8], strides = [1, 1]} : vector<4x96xf32> to vector<4x8xf32>
    %cst_334 = arith.constant 0.353553385 : f32
    %710 = vector.broadcast %cst_334 : f32 to vector<4x8xf32>
    %711 = arith.mulf %709, %710 : vector<4x8xf32>
    %712 = vector.extract_strided_slice %645 {offsets = [0, 56], sizes = [4, 8], strides = [1, 1]} : vector<4x96xf32> to vector<4x8xf32>
    %713 = vector.extract_strided_slice %645 {offsets = [0, 88], sizes = [4, 8], strides = [1, 1]} : vector<4x96xf32> to vector<4x8xf32>
    %cst_335 = arith.constant dense<0.000000e+00> : vector<4x4xf32>
    %714 = tpu.matmul %711, %712, %cst_335 {dimension_numbers = #tpu.dot_dimension_numbers<[1], [1], [0], [0], [0, 0, 1, 0], [], []>} : vector<4x8xf32>, vector<4x8xf32>, vector<4x4xf32> -> vector<4x4xf32>
    %715 = arith.addf %714, %9 : vector<4x4xf32>
    %cst_336 = arith.constant dense<0xFF800000> : vector<4xf32>
    %716 = vector.multi_reduction <maximumf>, %715, %cst_336 [1] : vector<4x4xf32> to vector<4xf32>
    %717 = vector.shape_cast %716 : vector<4xf32> to vector<4x1xf32>
    %718 = vector.broadcast %717 : vector<4x1xf32> to vector<4x4xf32>
    %719 = arith.subf %715, %718 : vector<4x4xf32>
    %720 = math.exp %719 : vector<4x4xf32>
    %cst_337 = arith.constant dense<0.000000e+00> : vector<4xf32>
    %721 = vector.multi_reduction <add>, %720, %cst_337 [1] : vector<4x4xf32> to vector<4xf32>
    %722 = vector.shape_cast %721 : vector<4xf32> to vector<4x1xf32>
    %723 = vector.broadcast %722 : vector<4x1xf32> to vector<4x4xf32>
    %724 = arith.divf %720, %723 : vector<4x4xf32>
    %cst_338 = arith.constant dense<0.000000e+00> : vector<4x8xf32>
    %725 = tpu.matmul %724, %713, %cst_338 {dimension_numbers = #tpu.dot_dimension_numbers<[1], [0], [0], [1], [0, 0, 1, 1], [], []>} : vector<4x4xf32>, vector<4x8xf32>, vector<4x8xf32> -> vector<4x8xf32>
    %726 = vector.extract_strided_slice %647 {offsets = [24, 0], sizes = [8, 32], strides = [1, 1]} : vector<32x32xf32> to vector<8x32xf32>
    %cst_339 = arith.constant dense<0.000000e+00> : vector<4x32xf32>
    %727 = tpu.matmul %725, %726, %cst_339 {dimension_numbers = #tpu.dot_dimension_numbers<[1], [0], [0], [1], [0, 0, 1, 1], [], []>} : vector<4x8xf32>, vector<8x32xf32>, vector<4x32xf32> -> vector<4x32xf32>
    %728 = arith.addf %708, %727 : vector<4x32xf32>
    %c3_340 = arith.constant 3 : index
    %c0_341 = arith.constant 0 : index
    %c0_342 = arith.constant 0 : index
    %729 = vector.load %arg15[%c3_340, %c0_341, %c0_342] : memref<4x1x32xf32, #tpu.memory_space<vmem>>, vector<1x1x32xf32>
    %730 = vector.shape_cast %729 : vector<1x1x32xf32> to vector<1x32xf32>
    %731 = vector.broadcast %730 : vector<1x32xf32> to vector<4x32xf32>
    %732 = arith.addf %728, %731 : vector<4x32xf32>
    %733 = arith.addf %638, %732 : vector<4x32xf32>
    %c12 = arith.constant 12 : index
    %c0_343 = arith.constant 0 : index
    %c0_344 = arith.constant 0 : index
    %734 = vector.load %arg20[%c12, %c0_343, %c0_344] : memref<16x1x32xf32, #tpu.memory_space<vmem>>, vector<1x1x32xf32>
    %735 = vector.shape_cast %734 : vector<1x1x32xf32> to vector<1x32xf32>
    %c13 = arith.constant 13 : index
    %c0_345 = arith.constant 0 : index
    %c0_346 = arith.constant 0 : index
    %736 = vector.load %arg20[%c13, %c0_345, %c0_346] : memref<16x1x32xf32, #tpu.memory_space<vmem>>, vector<1x1x32xf32>
    %737 = vector.shape_cast %736 : vector<1x1x32xf32> to vector<1x32xf32>
    %cst_347 = arith.constant dense<0.000000e+00> : vector<4xf32>
    %738 = vector.multi_reduction <add>, %733, %cst_347 [1] : vector<4x32xf32> to vector<4xf32>
    %739 = vector.shape_cast %738 : vector<4xf32> to vector<4x1xf32>
    %cst_348 = arith.constant 3.200000e+01 : f32
    %740 = vector.broadcast %cst_348 : f32 to vector<4x1xf32>
    %741 = arith.divf %739, %740 : vector<4x1xf32>
    %742 = vector.broadcast %741 : vector<4x1xf32> to vector<4x32xf32>
    %743 = arith.subf %733, %742 : vector<4x32xf32>
    %744 = arith.mulf %743, %743 : vector<4x32xf32>
    %cst_349 = arith.constant dense<0.000000e+00> : vector<4xf32>
    %745 = vector.multi_reduction <add>, %744, %cst_349 [1] : vector<4x32xf32> to vector<4xf32>
    %746 = vector.shape_cast %745 : vector<4xf32> to vector<4x1xf32>
    %cst_350 = arith.constant 3.200000e+01 : f32
    %747 = vector.broadcast %cst_350 : f32 to vector<4x1xf32>
    %748 = arith.divf %746, %747 : vector<4x1xf32>
    %cst_351 = arith.constant 9.99999974E-6 : f32
    %749 = vector.broadcast %cst_351 : f32 to vector<4x1xf32>
    %750 = arith.addf %748, %749 : vector<4x1xf32>
    %751 = math.rsqrt %750 : vector<4x1xf32>
    %752 = vector.broadcast %751 : vector<4x1xf32> to vector<4x32xf32>
    %753 = arith.mulf %743, %752 : vector<4x32xf32>
    %754 = vector.broadcast %735 : vector<1x32xf32> to vector<4x32xf32>
    %755 = arith.mulf %753, %754 : vector<4x32xf32>
    %756 = vector.broadcast %737 : vector<1x32xf32> to vector<4x32xf32>
    %757 = arith.addf %755, %756 : vector<4x32xf32>
    %c3_352 = arith.constant 3 : index
    %c0_353 = arith.constant 0 : index
    %c0_354 = arith.constant 0 : index
    %758 = vector.load %arg16[%c3_352, %c0_353, %c0_354] : memref<4x32x64xf32, #tpu.memory_space<vmem>>, vector<1x32x64xf32>
    %759 = vector.shape_cast %758 : vector<1x32x64xf32> to vector<32x64xf32>
    %cst_355 = arith.constant dense<0.000000e+00> : vector<4x64xf32>
    %760 = tpu.matmul %757, %759, %cst_355 {dimension_numbers = #tpu.dot_dimension_numbers<[1], [0], [0], [1], [0, 0, 1, 1], [], []>} : vector<4x32xf32>, vector<32x64xf32>, vector<4x64xf32> -> vector<4x64xf32>
    %c3_356 = arith.constant 3 : index
    %c0_357 = arith.constant 0 : index
    %c0_358 = arith.constant 0 : index
    %761 = vector.load %arg17[%c3_356, %c0_357, %c0_358] : memref<4x1x64xf32, #tpu.memory_space<vmem>>, vector<1x1x64xf32>
    %762 = vector.shape_cast %761 : vector<1x1x64xf32> to vector<1x64xf32>
    %763 = vector.broadcast %762 : vector<1x64xf32> to vector<4x64xf32>
    %764 = arith.addf %760, %763 : vector<4x64xf32>
    %765 = arith.mulf %764, %764 : vector<4x64xf32>
    %766 = arith.mulf %764, %765 : vector<4x64xf32>
    %cst_359 = arith.constant 4.471500e-02 : f32
    %767 = vector.broadcast %cst_359 : f32 to vector<4x64xf32>
    %768 = arith.mulf %767, %766 : vector<4x64xf32>
    %769 = arith.addf %764, %768 : vector<4x64xf32>
    %cst_360 = arith.constant 0.797884583 : f32
    %770 = vector.broadcast %cst_360 : f32 to vector<4x64xf32>
    %771 = arith.mulf %770, %769 : vector<4x64xf32>
    %772 = math.tanh %771 : vector<4x64xf32>
    %cst_361 = arith.constant 1.000000e+00 : f32
    %773 = vector.broadcast %cst_361 : f32 to vector<4x64xf32>
    %774 = arith.addf %773, %772 : vector<4x64xf32>
    %cst_362 = arith.constant 5.000000e-01 : f32
    %775 = vector.broadcast %cst_362 : f32 to vector<4x64xf32>
    %776 = arith.mulf %775, %774 : vector<4x64xf32>
    %777 = arith.mulf %764, %776 : vector<4x64xf32>
    %c3_363 = arith.constant 3 : index
    %c0_364 = arith.constant 0 : index
    %c0_365 = arith.constant 0 : index
    %778 = vector.load %arg18[%c3_363, %c0_364, %c0_365] : memref<4x64x32xf32, #tpu.memory_space<vmem>>, vector<1x64x32xf32>
    %779 = vector.shape_cast %778 : vector<1x64x32xf32> to vector<64x32xf32>
    %cst_366 = arith.constant dense<0.000000e+00> : vector<4x32xf32>
    %780 = tpu.matmul %777, %779, %cst_366 {dimension_numbers = #tpu.dot_dimension_numbers<[1], [0], [0], [1], [0, 0, 1, 1], [], []>} : vector<4x64xf32>, vector<64x32xf32>, vector<4x32xf32> -> vector<4x32xf32>
    %c3_367 = arith.constant 3 : index
    %c0_368 = arith.constant 0 : index
    %c0_369 = arith.constant 0 : index
    %781 = vector.load %arg19[%c3_367, %c0_368, %c0_369] : memref<4x1x32xf32, #tpu.memory_space<vmem>>, vector<1x1x32xf32>
    %782 = vector.shape_cast %781 : vector<1x1x32xf32> to vector<1x32xf32>
    %783 = vector.broadcast %782 : vector<1x32xf32> to vector<4x32xf32>
    %784 = arith.addf %780, %783 : vector<4x32xf32>
    %785 = arith.addf %757, %784 : vector<4x32xf32>
    %c14 = arith.constant 14 : index
    %c0_370 = arith.constant 0 : index
    %c0_371 = arith.constant 0 : index
    %786 = vector.load %arg20[%c14, %c0_370, %c0_371] : memref<16x1x32xf32, #tpu.memory_space<vmem>>, vector<1x1x32xf32>
    %787 = vector.shape_cast %786 : vector<1x1x32xf32> to vector<1x32xf32>
    %c15 = arith.constant 15 : index
    %c0_372 = arith.constant 0 : index
    %c0_373 = arith.constant 0 : index
    %788 = vector.load %arg20[%c15, %c0_372, %c0_373] : memref<16x1x32xf32, #tpu.memory_space<vmem>>, vector<1x1x32xf32>
    %789 = vector.shape_cast %788 : vector<1x1x32xf32> to vector<1x32xf32>
    %cst_374 = arith.constant dense<0.000000e+00> : vector<4xf32>
    %790 = vector.multi_reduction <add>, %785, %cst_374 [1] : vector<4x32xf32> to vector<4xf32>
    %791 = vector.shape_cast %790 : vector<4xf32> to vector<4x1xf32>
    %cst_375 = arith.constant 3.200000e+01 : f32
    %792 = vector.broadcast %cst_375 : f32 to vector<4x1xf32>
    %793 = arith.divf %791, %792 : vector<4x1xf32>
    %794 = vector.broadcast %793 : vector<4x1xf32> to vector<4x32xf32>
    %795 = arith.subf %785, %794 : vector<4x32xf32>
    %796 = arith.mulf %795, %795 : vector<4x32xf32>
    %cst_376 = arith.constant dense<0.000000e+00> : vector<4xf32>
    %797 = vector.multi_reduction <add>, %796, %cst_376 [1] : vector<4x32xf32> to vector<4xf32>
    %798 = vector.shape_cast %797 : vector<4xf32> to vector<4x1xf32>
    %cst_377 = arith.constant 3.200000e+01 : f32
    %799 = vector.broadcast %cst_377 : f32 to vector<4x1xf32>
    %800 = arith.divf %798, %799 : vector<4x1xf32>
    %cst_378 = arith.constant 9.99999974E-6 : f32
    %801 = vector.broadcast %cst_378 : f32 to vector<4x1xf32>
    %802 = arith.addf %800, %801 : vector<4x1xf32>
    %803 = math.rsqrt %802 : vector<4x1xf32>
    %804 = vector.broadcast %803 : vector<4x1xf32> to vector<4x32xf32>
    %805 = arith.mulf %795, %804 : vector<4x32xf32>
    %806 = vector.broadcast %787 : vector<1x32xf32> to vector<4x32xf32>
    %807 = arith.mulf %805, %806 : vector<4x32xf32>
    %808 = vector.broadcast %789 : vector<1x32xf32> to vector<4x32xf32>
    %809 = arith.addf %807, %808 : vector<4x32xf32>
    %c2_379 = arith.constant 2 : index
    %c0_380 = arith.constant 0 : index
    %c0_381 = arith.constant 0 : index
    %810 = vector.load %arg21[%c2_379, %c0_380, %c0_381] : memref<4x1x32xf32, #tpu.memory_space<vmem>>, vector<1x1x32xf32>
    %811 = vector.shape_cast %810 : vector<1x1x32xf32> to vector<1x32xf32>
    %c3_382 = arith.constant 3 : index
    %c0_383 = arith.constant 0 : index
    %c0_384 = arith.constant 0 : index
    %812 = vector.load %arg21[%c3_382, %c0_383, %c0_384] : memref<4x1x32xf32, #tpu.memory_space<vmem>>, vector<1x1x32xf32>
    %813 = vector.shape_cast %812 : vector<1x1x32xf32> to vector<1x32xf32>
    %cst_385 = arith.constant dense<0.000000e+00> : vector<4xf32>
    %814 = vector.multi_reduction <add>, %809, %cst_385 [1] : vector<4x32xf32> to vector<4xf32>
    %815 = vector.shape_cast %814 : vector<4xf32> to vector<4x1xf32>
    %cst_386 = arith.constant 3.200000e+01 : f32
    %816 = vector.broadcast %cst_386 : f32 to vector<4x1xf32>
    %817 = arith.divf %815, %816 : vector<4x1xf32>
    %818 = vector.broadcast %817 : vector<4x1xf32> to vector<4x32xf32>
    %819 = arith.subf %809, %818 : vector<4x32xf32>
    %820 = arith.mulf %819, %819 : vector<4x32xf32>
    %cst_387 = arith.constant dense<0.000000e+00> : vector<4xf32>
    %821 = vector.multi_reduction <add>, %820, %cst_387 [1] : vector<4x32xf32> to vector<4xf32>
    %822 = vector.shape_cast %821 : vector<4xf32> to vector<4x1xf32>
    %cst_388 = arith.constant 3.200000e+01 : f32
    %823 = vector.broadcast %cst_388 : f32 to vector<4x1xf32>
    %824 = arith.divf %822, %823 : vector<4x1xf32>
    %cst_389 = arith.constant 9.99999974E-6 : f32
    %825 = vector.broadcast %cst_389 : f32 to vector<4x1xf32>
    %826 = arith.addf %824, %825 : vector<4x1xf32>
    %827 = math.rsqrt %826 : vector<4x1xf32>
    %828 = vector.broadcast %827 : vector<4x1xf32> to vector<4x32xf32>
    %829 = arith.mulf %819, %828 : vector<4x32xf32>
    %830 = vector.broadcast %811 : vector<1x32xf32> to vector<4x32xf32>
    %831 = arith.mulf %829, %830 : vector<4x32xf32>
    %832 = vector.broadcast %813 : vector<1x32xf32> to vector<4x32xf32>
    %833 = arith.addf %831, %832 : vector<4x32xf32>
    %c0_390 = arith.constant 0 : index
    %c0_391 = arith.constant 0 : index
    %c0_392 = arith.constant 0 : index
    %834 = vector.load %arg22[%c0_390, %c0_391, %c0_392] : memref<4x32x1xf32, #tpu.memory_space<vmem>>, vector<1x32x1xf32>
    %835 = vector.shape_cast %834 : vector<1x32x1xf32> to vector<32x1xf32>
    %cst_393 = arith.constant dense<0.000000e+00> : vector<4x1xf32>
    %836 = tpu.matmul %833, %835, %cst_393 {dimension_numbers = #tpu.dot_dimension_numbers<[1], [0], [0], [1], [0, 0, 1, 1], [], []>} : vector<4x32xf32>, vector<32x1xf32>, vector<4x1xf32> -> vector<4x1xf32>
    %c1_394 = arith.constant 1 : index
    %c0_395 = arith.constant 0 : index
    %c0_396 = arith.constant 0 : index
    %837 = vector.load %arg22[%c1_394, %c0_395, %c0_396] : memref<4x32x1xf32, #tpu.memory_space<vmem>>, vector<1x32x1xf32>
    %838 = vector.shape_cast %837 : vector<1x32x1xf32> to vector<32x1xf32>
    %cst_397 = arith.constant dense<0.000000e+00> : vector<4x1xf32>
    %839 = tpu.matmul %1, %838, %cst_397 {dimension_numbers = #tpu.dot_dimension_numbers<[1], [0], [0], [1], [0, 0, 1, 1], [], []>} : vector<4x32xf32>, vector<32x1xf32>, vector<4x1xf32> -> vector<4x1xf32>
    %840 = arith.addf %836, %839 : vector<4x1xf32>
    %c2_398 = arith.constant 2 : index
    %c0_399 = arith.constant 0 : index
    %c0_400 = arith.constant 0 : index
    %841 = vector.load %arg22[%c2_398, %c0_399, %c0_400] : memref<4x32x1xf32, #tpu.memory_space<vmem>>, vector<1x32x1xf32>
    %842 = vector.shape_cast %841 : vector<1x32x1xf32> to vector<32x1xf32>
    %cst_401 = arith.constant dense<0.000000e+00> : vector<4x1xf32>
    %843 = tpu.matmul %54, %842, %cst_401 {dimension_numbers = #tpu.dot_dimension_numbers<[1], [0], [0], [1], [0, 0, 1, 1], [], []>} : vector<4x32xf32>, vector<32x1xf32>, vector<4x1xf32> -> vector<4x1xf32>
    %844 = arith.addf %840, %843 : vector<4x1xf32>
    %c3_402 = arith.constant 3 : index
    %c0_403 = arith.constant 0 : index
    %c0_404 = arith.constant 0 : index
    %845 = vector.load %arg22[%c3_402, %c0_403, %c0_404] : memref<4x32x1xf32, #tpu.memory_space<vmem>>, vector<1x32x1xf32>
    %846 = vector.shape_cast %845 : vector<1x32x1xf32> to vector<32x1xf32>
    %cst_405 = arith.constant dense<0.000000e+00> : vector<4x1xf32>
    %847 = tpu.matmul %460, %846, %cst_405 {dimension_numbers = #tpu.dot_dimension_numbers<[1], [0], [0], [1], [0, 0, 1, 1], [], []>} : vector<4x32xf32>, vector<32x1xf32>, vector<4x1xf32> -> vector<4x1xf32>
    %848 = arith.addf %844, %847 : vector<4x1xf32>
    %c0_406 = arith.constant 0 : index
    %c0_407 = arith.constant 0 : index
    %849 = vector.load %arg23[%c0_406, %c0_407] : memref<1x1xf32, #tpu.memory_space<vmem>>, vector<1x1xf32>
    %850 = vector.broadcast %849 : vector<1x1xf32> to vector<4x1xf32>
    %851 = arith.addf %848, %850 : vector<4x1xf32>
    %852 = arith.negf %851 : vector<4x1xf32>
    %853 = math.exp %852 : vector<4x1xf32>
    %cst_408 = arith.constant 1.000000e+00 : f32
    %854 = vector.broadcast %cst_408 : f32 to vector<4x1xf32>
    %855 = arith.addf %854, %853 : vector<4x1xf32>
    %856 = arith.divf %854, %855 : vector<4x1xf32>
    %857 = vector.broadcast %856 : vector<4x1xf32> to vector<4x8xf32>
    %858 = arith.mulf %48, %857 : vector<4x8xf32>
    %cst_409 = arith.constant 1.000000e+00 : f32
    %859 = vector.broadcast %cst_409 : f32 to vector<4x1xf32>
    %860 = arith.subf %859, %856 : vector<4x1xf32>
    %861 = vector.broadcast %860 : vector<4x1xf32> to vector<4x8xf32>
    %862 = arith.mulf %454, %861 : vector<4x8xf32>
    %863 = arith.addf %858, %862 : vector<4x8xf32>
    %c0_410 = arith.constant 0 : index
    %c0_411 = arith.constant 0 : index
    %c0_412 = arith.constant 0 : index
    %c0_413 = arith.constant 0 : index
    %864 = vector.load %arg24[%c0_410, %c0_411, %c0_412, %c0_413] : memref<1x5x4x8xf32, #tpu.memory_space<vmem>>, vector<1x1x4x8xf32>
    %865 = vector.shape_cast %864 : vector<1x1x4x8xf32> to vector<4x8xf32>
    %866 = vector.shape_cast %39 : vector<4x8xf32> to vector<1x1x4x8xf32>
    tpu.vector_store %arg24[%c0_410, %c0_411, %c0_412, %c0_413], %866 {strides = array<i32>} : memref<1x5x4x8xf32, #tpu.memory_space<vmem>>, vector<1x1x4x8xf32>,
    %c0_414 = arith.constant 0 : index
    %c1_415 = arith.constant 1 : index
    %c0_416 = arith.constant 0 : index
    %c0_417 = arith.constant 0 : index
    %867 = vector.load %arg24[%c0_414, %c1_415, %c0_416, %c0_417] : memref<1x5x4x8xf32, #tpu.memory_space<vmem>>, vector<1x1x4x8xf32>
    %868 = vector.shape_cast %867 : vector<1x1x4x8xf32> to vector<4x8xf32>
    %869 = vector.shape_cast %445 : vector<4x8xf32> to vector<1x1x4x8xf32>
    tpu.vector_store %arg24[%c0_414, %c1_415, %c0_416, %c0_417], %869 {strides = array<i32>} : memref<1x5x4x8xf32, #tpu.memory_space<vmem>>, vector<1x1x4x8xf32>,
    %c0_418 = arith.constant 0 : index
    %c2_419 = arith.constant 2 : index
    %c0_420 = arith.constant 0 : index
    %c0_421 = arith.constant 0 : index
    %870 = vector.load %arg24[%c0_418, %c2_419, %c0_420, %c0_421] : memref<1x5x4x8xf32, #tpu.memory_space<vmem>>, vector<1x1x4x8xf32>
    %871 = vector.shape_cast %870 : vector<1x1x4x8xf32> to vector<4x8xf32>
    %872 = vector.shape_cast %48 : vector<4x8xf32> to vector<1x1x4x8xf32>
    tpu.vector_store %arg24[%c0_418, %c2_419, %c0_420, %c0_421], %872 {strides = array<i32>} : memref<1x5x4x8xf32, #tpu.memory_space<vmem>>, vector<1x1x4x8xf32>,
    %c0_422 = arith.constant 0 : index
    %c3_423 = arith.constant 3 : index
    %c0_424 = arith.constant 0 : index
    %c0_425 = arith.constant 0 : index
    %873 = vector.load %arg24[%c0_422, %c3_423, %c0_424, %c0_425] : memref<1x5x4x8xf32, #tpu.memory_space<vmem>>, vector<1x1x4x8xf32>
    %874 = vector.shape_cast %873 : vector<1x1x4x8xf32> to vector<4x8xf32>
    %875 = vector.shape_cast %454 : vector<4x8xf32> to vector<1x1x4x8xf32>
    tpu.vector_store %arg24[%c0_422, %c3_423, %c0_424, %c0_425], %875 {strides = array<i32>} : memref<1x5x4x8xf32, #tpu.memory_space<vmem>>, vector<1x1x4x8xf32>,
    %c0_426 = arith.constant 0 : index
    %c4_427 = arith.constant 4 : index
    %c0_428 = arith.constant 0 : index
    %c0_429 = arith.constant 0 : index
    %876 = vector.load %arg24[%c0_426, %c4_427, %c0_428, %c0_429] : memref<1x5x4x8xf32, #tpu.memory_space<vmem>>, vector<1x1x4x8xf32>
    %877 = vector.shape_cast %876 : vector<1x1x4x8xf32> to vector<4x8xf32>
    %878 = vector.shape_cast %863 : vector<4x8xf32> to vector<1x1x4x8xf32>
    tpu.vector_store %arg24[%c0_426, %c4_427, %c0_428, %c0_429], %878 {strides = array<i32>} : memref<1x5x4x8xf32, #tpu.memory_space<vmem>>, vector<1x1x4x8xf32>,
    %c0_430 = arith.constant 0 : index
    %c0_431 = arith.constant 0 : index
    %c0_432 = arith.constant 0 : index
    %c0_433 = arith.constant 0 : index
    %879 = vector.load %arg25[%c0_430, %c0_431, %c0_432, %c0_433] : memref<1x2x4x32xf32, #tpu.memory_space<vmem>>, vector<1x1x4x32xf32>
    %880 = vector.shape_cast %879 : vector<1x1x4x32xf32> to vector<4x32xf32>
    %881 = vector.shape_cast %54 : vector<4x32xf32> to vector<1x1x4x32xf32>
    tpu.vector_store %arg25[%c0_430, %c0_431, %c0_432, %c0_433], %881 {strides = array<i32>} : memref<1x2x4x32xf32, #tpu.memory_space<vmem>>, vector<1x1x4x32xf32>,
    %c0_434 = arith.constant 0 : index
    %c1_435 = arith.constant 1 : index
    %c0_436 = arith.constant 0 : index
    %c0_437 = arith.constant 0 : index
    %882 = vector.load %arg25[%c0_434, %c1_435, %c0_436, %c0_437] : memref<1x2x4x32xf32, #tpu.memory_space<vmem>>, vector<1x1x4x32xf32>
    %883 = vector.shape_cast %882 : vector<1x1x4x32xf32> to vector<4x32xf32>
    %884 = vector.shape_cast %460 : vector<4x32xf32> to vector<1x1x4x32xf32>
    tpu.vector_store %arg25[%c0_434, %c1_435, %c0_436, %c0_437], %884 {strides = array<i32>} : memref<1x2x4x32xf32, #tpu.memory_space<vmem>>, vector<1x1x4x32xf32>,
    %c0_438 = arith.constant 0 : index
    %c0_439 = arith.constant 0 : index
    %c0_440 = arith.constant 0 : index
    %c0_441 = arith.constant 0 : index
    %885 = vector.load %arg26[%c0_438, %c0_439, %c0_440, %c0_441] : memref<1x2x4x1xf32, #tpu.memory_space<vmem>>, vector<1x1x4x1xf32>
    %886 = vector.shape_cast %885 : vector<1x1x4x1xf32> to vector<4x1xf32>
    %887 = vector.shape_cast %856 : vector<4x1xf32> to vector<1x1x4x1xf32>
    tpu.vector_store %arg26[%c0_438, %c0_439, %c0_440, %c0_441], %887 {strides = array<i32>} : memref<1x2x4x1xf32, #tpu.memory_space<vmem>>, vector<1x1x4x1xf32>,
    %c0_442 = arith.constant 0 : index
    %c1_443 = arith.constant 1 : index
    %c0_444 = arith.constant 0 : index
    %c0_445 = arith.constant 0 : index
    %888 = vector.load %arg26[%c0_442, %c1_443, %c0_444, %c0_445] : memref<1x2x4x1xf32, #tpu.memory_space<vmem>>, vector<1x1x4x1xf32>
    %889 = vector.shape_cast %888 : vector<1x1x4x1xf32> to vector<4x1xf32>
    %890 = vector.shape_cast %851 : vector<4x1xf32> to vector<1x1x4x1xf32>
    tpu.vector_store %arg26[%c0_442, %c1_443, %c0_444, %c0_445], %890 {strides = array<i32>} : memref<1x2x4x1xf32, #tpu.memory_space<vmem>>, vector<1x1x4x1xf32>,
    return
  }
  func.func @transform_0(%arg0: i32) -> (i32, i32, i32) {
    %c0_i32 = arith.constant 0 : i32
    %c0_i32_0 = arith.constant 0 : i32
    %c0_i32_1 = arith.constant 0 : i32
    return %arg0, %c0_i32, %c0_i32_0 : i32, i32, i32
  }
  func.func @transform_1(%arg0: i32) -> (i32, i32, i32, i32) {
    %c0_i32 = arith.constant 0 : i32
    %c0_i32_0 = arith.constant 0 : i32
    %c0_i32_1 = arith.constant 0 : i32
    %c0_i32_2 = arith.constant 0 : i32
    return %arg0, %c0_i32, %c0_i32_0, %c0_i32_1 : i32, i32, i32, i32
  }
  func.func @transform_2(%arg0: i32) -> (i32, i32, i32) {
    %c0_i32 = arith.constant 0 : i32
    %c0_i32_0 = arith.constant 0 : i32
    %c0_i32_1 = arith.constant 0 : i32
    return %arg0, %c0_i32, %c0_i32_0 : i32, i32, i32
  }
  func.func @transform_3(%arg0: i32) -> (i32, i32, i32) {
    %c0_i32 = arith.constant 0 : i32
    %c0_i32_0 = arith.constant 0 : i32
    %c0_i32_1 = arith.constant 0 : i32
    return %arg0, %c0_i32, %c0_i32_0 : i32, i32, i32
  }
  func.func @transform_4(%arg0: i32) -> (i32, i32) {
    %c0_i32 = arith.constant 0 : i32
    %c0_i32_0 = arith.constant 0 : i32
    %c0_i32_1 = arith.constant 0 : i32
    return %c0_i32, %c0_i32_0 : i32, i32
  }
  func.func @transform_5(%arg0: i32) -> (i32, i32) {
    %c0_i32 = arith.constant 0 : i32
    %c0_i32_0 = arith.constant 0 : i32
    %c0_i32_1 = arith.constant 0 : i32
    return %c0_i32, %c0_i32_0 : i32, i32
  }
  func.func @transform_6(%arg0: i32) -> (i32, i32) {
    %c0_i32 = arith.constant 0 : i32
    %c0_i32_0 = arith.constant 0 : i32
    %c0_i32_1 = arith.constant 0 : i32
    return %c0_i32, %c0_i32_0 : i32, i32
  }
  func.func @transform_7(%arg0: i32) -> (i32, i32, i32) {
    %c0_i32 = arith.constant 0 : i32
    %c0_i32_0 = arith.constant 0 : i32
    %c0_i32_1 = arith.constant 0 : i32
    %c0_i32_2 = arith.constant 0 : i32
    return %c0_i32, %c0_i32_0, %c0_i32_1 : i32, i32, i32
  }
  func.func @transform_8(%arg0: i32) -> (i32, i32, i32) {
    %c0_i32 = arith.constant 0 : i32
    %c0_i32_0 = arith.constant 0 : i32
    %c0_i32_1 = arith.constant 0 : i32
    %c0_i32_2 = arith.constant 0 : i32
    return %c0_i32, %c0_i32_0, %c0_i32_1 : i32, i32, i32
  }
  func.func @transform_9(%arg0: i32) -> (i32, i32, i32) {
    %c0_i32 = arith.constant 0 : i32
    %c0_i32_0 = arith.constant 0 : i32
    %c0_i32_1 = arith.constant 0 : i32
    %c0_i32_2 = arith.constant 0 : i32
    return %c0_i32, %c0_i32_0, %c0_i32_1 : i32, i32, i32
  }
  func.func @transform_10(%arg0: i32) -> (i32, i32, i32) {
    %c0_i32 = arith.constant 0 : i32
    %c0_i32_0 = arith.constant 0 : i32
    %c0_i32_1 = arith.constant 0 : i32
    %c0_i32_2 = arith.constant 0 : i32
    return %c0_i32, %c0_i32_0, %c0_i32_1 : i32, i32, i32
  }
  func.func @transform_11(%arg0: i32) -> (i32, i32, i32) {
    %c0_i32 = arith.constant 0 : i32
    %c0_i32_0 = arith.constant 0 : i32
    %c0_i32_1 = arith.constant 0 : i32
    %c0_i32_2 = arith.constant 0 : i32
    return %c0_i32, %c0_i32_0, %c0_i32_1 : i32, i32, i32
  }
  func.func @transform_12(%arg0: i32) -> (i32, i32, i32) {
    %c0_i32 = arith.constant 0 : i32
    %c0_i32_0 = arith.constant 0 : i32
    %c0_i32_1 = arith.constant 0 : i32
    %c0_i32_2 = arith.constant 0 : i32
    return %c0_i32, %c0_i32_0, %c0_i32_1 : i32, i32, i32
  }
  func.func @transform_13(%arg0: i32) -> (i32, i32, i32) {
    %c0_i32 = arith.constant 0 : i32
    %c0_i32_0 = arith.constant 0 : i32
    %c0_i32_1 = arith.constant 0 : i32
    %c0_i32_2 = arith.constant 0 : i32
    return %c0_i32, %c0_i32_0, %c0_i32_1 : i32, i32, i32
  }
  func.func @transform_14(%arg0: i32) -> (i32, i32, i32) {
    %c0_i32 = arith.constant 0 : i32
    %c0_i32_0 = arith.constant 0 : i32
    %c0_i32_1 = arith.constant 0 : i32
    %c0_i32_2 = arith.constant 0 : i32
    return %c0_i32, %c0_i32_0, %c0_i32_1 : i32, i32, i32
  }
  func.func @transform_15(%arg0: i32) -> (i32, i32, i32) {
    %c0_i32 = arith.constant 0 : i32
    %c0_i32_0 = arith.constant 0 : i32
    %c0_i32_1 = arith.constant 0 : i32
    %c0_i32_2 = arith.constant 0 : i32
    return %c0_i32, %c0_i32_0, %c0_i32_1 : i32, i32, i32
  }
  func.func @transform_16(%arg0: i32) -> (i32, i32, i32) {
    %c0_i32 = arith.constant 0 : i32
    %c0_i32_0 = arith.constant 0 : i32
    %c0_i32_1 = arith.constant 0 : i32
    %c0_i32_2 = arith.constant 0 : i32
    return %c0_i32, %c0_i32_0, %c0_i32_1 : i32, i32, i32
  }
  func.func @transform_17(%arg0: i32) -> (i32, i32, i32) {
    %c0_i32 = arith.constant 0 : i32
    %c0_i32_0 = arith.constant 0 : i32
    %c0_i32_1 = arith.constant 0 : i32
    %c0_i32_2 = arith.constant 0 : i32
    return %c0_i32, %c0_i32_0, %c0_i32_1 : i32, i32, i32
  }
  func.func @transform_18(%arg0: i32) -> (i32, i32, i32) {
    %c0_i32 = arith.constant 0 : i32
    %c0_i32_0 = arith.constant 0 : i32
    %c0_i32_1 = arith.constant 0 : i32
    %c0_i32_2 = arith.constant 0 : i32
    return %c0_i32, %c0_i32_0, %c0_i32_1 : i32, i32, i32
  }
  func.func @transform_19(%arg0: i32) -> (i32, i32, i32) {
    %c0_i32 = arith.constant 0 : i32
    %c0_i32_0 = arith.constant 0 : i32
    %c0_i32_1 = arith.constant 0 : i32
    %c0_i32_2 = arith.constant 0 : i32
    return %c0_i32, %c0_i32_0, %c0_i32_1 : i32, i32, i32
  }
  func.func @transform_20(%arg0: i32) -> (i32, i32, i32) {
    %c0_i32 = arith.constant 0 : i32
    %c0_i32_0 = arith.constant 0 : i32
    %c0_i32_1 = arith.constant 0 : i32
    %c0_i32_2 = arith.constant 0 : i32
    return %c0_i32, %c0_i32_0, %c0_i32_1 : i32, i32, i32
  }
  func.func @transform_21(%arg0: i32) -> (i32, i32, i32) {
    %c0_i32 = arith.constant 0 : i32
    %c0_i32_0 = arith.constant 0 : i32
    %c0_i32_1 = arith.constant 0 : i32
    %c0_i32_2 = arith.constant 0 : i32
    return %c0_i32, %c0_i32_0, %c0_i32_1 : i32, i32, i32
  }
  func.func @transform_22(%arg0: i32) -> (i32, i32) {
    %c0_i32 = arith.constant 0 : i32
    %c0_i32_0 = arith.constant 0 : i32
    %c0_i32_1 = arith.constant 0 : i32
    return %c0_i32, %c0_i32_0 : i32, i32
  }
  func.func @transform_23(%arg0: i32) -> (i32, i32, i32, i32) {
    %c0_i32 = arith.constant 0 : i32
    %c0_i32_0 = arith.constant 0 : i32
    %c0_i32_1 = arith.constant 0 : i32
    %c0_i32_2 = arith.constant 0 : i32
    return %arg0, %c0_i32, %c0_i32_0, %c0_i32_1 : i32, i32, i32, i32
  }
  func.func @transform_24(%arg0: i32) -> (i32, i32, i32, i32) {
    %c0_i32 = arith.constant 0 : i32
    %c0_i32_0 = arith.constant 0 : i32
    %c0_i32_1 = arith.constant 0 : i32
    %c0_i32_2 = arith.constant 0 : i32
    return %arg0, %c0_i32, %c0_i32_0, %c0_i32_1 : i32, i32, i32, i32
  }
  func.func @transform_25(%arg0: i32) -> (i32, i32, i32, i32) {
    %c0_i32 = arith.constant 0 : i32
    %c0_i32_0 = arith.constant 0 : i32
    %c0_i32_1 = arith.constant 0 : i32
    %c0_i32_2 = arith.constant 0 : i32
    return %arg0, %c0_i32, %c0_i32_0, %c0_i32_1 : i32, i32, i32, i32
  }
}

</mosaic_0001>

<bundles_post_ra>
// kernel: squeeze.16
= control target key start
LH: loop header
LB: loop body
LE: loop exit
PB: predicated region body
PF: predicated region fallthrough
CT: control target
= control target key end

     0   :  { %s77_s0 = inlined_call_operand.vmem [shape: f32[2,4], index: 0, kind: input, shape index: {}]   ;;  %s78_s1 = inlined_call_operand.hbm [shape: f32[8,1], index: 1, kind: output, shape index: {}]  }
   0x1   :  { %v6_v0 = vld [vmem:[%s77_s0] sm:$0x3] }
   0x2   :  { %7 = vst [vmem:[#allocation3] sm:$0x3] %v6_v0 }
   0x3   :  { %2 = vsyncpa [#allocation1], 0  ;;  %vm9_vm0 = vcmask 31744   ;;  %s59_s0 = smov 4   ;;  %vm15_vm1 = vcmask 64544   ;;  %s60_s8 = smov [#allocation0]  }
   0x4   :  { %s29_s9 = sshll.u32 %s60_s8, 4  ;;  %s30_s9 = int_to_ptr.vmem [resolvable:$true] %s29_s9 }
   0x5   :  { %s37_s10 = scalar_lea.vmem %s30_s9, 16  ;;  %s41_s11 = scalar_lea.vmem %s30_s9, 32 }
   0x6   :  { %p38_p0 = scmp.ne.s32.totalorder %s30_s9, %s37_s10  ;;  %p42_p1 = scmp.lt.s32.totalorder %s30_s9, %s30_s9 }
   0x7   :  { %p43_p2 = scmp.lt.s32.totalorder %s41_s11, %s37_s10 }
   0x9   :  { %v12_v1 = vld [vmem:[#allocation3 + $0x1] sm:$0x1]   ;;  %v8_v2 = vld [vmem:[#allocation3] sm:$0x1]   ;;  %p44_p3 = por %p43_p2, %p42_p1 }
   0xa   :  { %13 = vrot.lane.b32.xlu0 %v12_v1, %s59_s0  ;;  %10 = vst.msk [vmem:[#allocation2] sm:$0x1] %vm9_vm0, %v8_v2  }
   0xb   :  { %p45_p4 = pnand %p44_p3, %p38_p0 }
  0x7c   :  { %v14_v3 = vpop.permute.xlu0 %13  }
  0x7d   :  { %16 = vst.msk [vmem:[#allocation2] sm:$0x1] %vm15_vm1, %v14_v3  }
  0x84   :  { %v21_v4 = vld [vmem:[#allocation2] sm:$0x1] }
  0x85   :  { %24 = vst [vmem:[#allocation0] sm:$0x1] %v21_v4 }
  0x86   :  { %48 = shalt.err (!%p45_p4)
}
  0x87   :  { %32 = dma.vmem_to_hbm [thread:$0]  %s30_s9, 16, %s78_s1, [#allocation1]  }
  0x88   :  { %57 = dma.done.wait [#allocation1], 16  }
  0x89   :  { %58 = vsyncadd [#allocation1], 4294967280 }
  0x8a   :  { %34 = vsyncpa [#allocation1], 1 }

// kernel: mike_knowledge_selection.1
= control target key start
LH: loop header
LB: loop body
LE: loop exit
PB: predicated region body
PF: predicated region fallthrough
CT: control target
= control target key end

     0   :  { %s11525_s0 = inlined_call_operand.vmem [shape: f32[2,4,32], index: 0, kind: input, shape index: {}]   ;;  %s11526_s1 = inlined_call_operand.vmem [shape: f32[2,4,8,32], index: 1, kind: input, shape index: {}]   ;;  %s11527_s2 = inlined_call_operand.vmem [shape: f32[2,4,8], index: 2, kind: input, shape index: {}]   ;;  %s11528_s3 = inlined_call_operand.vmem [shape: f32[2,4,8], index: 3, kind: input, shape index: {}]   ;;  %s11529_s4 = inlined_call_operand.vmem [shape: f32[4,4], index: 4, kind: input, shape index: {}]   ;;  %s11530_s5 = inlined_call_operand.vmem [shape: f32[32,64], index: 5, kind: input, shape index: {}]   ;;  %s11531_s6 = inlined_call_operand.vmem [shape: f32[1,64], index: 6, kind: input, shape index: {}]   ;;  %s11532_s7 = inlined_call_operand.vmem [shape: f32[4,32,32], index: 7, kind: input, shape index: {}]   ;;  %s11533_s8 = inlined_call_operand.vmem [shape: f32[4,1,32], index: 8, kind: input, shape index: {}]   ;;  %s11534_s9 = inlined_call_operand.vmem [shape: f32[2,1,32], index: 9, kind: input, shape index: {}]   ;;  %s11535_s10 = inlined_call_operand.vmem [shape: f32[2,4,32], index: 10, kind: input, shape index: {}]   ;;  %s11536_s11 = inlined_call_operand.vmem [shape: f32[4,32,96], index: 11, kind: input, shape index: {}]   ;;  %s11537_s12 = inlined_call_operand.vmem [shape: f32[4,1,96], index: 12, kind: input, shape index: {}]   ;;  %s11538_s13 = inlined_call_operand.vmem [shape: f32[4,32,32], index: 13, kind: input, shape index: {}]   ;;  %s11539_s14 = inlined_call_operand.vmem [shape: f32[4,1,32], index: 14, kind: input, shape index: {}]   ;;  %s11540_s15 = inlined_call_operand.vmem [shape: f32[4,32,64], index: 15, kind: input, shape index: {}]   ;;  %s11541_s16 = inlined_call_operand.vmem [shape: f32[4,1,64], index: 16, kind: input, shape index: {}]   ;;  %s11542_s17 = inlined_call_operand.vmem [shape: f32[4,64,32], index: 17, kind: input, shape index: {}]   ;;  %s11543_s18 = inlined_call_operand.vmem [shape: f32[4,1,32], index: 18, kind: input, shape index: {}]   ;;  %s11544_s19 = inlined_call_operand.vmem [shape: f32[16,1,32], index: 19, kind: input, shape index: {}]   ;;  %s11545_s20 = inlined_call_operand.vmem [shape: f32[4,1,32], index: 20, kind: input, shape index: {}]   ;;  %s11546_s21 = inlined_call_operand.vmem [shape: f32[4,32,1], index: 21, kind: input, shape index: {}]   ;;  %s11547_s22 = inlined_call_operand.<no memory space> [shape: f32[1,1], index: 22, kind: input, shape index: {}]   ;;  %s11548_s23 = inlined_call_operand.vmem [shape: f32[2,5,4,8], index: 23, kind: output, shape index: {0}]   ;;  %s11549_s24 = inlined_call_operand.vmem [shape: f32[2,2,4,32], index: 24, kind: output, shape index: {1}]   ;;  %s11550_s25 = inlined_call_operand.vmem [shape: f32[2,2,4,1], index: 25, kind: output, shape index: {2}]  }
   0x1   :  { %11588 = sst [smem:[#allocation6_spill]] %s11525_s0  ;;  %v31_v0 = vstv %s11547_s22 }
   0x2   :  { %11589 = sst [smem:[#allocation7_spill]] %s11526_s1  ;;  %32 = vst [vmem:[#allocation2] sm:$0x1] %v31_v0 }
   0x3   :  { %11590 = sst [smem:[#allocation8_spill]] %s11527_s2 }
   0x4   :  { %11591 = sst [smem:[#allocation9_spill]] %s11528_s3 }
   0x5   :  { %11592 = sst [smem:[#allocation10_spill]] %s11529_s4 }
   0x6   :  { %11593 = sst [smem:[#allocation11_spill]] %s11530_s5 }
   0x7   :  { %11594 = sst [smem:[#allocation12_spill]] %s11531_s6  ;;  %s10184_s6 = smov 0  }
   0x8   :  { %11595 = sst [smem:[#allocation13_spill]] %s11532_s7 }
   0x9   :  { %11596 = sst [smem:[#allocation14_spill]] %s11533_s8 }
   0xa   :  { %11597 = sst [smem:[#allocation15_spill]] %s11534_s9 }
   0xb   :  { %11598 = sst [smem:[#allocation16_spill]] %s11535_s10 }
   0xc   :  { %11599 = sst [smem:[#allocation17_spill]] %s11539_s14 }
   0xd   :  { %11600 = sst [smem:[#allocation18_spill]] %s11546_s21 }
   0xe   :  { %11601 = sst [smem:[#allocation19_spill]] %s11548_s23 }
   0xf   :  { %11602 = sst [smem:[#allocation20_spill]] %s11549_s24 }
  0x10   :  { %11603 = sst [smem:[#allocation21_spill]] %s11550_s25 }
  0x11 LB: > { %11604 = sst [smem:[#allocation3_spill]] %s10034_s6  ;;  %s8713_s30 = sadd.s32 4294967295, %s10034_s6   ;;  %s10034_s6 = sphi %s10184_s6, %s38_s6  }
  0x12   : > { %p8717_p0 = scmp.ge.s32.totalorder %s10034_s6, 1  ;;  %p721_p1 = scmp.lt.s32.totalorder %s10034_s6, 3 }
  0x14   : > { %p722_p2 = pnand %p8717_p0, %p721_p1 }
  0x16   : > { %725 = sbr.rel (%p722_p2) target bundleno = 16383 (0x3fff), region = 112 }
  0x1b   : > { %s11605_s26 = sld [smem:[#allocation11_spill]]  ;;  %p811_p3 = scmp.lt.s32.totalorder %s8713_s30, 1  ;;  %v972_v3 = vlaneseq  ;;  %v10036_v4 = vmov 0.0   ;;  %vm10037_vm0 = vmmov 0   ;;  %v10038_v6 = vmov 1966171168  }
  0x1c   : > { %9305 = vmatprep.subr.mxu1 %v10036_v4  ;;  %9307 = vmatprep.mubr.msk.f32.mxu1 %vm10037_vm0, %v10036_v4  ;;  %v970_v7 = vunpack.c.l.s4 %v10038_v6  ;;  %vm862_vm1 = vcmask 261120   ;;  %s11607_s29 = sld [smem:[#allocation7_spill]]  ;;  %vm984_vm2 = vcmask 64512   ;;  %vm1626_vm3 = vcmask 1042434   ;;  %s11558_s5 = smov 96  }
  0x1d   : > { %s11644_s30 = smov (!%p811_p3, %s8713_s30), 1  ;;  %v973_v8 = vshrl.u32 %v972_v3, 7  ;;  %s11608_s1 = sld [smem:[#allocation9_spill]]  ;;  %vm1629_vm4 = vcmask 1043459   ;;  %vm2056_vm5 = vcmask 1040384   ;;  %vm1623_vm6 = vcmask 1041409  }
  0x1e   : > { %11606 = sst [smem:[#allocation4_spill]] %s11644_s30  ;;  %s9030_s9 = sshll.u32 %s11644_s30, 5  ;;  %v971_v10 = vunpack.c.0.s8 %v970_v7  ;;  %vm1633_vm8 = vcmask 60416   ;;  %vm3122_vm9 = vcmask 257024   ;;  %vm2227_vm10 = vcmask 27648  }
  0x1f   : > { %s10216_s7 = sshll.u32 %s11644_s30, 2  ;;  %s11609_s28 = sld [smem:[#allocation13_spill]]  ;;  %vm2245_vm11 = vcmask 1043456   ;;  %vm2241_vm12 = vcmask 31744   ;;  %vm3259_vm13 = vcmask 523264   ;;  %vm8552_vm14 = vcmask 3072  }
  0x20   : > { %v10226_v13 = vsub.s32 %v971_v10, %v973_v8  ;;  %s11612_s0 = sld [smem:[#allocation12_spill]]  ;;  %s9892_s3 = smul.u32 20, %s11644_s30 }
  0x21   : > { %v854_v1 = vld [vmem:[%s11605_s26 + $0x18] sm:$0xff]  ;;  %v853_v2 = vld [vmem:[%s11605_s26 + $0x10] sm:$0xff]  ;;  %v852_v5 = vld [vmem:[%s11605_s26 + $0x8] sm:$0xff]  ;;  %s11613_s22 = sld [smem:[#allocation14_spill]]  ;;  %s11572_s27 = smov 72  }
  0x22   : > { %9291 = vmatprep.subr.mxu0 %v854_v1  ;;  %v851_v9 = vld [vmem:[%s11605_s26] sm:$0xff]  ;;  %s10213_s2 = scalar_lea.vmem %s11607_s29, %s9030_s9  ;;  %s11614_s4 = sld [smem:[#allocation15_spill]] }
  0x23   : > { %9292 = vmatpush3.msra.mxu0 %v854_v1  ;;  %v844_v11 = vld [vmem:[%s10213_s2] sm:$0xff]  ;;  %v10220_v12 = vld [vmem:[%s10213_s2 + $0x8] sm:$0xff]  ;;  %s827_s8 = scalar_lea.vmem %s11608_s1, %s10216_s7  ;;  %v10233_v15 = vld [vmem:[%s10213_s2 + $0x10] sm:$0xff]  ;;  %s11610_s1 = sld [smem:[#allocation6_spill]] }
  0x24   : > { %9293 = vmatprep.subr.mxu0 %v853_v2  ;;  %9299 = vmatprep.mubr.msk.f32.mxu0 %vm862_vm1, %v844_v11  ;;  %v8733_v16 = vld.sshfl [vmem:[%s827_s8] sm:$0x33 pattern:$0x75316420]  ;;  %v10245_v20 = vld [vmem:[%s10213_s2 + $0x18] sm:$0xff]  ;;  %s11616_s23 = sld [smem:[#allocation19_spill]] }
  0x25   : > { %9294 = vmatpush3.msra.mxu0 %v853_v2  ;;  %v1204_v14 = vld [vmem:[%s11609_s28 + $0x18] sm:$0xff]  ;;  %9306 = vmatpush3.msra.mxu1 %v844_v11  ;;  %v1203_v17 = vld [vmem:[%s11609_s28 + $0x10] sm:$0xff]  ;;  %v968_v18 = vcombine.high %v8733_v16, %v8733_v16  ;;  %v975_v19 = vrot.slane %v8733_v16, %v10226_v13  ;;  %v1202_v21 = vld [vmem:[%s11609_s28 + $0x8] sm:$0xff]  ;;  %s11617_s10 = sld [smem:[#allocation16_spill]]  ;;  %s11622_s9 = smov 96  }
  0x26   : > { %9295 = vmatprep.subr.mxu0 %v852_v5  ;;  %9310 = vmatprep.subr.mxu1 %v10036_v4  ;;  %v1201_v22 = vld [vmem:[%s11609_s28] sm:$0xff]  ;;  %s11618_s24 = sld [smem:[#allocation20_spill]]  ;;  %s11628_s25 = smov 72  }
  0x27   : > { %9296 = vmatpush3.msra.mxu0 %v852_v5  ;;  %9308 = vmatmul.mubr.msk.f32.vlgmr.msra.gmra.mxu1 %vm984_vm2, %v975_v19  ;;  %v982_v23 = vrot.slane %v968_v18, %v10226_v13  ;;  %v983_v25 = vcombine.high %v975_v19, %v975_v19  ;;  %v8728_v27 = vld [vmem:[%s11612_s0] ss:$0 sm:$0xff]  ;;  %s11615_s0 = sld [smem:[#allocation8_spill]]  ;;  %s11629_s6 = smov 104  }
  0x28   : > { %9297 = vmatprep.subr.mxu0 %v851_v9  ;;  %9311 = vmatpush3.msra.mxu1 %v10220_v12  ;;  %v8742_v34 = vld [vmem:[%s11613_s22] ss:$0 sm:$0xff]  ;;  %v8880_v48 = vld [vmem:[%s11614_s4 + $0x1] sm:$0x1]  ;;  %s11620_s14 = sld [smem:[#allocation17_spill]]  ;;  %s11630_s26 = smov 48  }
  0x29   : > { %9298 = vmatpush3.msra.mxu0 %v851_v9  ;;  %s10255_s8 = scalar_lea.vmem %s11610_s1, %s10216_s7  ;;  %9312 = vmatprep.mubr.msk.f32.mxu1 %vm10037_vm0, %v10036_v4  ;;  %s11564_s1 = smov 112  }
  0x2a   : > { %9300 = vmatmul.mubr.msk.f32.vlgmr.msra.gmra.mxu0 %vm862_vm1, %v10220_v12  ;;  %9320 = vmatprep.subr.mxu0 %v10036_v4  ;;  %11611 = sst [smem:[#allocation5_spill]] %s10255_s8  ;;  %v843_v24 = vld [vmem:[%s10255_s8] sm:$0xf]  ;;  %s11631_s8 = smov 40  }
  0x2b   : > { %9321 = vmatpush3.msra.mxu0 %v1204_v14  ;;  %9302 = vmatprep.mubr.msk.f32.mxu0 %vm862_vm1, %v10233_v15 }
  0x2c   : > { %9322 = vmatprep.subr.mxu0 %v10036_v4  ;;  %9313 = vmatmul.mubr.msk.f32.vlgmr.msra.gmra.mxu1 %vm984_vm2, %v982_v23 }
  0x2d   : > { %9323 = vmatpush3.msra.mxu0 %v1203_v17  ;;  %9315 = vmatprep.subr.mxu1 %v10036_v4  ;;  %s823_s29 = scalar_lea.vmem %s11615_s0, %s10216_s7  ;;  %s10354_s7 = scalar_lea.vmem %s11616_s23, %s9892_s3 }
  0x2e   : > { %9303 = vmatmul.mubr.msk.f32.gmra.mxu0 %vm862_vm1, %v10245_v20  ;;  %9324 = vmatprep.subr.mxu0 %v10036_v4  ;;  %v10346_v2 = vld [vmem:[%s823_s29] sm:$0xf]  ;;  %s11556_s0 = smov 120   ;;  %s11560_s29 = smov 88  }
  0x2f   : > { %9325 = vmatpush3.msra.mxu0 %v1202_v21  ;;  %9328 = vmatprep.mubr.msk.f32.mxu0 %vm10037_vm0, %v10036_v4  ;;  %vm1617_vm7 = vcmp.gt.f32.partialorder %v10346_v2, 0.0  ;;  %s11563_s3 = sshll.u32 %s11644_s30, 3  ;;  %s11619_s23 = sld [smem:[#allocation10_spill]] }
  0x30   : > { %9326 = vmatprep.subr.mxu0 %v10036_v4  ;;  %9317 = vmatprep.mubr.msk.f32.mxu1 %vm10037_vm0, %v10036_v4  ;;  %s11635_s30 = smov 40  }
  0x31   : > { %9327 = vmatpush3.msra.mxu0 %v1201_v22  ;;  %9316 = vmatpush3.msra.mxu1 %v10233_v15 }
  0x32   : > { %9329 = vmatmul.mubr.msk.f32.vlgmr.msra.gmra.mxu0 %vm862_vm1, %v843_v24  ;;  %9351 = vmatprep.subr.mxu0 %v10036_v4 }
  0x33   : > { %9331 = vmatprep.subr.mxu1 %v10036_v4  ;;  %9352 = vmatpush3.msra.mxu0 %v844_v11 }
  0x34   : > { %9318 = vmatmul.mubr.msk.f32.vlgmr.msra.gmra.mxu1 %vm984_vm2, %v983_v25  ;;  %9353 = vmatprep.mubr.msk.f32.mxu0 %vm10037_vm0, %v10036_v4 }
  0x35   : > { %9333 = vmatprep.mubr.msk.f32.mxu1 %vm10037_vm0, %v10036_v4  ;;  %9361 = vmatprep.subr.mxu0 %v10036_v4 }
  0xe7   : > { %v1053_v29 = vpop.f32.mrf.mxu1 }
  0xe8   : > { %v2050_v35 = vrot.slane %v1053_v29, 7  ;;  %v2046_v29 = vld [vmem:[%s11614_s4] sm:$0x1]  ;;  %s11574_s4 = smov 64  }
  0xe9   : > { %v9309_v32 = vpop.f32.mrf.mxu1 }
  0xea   : > { %v9301_v26 = vpop.f32.mrf.mxu0 }
  0xeb   : > { %v10304_v49 = vadd.f32 %v9301_v26, %v8728_v27 }
  0xec   : > { %v941_v28 = vpop.f32.mrf.mxu0  ;;  %v1125_v37 = vpop.f32.mrf.mxu1 }
  0xed   : > { %v10290_v30 = vadd.f32 %v8728_v27, %v941_v28  ;;  %v2051_v39 = vrot.slane %v1125_v37, 6  ;;  %v8739_v37 = vld [vmem:[%s11609_s28 + $0x30] sm:$0xff] }
  0xee   : > { %v9304_v31 = vpop.f32.mrf.mxu0  ;;  %v9314_v41 = vpop.f32.mrf.mxu1 }
  0xef   : > { %9332 = vmatpush3.xpose.msk.msra.mxu1 %vm862_vm1, %v10290_v30  ;;  %v2052_v43 = vsel %vm1626_vm3, %v2051_v39, %v2050_v35  ;;  %v10328_v56 = vadd.f32 %v9304_v31, %v8728_v27  ;;  %v2061_v31 = vld [vmem:[%s11536_s11 + $0x8] sm:$0xff]  ;;  %v8737_v39 = vld [vmem:[%s11609_s28 + $0x20] sm:$0xff] }
  0xf0   : > { %v951_v33 = vpop.f32.mrf.mxu0  ;;  %9336 = vmatprep.subr.mxu1 %v10036_v4 }
  0xf1   : > { %v10320_v54 = vadd.f32 %v8728_v27, %v951_v33  ;;  %v2058_v33 = vld [vmem:[%s11617_s10] sm:$0xf] }
  0xf2   : > { %v1288_v36 = vpop.f32.mrf.mxu0 }
  0xf3   : > { %v1289_v38 = vadd.f32 %v8742_v34, %v1288_v36  ;;  %v2060_v34 = vld [vmem:[%s11536_s11] sm:$0xff]  ;;  %v8740_v36 = vld [vmem:[%s11609_s28 + $0x38] sm:$0xff] }
  0xf4   : > { %v9330_v40 = vpop.f32.mrf.mxu0  ;;  %v1197_v44 = vpop.f32.mrf.mxu1 }
  0xf5   : > { %v1299_v42 = vrot.slane %v1289_v38, %v10226_v13  ;;  %v2053_v47 = vrot.slane %v1197_v44, 5  ;;  %v8738_v38 = vld [vmem:[%s11609_s28 + $0x28] sm:$0xff] }
  0xf6   : > { %v9319_v50 = vpop.f32.mrf.mxu1 }
  0xf7   : > { %v1300_v45 = vcombine.high %v1299_v42, %v1299_v42  ;;  %v1307_v46 = vrot.slane %v1299_v42, %v10226_v13  ;;  %v10308_v51 = vsel %vm1629_vm4, %v2053_v47, %v2052_v43 }
  0xf8   : > { %v10316_v52 = vsel %vm2056_vm5, %v8880_v48, %v10308_v51  ;;  %v2057_v32 = vsel %vm2056_vm5, %v2046_v29, %v10308_v51 }
  0xf9   : > { %9334 = vmatmul.mubr.msk.f32.vlgmr.msra.gmra.mxu1 %vm862_vm1, %v1307_v46  ;;  %v1314_v53 = vrot.slane %v1300_v45, %v10226_v13  ;;  %v1315_v55 = vcombine.high %v1307_v46, %v1307_v46  ;;  %v10410_v35 = vadd.f32 %v2058_v33, %v2057_v32 }
  0xfa   : > { %9337 = vmatpush3.xpose.msk.msra.mxu1 %vm862_vm1, %v10304_v49  ;;  %9338 = vmatprep.mubr.msk.f32.mxu1 %vm10037_vm0, %v10036_v4 }
  0xfb   : > { %9341 = vmatprep.subr.mxu1 %v10036_v4  ;;  %v1316_v57 = vcombine.high %v1314_v53, %v1314_v53 }
  0xfd   : > { %9339 = vmatmul.mubr.msk.f32.vlgmr.msra.gmra.mxu1 %vm862_vm1, %v1314_v53 }
  0xfe   : > { %9342 = vmatpush3.xpose.msk.msra.mxu1 %vm862_vm1, %v10320_v54  ;;  %9343 = vmatprep.mubr.msk.f32.mxu1 %vm10037_vm0, %v10036_v4 }
  0xff   : > { %9346 = vmatprep.subr.mxu1 %v10036_v4 }
 0x101   : > { %9344 = vmatmul.mubr.msk.f32.vlgmr.msra.gmra.mxu1 %vm862_vm1, %v1315_v55 }
 0x102   : > { %9347 = vmatpush3.xpose.msk.msra.mxu1 %vm862_vm1, %v10328_v56  ;;  %9348 = vmatprep.mubr.msk.f32.mxu1 %vm10037_vm0, %v10036_v4 }
 0x103   : > { %9356 = vmatprep.subr.mxu1 %v10036_v4 }
 0x105   : > { %9349 = vmatmul.mubr.msk.f32.vlgmr.msra.gmra.mxu1 %vm862_vm1, %v1316_v57 }
 0x106   : > { %9357 = vmatpush3.msra.mxu1 %v10220_v12  ;;  %9358 = vmatprep.mubr.msk.f32.mxu1 %vm10037_vm0, %v10036_v4 }
 0x107   : > { %9366 = vmatprep.subr.mxu1 %v10036_v4 }
 0x1b9   : > { %v1388_v58 = vpop.f32.mrf.mxu1 }
 0x1bb   : > { %v9335_v59 = vpop.f32.mrf.mxu1 }
 0x1bd   : > { %v1463_v60 = vpop.f32.mrf.mxu1 }
 0x1be   : > { %v1622_v63 = vrot.slane %v1463_v60, 7 }
 0x1bf   : > { %v9340_v61 = vpop.f32.mrf.mxu1 }
 0x1c0   : > { %v1624_v5 = vsel %vm1623_vm6, %v1622_v63, %v1388_v58  ;;  %v8758_v58 = vld [vmem:[%s11537_s12] ss:$0 sm:$0xff] }
 0x1c1   : > { %v1538_v62 = vpop.f32.mrf.mxu1 }
 0x1c2   : > { %v1625_v0 = vrot.slane %v1538_v62, 6 }
 0x1c3   : > { %v9345_v1 = vpop.f32.mrf.mxu1 }
 0x1c4   : > { %v1627_v7 = vsel %vm1626_vm3, %v1625_v0, %v1624_v5 }
 0x1c5   : > { %v1613_v3 = vpop.f32.mrf.mxu1 }
 0x1c6   : > { %v1628_v6 = vrot.slane %v1613_v3, 5  ;;  %v8756_v3 = vld [vmem:[%s11613_s22 + $0x1] ss:$0 sm:$0xff] }
 0x1c7   : > { %v9350_v8 = vpop.f32.mrf.mxu1 }
 0x1c8   : > { %v1630_v9 = vsel %vm1629_vm4, %v1628_v6, %v1627_v7  ;;  %v10484_v8 = vld [vmem:[%s11619_s23] sm:$0xf] }
 0x1c9   : > { %v1632_v10 = vsel %vm1617_vm7, %v1630_v9, -1e+20 }
 0x1ca   : > { %v1634_v11 = vsel %vm1633_vm8, %v1632_v10, -inf  ;;  %8540 = vst.msk [vmem:[%s10354_s7] sm:$0xf] %vm1633_vm8, %v1632_v10 }
 0x1cb   : > { %1635 = vmax.xlane.f32.xlu0 %v1634_v11 }
 0x254   : > { %v1636_v12 = vpop.xlane.xlu0 %1635 }
 0x255   : > { %v1637_v14 = vsub.f32 %v1632_v10, %v1636_v12 }
 0x257   : > { %v1638_v16 = vmul.f32 1.442695, %v1637_v14 }
 0x259   : > { %9918 = vpow2.f32 %v1638_v16 }
 0x266   : > { %v9919_v17 = vpop.eup %9918 }
 0x267   : > { %v1640_v18 = vsel %vm1633_vm8, %v9919_v17, 0.0 }
 0x268   : > { %1641 = vadd.xlane.f32.xlu0 %v1640_v18 }
 0x2f1   : > { %v1642_v19 = vpop.xlane.xlu0 %1641 }
 0x2f2   : > { %9920 = vrcp.f32 %v1642_v19 }
 0x2ff   : > { %v9921_v21 = vpop.eup %9920 }
 0x300   : > { %v10363_v22 = vmul.f32 %v9921_v21, %v9919_v17 }
 0x302   : > { %9023 = vst.msk [vmem:[%s10354_s7 + $0x8] sm:$0xf] %vm1633_vm8, %v10363_v22  ;;  %v1652_v23 = vrot.slane %v10363_v22, %v10226_v13 }
 0x304   : > { %v1660_v24 = vrot.slane %v1652_v23, %v10226_v13  ;;  %v1653_v25 = vcombine.high %v1652_v23, %v1652_v23 }
 0x306   : > { %9354 = vmatmul.mubr.msk.f32.vlgmr.msra.gmra.mxu0 %vm984_vm2, %v1660_v24  ;;  %v1667_v26 = vrot.slane %v1653_v25, %v10226_v13  ;;  %v1668_v27 = vcombine.high %v1660_v24, %v1660_v24 }
 0x307   : > { %9362 = vmatpush3.msra.mxu0 %v10233_v15  ;;  %9363 = vmatprep.mubr.msk.f32.mxu0 %vm10037_vm0, %v10036_v4  ;;  %v2063_v15 = vld [vmem:[%s11536_s11 + $0x18] sm:$0xff] }
 0x308   : > { %9359 = vmatmul.mubr.msk.f32.vlgmr.msra.gmra.mxu1 %vm984_vm2, %v1667_v26  ;;  %9371 = vmatprep.subr.mxu0 %v10036_v4  ;;  %v1669_v28 = vcombine.high %v1667_v26, %v1667_v26 }
 0x309   : > { %9367 = vmatpush3.msra.mxu1 %v10245_v20  ;;  %9368 = vmatprep.mubr.msk.f32.mxu1 %vm10037_vm0, %v10036_v4  ;;  %v2062_v20 = vld [vmem:[%s11536_s11 + $0x10] sm:$0xff] }
 0x30a   : > { %9364 = vmatmul.mubr.msk.f32.vlgmr.msra.gmra.mxu0 %vm984_vm2, %v1668_v27  ;;  %9382 = vmatprep.subr.mxu1 %v10036_v4 }
 0x30b   : > { %9379 = vmatprep.mubr.msk.f32.mxu0 %vm10037_vm0, %v10036_v4  ;;  %9372 = vmatpush3.msra.mxu0 %v8740_v36 }
 0x30c   : > { %9369 = vmatmul.mubr.msk.f32.vlgmr.msra.gmra.mxu1 %vm984_vm2, %v1669_v28  ;;  %9373 = vmatprep.subr.mxu0 %v10036_v4 }
 0x30d   : > { %9383 = vmatpush3.msra.mxu1 %v2063_v15  ;;  %9390 = vmatprep.mubr.msk.f32.mxu1 %vm10037_vm0, %v10036_v4 }
 0x30e   : > { %9384 = vmatprep.subr.mxu1 %v10036_v4  ;;  %9374 = vmatpush3.msra.mxu0 %v8739_v37 }
 0x30f   : > { %9385 = vmatpush3.msra.mxu1 %v2062_v20  ;;  %9375 = vmatprep.subr.mxu0 %v10036_v4 }
 0x310   : > { %9386 = vmatprep.subr.mxu1 %v10036_v4  ;;  %9376 = vmatpush3.msra.mxu0 %v8738_v38 }
 0x311   : > { %9387 = vmatpush3.msra.mxu1 %v2061_v31  ;;  %9377 = vmatprep.subr.mxu0 %v10036_v4 }
 0x312   : > { %9388 = vmatprep.subr.mxu1 %v10036_v4  ;;  %9378 = vmatpush3.msra.mxu0 %v8737_v39  ;;  %v2144_v39 = vld [vmem:[%s11538_s13] sm:$0xff] }
 0x313   : > { %9389 = vmatpush3.msra.mxu1 %v2060_v34  ;;  %9393 = vmatprep.subr.mxu0 %v10036_v4 }
 0x314   : > { %9391 = vmatmul.mubr.msk.f32.vlgmr.msra.gmra.mxu1 %vm862_vm1, %v10410_v35  ;;  %9398 = vmatprep.subr.mxu1 %v10036_v4 }
 0x315   : > { %9400 = vmatprep.mubr.msk.f32.mxu1 %vm10037_vm0, %v10036_v4 }
 0x3c6   : > { %v1738_v40 = vpop.f32.mrf.mxu0 }
 0x3c8   : > { %v9355_v41 = vpop.f32.mrf.mxu0  ;;  %v1810_v42 = vpop.f32.mrf.mxu1 }
 0x3c9   : > { %v1968_v43 = vrot.slane %v1810_v42, 7 }
 0x3ca   : > { %v9360_v44 = vpop.f32.mrf.mxu1  ;;  %v1882_v45 = vpop.f32.mrf.mxu0 }
 0x3cb   : > { %v1969_v46 = vsel %vm1623_vm6, %v1968_v43, %v1738_v40  ;;  %v1970_v47 = vrot.slane %v1882_v45, 6  ;;  %v2145_v40 = vld [vmem:[%s11538_s13 + $0x8] sm:$0xff] }
 0x3cc   : > { %v9365_v48 = vpop.f32.mrf.mxu0  ;;  %v1954_v50 = vpop.f32.mrf.mxu1 }
 0x3cd   : > { %v1971_v51 = vsel %vm1626_vm3, %v1970_v47, %v1969_v46  ;;  %v1972_v53 = vrot.slane %v1954_v50, 5 }
 0x3ce   : > { %v9370_v55 = vpop.f32.mrf.mxu1 }
 0x3cf   : > { %v1973_v57 = vsel %vm1629_vm4, %v1972_v53, %v1971_v51 }
 0x3d0   : > { %9380 = vmatmul.mubr.msk.f32.vlgmr.msra.gmra.mxu0 %vm862_vm1, %v1973_v57 }
 0x3d1   : > { %9395 = vmatprep.mubr.msk.f32.mxu0 %vm10037_vm0, %v10036_v4 }
 0x3d4   : > { %v2140_v59 = vpop.f32.mrf.mxu1 }
 0x3d5   : > { %v10443_v60 = vadd.f32 %v8758_v58, %v2140_v59 }
 0x3d6   : > { %v9392_v61 = vpop.f32.mrf.mxu1 }
 0x3d7   : > { %2150 = vrot.lane.b32.xlu1 %v10443_v60, %s11558_s5  ;;  %v10448_v62 = vmul.f32 0.35355338, %v10443_v60  ;;  %s10474_s5 = scalar_lea.vmem %s11618_s24, %s11563_s3  ;;  %s11566_s3 = smov 48  }
 0x3d8   : > { %s11627_s24 = smov 112  }
 0x3d9   : > { %2318 = vrot.lane.b32.xlu0 %v10448_v62, %s11556_s0  ;;  %s11578_s0 = smov 56  }
 0x3db   : > { %2320 = vrot.lane.b32.xlu1 %v10443_v60, %s11560_s29  ;;  %s11576_s29 = smov 80  }
 0x449   : > { %v2151_v63 = vpop.permute.xlu1 %2150 }
 0x44a   : > { %9394 = vmatpush3.xpose.msk.msra.mxu0 %vm984_vm2, %v2151_v63 }
 0x44b   : > { %9403 = vmatprep.subr.mxu0 %v10036_v4  ;;  %v2319_v1 = vpop.permute.xlu0 %2318 }
 0x44d   : > { %v2321_v0 = vpop.permute.xlu1 %2320  ;;  %9396 = vmatmul.mubr.msk.f32.vlgmr.msra.gmra.mxu0 %vm984_vm2, %v10448_v62 }
 0x44e   : > { %9404 = vmatpush3.xpose.msk.msra.mxu0 %vm984_vm2, %v2321_v0  ;;  %9405 = vmatprep.mubr.msk.f32.mxu0 %vm10037_vm0, %v10036_v4 }
 0x44f   : > { %9413 = vmatprep.subr.mxu0 %v10036_v4 }
 0x451   : > { %9406 = vmatmul.mubr.msk.f32.vlgmr.msra.gmra.mxu0 %vm984_vm2, %v2319_v1 }
 0x452   : > { %9415 = vmatprep.mubr.msk.f32.mxu0 %vm10037_vm0, %v10036_v4  ;;  %9414 = vmatpush3.msra.mxu0 %v2145_v40 }
 0x453   : > { %9423 = vmatprep.subr.mxu0 %v10036_v4 }
 0x490   : > { %v2042_v5 = vpop.f32.mrf.mxu0 }
 0x491   : > { %v10476_v6 = vadd.f32 %v8756_v3, %v2042_v5 }
 0x492   : > { %v9381_v7 = vpop.f32.mrf.mxu0 }
 0x493   : > { %8549 = vst.msk [vmem:[%s10474_s5] sm:$0xf] %vm3122_vm9, %v10476_v6 }
 0x50d   : > { %v2223_v9 = vpop.f32.mrf.mxu0 }
 0x50e   : > { %v2224_v10 = vadd.f32 %v2223_v9, %v10484_v8 }
 0x50f   : > { %v9397_v11 = vpop.f32.mrf.mxu0 }
 0x510   : > { %v2228_v12 = vsel %vm2227_vm10, %v2224_v10, -inf }
 0x511   : > { %2229 = vmax.xlane.f32.xlu1 %v2228_v12  ;;  %v2392_v14 = vpop.f32.mrf.mxu0  ;;  %v2146_v12 = vld [vmem:[%s11538_s13 + $0x10] sm:$0xff] }
 0x512   : > { %v2393_v16 = vadd.f32 %v2392_v14, %v10484_v8 }
 0x513   : > { %v9407_v17 = vpop.f32.mrf.mxu0 }
 0x514   : > { %v2396_v18 = vsel %vm2227_vm10, %v2393_v16, -inf }
 0x515   : > { %2397 = vmax.xlane.f32.xlu0 %v2396_v18 }
 0x52b   : > { %2407 = vrot.lane.b32.xlu0 %v10443_v60, %s11578_s0 }
 0x59a   : > { %v2230_v19 = vpop.xlane.xlu1 %2229 }
 0x59b   : > { %v2231_v21 = vsub.f32 %v2224_v10, %v2230_v19 }
 0x59d   : > { %v2232_v23 = vmul.f32 1.442695, %v2231_v21 }
 0x59e   : > { %v2398_v24 = vpop.xlane.xlu0 %2397 }
 0x59f   : > { %9922 = vpow2.f32 %v2232_v23  ;;  %v2399_v25 = vsub.f32 %v2393_v16, %v2398_v24 }
 0x5a1   : > { %v2400_v26 = vmul.f32 1.442695, %v2399_v25 }
 0x5a2   : > { %v2408_v36 = vpop.permute.xlu0 %2407 }
 0x5a3   : > { %9924 = vpow2.f32 %v2400_v26 }
 0x5ac   : > { %v9923_v27 = vpop.eup %9922 }
 0x5ad   : > { %v2234_v28 = vsel %vm2227_vm10, %v9923_v27, 0.0 }
 0x5ae   : > { %2235 = vadd.xlane.f32.xlu1 %v2234_v28  ;;  %v2147_v28 = vld [vmem:[%s11538_s13 + $0x18] sm:$0xff] }
 0x5b0   : > { %v9925_v15 = vpop.eup %9924 }
 0x5b1   : > { %v2402_v29 = vsel %vm2227_vm10, %v9925_v15, 0.0 }
 0x5b2   : > { %2403 = vadd.xlane.f32.xlu1 %v2402_v29 }
 0x5c3   : > { %2239 = vrot.lane.b32.xlu1 %v10443_v60, %s11574_s4  ;;  %s11623_s4 = smov 120  }
 0x5c7   : > { %2632 = vrot.lane.b32.xlu1 %v10443_v60, %s11576_s29  ;;  %s11624_s29 = smov 56  }
 0x5cb   : > { %2630 = vrot.lane.b32.xlu1 %v10448_v62, %s11564_s1  ;;  %s11568_s1 = smov 104  }
 0x637   : > { %v2236_v20 = vpop.xlane.xlu1 %2235 }
 0x638   : > { %9926 = vrcp.f32 %v2236_v20 }
 0x63b   : > { %v2404_v31 = vpop.xlane.xlu1 %2403 }
 0x63c   : > { %9928 = vrcp.f32 %v2404_v31 }
 0x63f   : > { %v2240_v32 = vpop.permute.xlu1 %2239 }
 0x640   : > { %9399 = vmatpush3.msk.msra.mxu1 %vm2245_vm11, %v2240_v32 }
 0x641   : > { %9408 = vmatprep.subr.mxu1 %v10036_v4 }
 0x643   : > { %v2633_v42 = vpop.permute.xlu1 %2632 }
 0x645   : > { %v9927_v33 = vpop.eup %9926 }
 0x646   : > { %v2238_v34 = vmul.f32 %v9927_v33, %v9923_v27 }
 0x647   : > { %v2631_v46 = vpop.permute.xlu1 %2630 }
 0x648   : > { %9401 = vmatmul.mubr.msk.f32.vlgmr.msra.gmra.mxu1 %vm2241_vm12, %v2238_v34 }
 0x649   : > { %v9929_v37 = vpop.eup %9928  ;;  %9409 = vmatpush3.msk.msra.mxu1 %vm2245_vm11, %v2408_v36  ;;  %9410 = vmatprep.mubr.msk.f32.mxu1 %vm10037_vm0, %v10036_v4 }
 0x64a   : > { %v2406_v38 = vmul.f32 %v9929_v37, %v9925_v15  ;;  %9418 = vmatprep.subr.mxu1 %v10036_v4 }
 0x64c   : > { %9411 = vmatmul.mubr.msk.f32.vlgmr.msra.gmra.mxu1 %vm2241_vm12, %v2406_v38  ;;  %v8780_v38 = vld [vmem:[%s11620_s14] ss:$0 sm:$0xff] }
 0x64d   : > { %9420 = vmatprep.mubr.msk.f32.mxu1 %vm10037_vm0, %v10036_v4  ;;  %9419 = vmatpush3.msra.mxu1 %v2144_v39 }
 0x64e   : > { %9428 = vmatprep.subr.mxu1 %v10036_v4 }
 0x708   : > { %v2314_v41 = vpop.f32.mrf.mxu1 }
 0x709   : > { %9421 = vmatmul.mubr.msk.f32.vlgmr.msra.gmra.mxu1 %vm984_vm2, %v2314_v41 }
 0x70a   : > { %v9402_v43 = vpop.f32.mrf.mxu1  ;;  %9430 = vmatprep.mubr.msk.f32.mxu1 %vm10037_vm0, %v10036_v4 }
 0x70c   : > { %v2480_v44 = vpop.f32.mrf.mxu1 }
 0x70d   : > { %9416 = vmatmul.mubr.msk.f32.vlgmr.msra.gmra.mxu0 %vm984_vm2, %v2480_v44 }
 0x70e   : > { %9424 = vmatpush3.xpose.msk.msra.mxu0 %vm984_vm2, %v2633_v42  ;;  %v9412_v45 = vpop.f32.mrf.mxu1  ;;  %9425 = vmatprep.mubr.msk.f32.mxu0 %vm10037_vm0, %v10036_v4 }
 0x70f   : > { %9433 = vmatprep.subr.mxu0 %v10036_v4 }
 0x711   : > { %9426 = vmatmul.mubr.msk.f32.vlgmr.msra.gmra.mxu0 %vm984_vm2, %v2631_v46 }
 0x712   : > { %9435 = vmatprep.mubr.msk.f32.mxu0 %vm10037_vm0, %v10036_v4  ;;  %9434 = vmatpush3.msra.mxu0 %v2146_v12  ;;  %v3245_v12 = vld [vmem:[%s11542_s17 + $0x8] sm:$0xff] }
 0x713   : > { %9443 = vmatprep.subr.mxu0 %v10036_v4 }
 0x7c9   : > { %v2626_v47 = vpop.f32.mrf.mxu1 }
 0x7cb   : > { %v9422_v48 = vpop.f32.mrf.mxu1 }
 0x7cd   : > { %v2553_v50 = vpop.f32.mrf.mxu0 }
 0x7ce   : > { %v2627_v51 = vadd.f32 %v2626_v47, %v2553_v50  ;;  %v3154_v50 = vld [vmem:[%s11540_s15 + $0x18] sm:$0xff] }
 0x7cf   : > { %v9417_v53 = vpop.f32.mrf.mxu0 }
 0x7d0   : > { %v3151_v53 = vld [vmem:[%s11540_s15] sm:$0xff] }
 0x7d1   : > { %v2704_v55 = vpop.f32.mrf.mxu0 }
 0x7d2   : > { %v2705_v57 = vadd.f32 %v2704_v55, %v10484_v8 }
 0x7d3   : > { %v9427_v58 = vpop.f32.mrf.mxu0 }
 0x7d4   : > { %v2708_v59 = vsel %vm2227_vm10, %v2705_v57, -inf }
 0x7d5   : > { %2709 = vmax.xlane.f32.xlu1 %v2708_v59 }
 0x7e6   : > { %2719 = vrot.lane.b32.xlu1 %v10443_v60, %s11566_s3  ;;  %s11570_s3 = smov 40  }
 0x7ea   : > { %2870 = vrot.lane.b32.xlu1 %v10448_v62, %s11568_s1  ;;  %s11621_s1 = smov 88  }
 0x85e   : > { %v2710_v61 = vpop.xlane.xlu1 %2709 }
 0x85f   : > { %v2711_v63 = vsub.f32 %v2705_v57, %v2710_v61  ;;  %v8782_v61 = vld [vmem:[%s11544_s19] ss:$0 sm:$0xff] }
 0x861   : > { %v2712_v0 = vmul.f32 1.442695, %v2711_v63 }
 0x862   : > { %v2720_v1 = vpop.permute.xlu1 %2719 }
 0x863   : > { %9930 = vpow2.f32 %v2712_v0  ;;  %9429 = vmatpush3.msk.msra.mxu1 %vm2245_vm11, %v2720_v1  ;;  %v8783_v0 = vld [vmem:[%s11544_s19 + $0x1] ss:$0 sm:$0xff] }
 0x864   : > { %9438 = vmatprep.subr.mxu1 %v10036_v4 }
 0x866   : > { %v2871_v11 = vpop.permute.xlu1 %2870 }
 0x870   : > { %v9931_v3 = vpop.eup %9930 }
 0x871   : > { %v2714_v5 = vsel %vm2227_vm10, %v9931_v3, 0.0 }
 0x872   : > { %2715 = vadd.xlane.f32.xlu0 %v2714_v5  ;;  %v3251_v5 = vld [vmem:[%s11542_s17 + $0x38] sm:$0xff] }
 0x888   : > { %2872 = vrot.lane.b32.xlu0 %v10443_v60, %s11572_s27  ;;  %s11625_s27 = smov 80  }
 0x8fb   : > { %v2716_v7 = vpop.xlane.xlu0 %2715 }
 0x8fc   : > { %9932 = vrcp.f32 %v2716_v7  ;;  %v3250_v7 = vld [vmem:[%s11542_s17 + $0x30] sm:$0xff] }
 0x8ff   : > { %v2873_v10 = vpop.permute.xlu0 %2872 }
 0x909   : > { %v9933_v62 = vpop.eup %9932 }
 0x90a   : > { %v2718_v9 = vmul.f32 %v9933_v62, %v9931_v3  ;;  %v3249_v62 = vld [vmem:[%s11542_s17 + $0x28] sm:$0xff] }
 0x90c   : > { %9431 = vmatmul.mubr.msk.f32.vlgmr.msra.gmra.mxu1 %vm2241_vm12, %v2718_v9  ;;  %v3248_v9 = vld [vmem:[%s11542_s17 + $0x20] sm:$0xff] }
 0x90d   : > { %9439 = vmatpush3.xpose.msk.msra.mxu1 %vm984_vm2, %v2873_v10  ;;  %9440 = vmatprep.mubr.msk.f32.mxu1 %vm10037_vm0, %v10036_v4  ;;  %v3247_v10 = vld [vmem:[%s11542_s17 + $0x18] sm:$0xff] }
 0x90e   : > { %9448 = vmatprep.subr.mxu1 %v10036_v4 }
 0x910   : > { %9441 = vmatmul.mubr.msk.f32.vlgmr.msra.gmra.mxu1 %vm984_vm2, %v2871_v11  ;;  %v3246_v11 = vld [vmem:[%s11542_s17 + $0x10] sm:$0xff] }
 0x911   : > { %9450 = vmatprep.mubr.msk.f32.mxu1 %vm10037_vm0, %v10036_v4  ;;  %9449 = vmatpush3.msra.mxu1 %v2147_v28 }
 0x912   : > { %9464 = vmatprep.subr.mxu1 %v10036_v4 }
 0x9cc   : > { %v2792_v14 = vpop.f32.mrf.mxu1 }
 0x9cd   : > { %9436 = vmatmul.mubr.msk.f32.vlgmr.msra.gmra.mxu0 %vm984_vm2, %v2792_v14  ;;  %v3244_v14 = vld [vmem:[%s11542_s17] sm:$0xff] }
 0x9ce   : > { %v9432_v16 = vpop.f32.mrf.mxu1  ;;  %9445 = vmatprep.mubr.msk.f32.mxu0 %vm10037_vm0, %v10036_v4 }
 0x9cf   : > { %v8784_v16 = vld [vmem:[%s11541_s16] ss:$0 sm:$0xff] }
 0x9d0   : > { %v2944_v17 = vpop.f32.mrf.mxu1 }
 0x9d1   : > { %v2945_v18 = vadd.f32 %v2944_v17, %v10484_v8 }
 0x9d2   : > { %v9442_v19 = vpop.f32.mrf.mxu1 }
 0x9d3   : > { %v2948_v21 = vsel %vm2227_vm10, %v2945_v18, -inf }
 0x9d4   : > { %2949 = vmax.xlane.f32.xlu1 %v2948_v21 }
 0xa5d   : > { %v2950_v23 = vpop.xlane.xlu1 %2949 }
 0xa5e   : > { %v2951_v24 = vsub.f32 %v2945_v18, %v2950_v23 }
 0xa60   : > { %v2952_v25 = vmul.f32 1.442695, %v2951_v24 }
 0xa62   : > { %9934 = vpow2.f32 %v2952_v25 }
 0xa6f   : > { %v9935_v26 = vpop.eup %9934 }
 0xa70   : > { %v2954_v27 = vsel %vm2227_vm10, %v9935_v26, 0.0 }
 0xa71   : > { %2955 = vadd.xlane.f32.xlu0 %v2954_v27 }
 0xa87   : > { %2959 = vrot.lane.b32.xlu0 %v10443_v60, %s11570_s3  ;;  %s11626_s3 = smov 64  }
 0xa8d   : > { %v2865_v15 = vpop.f32.mrf.mxu0 }
 0xa8e   : > { %v2869_v29 = vadd.f32 %v2865_v15, %v2627_v51  ;;  %v3153_v51 = vld [vmem:[%s11540_s15 + $0x10] sm:$0xff] }
 0xa8f   : > { %v9437_v20 = vpop.f32.mrf.mxu0 }
 0xa90   : > { %v8786_v20 = vld [vmem:[%s11543_s18] ss:$0 sm:$0xff] }
 0xafa   : > { %v2956_v31 = vpop.xlane.xlu0 %2955 }
 0xafb   : > { %9936 = vrcp.f32 %v2956_v31 }
 0xafe   : > { %v2960_v32 = vpop.permute.xlu0 %2959 }
 0xaff   : > { %9444 = vmatpush3.msk.msra.mxu0 %vm2245_vm11, %v2960_v32 }
 0xb00   : > { %9453 = vmatprep.subr.mxu0 %v10036_v4 }
 0xb08   : > { %v9937_v33 = vpop.eup %9936 }
 0xb09   : > { %v2958_v34 = vmul.f32 %v9937_v33, %v9935_v26 }
 0xb0b   : > { %9446 = vmatmul.mubr.msk.f32.vlgmr.msra.gmra.mxu0 %vm2241_vm12, %v2958_v34 }
 0xb0c   : > { %9461 = vmatprep.mubr.msk.f32.mxu0 %vm10037_vm0, %v10036_v4  ;;  %9454 = vmatpush3.msra.mxu0 %v3154_v50  ;;  %v8790_v50 = vld [vmem:[%s11544_s19 + $0x2] ss:$0 sm:$0xff] }
 0xb0d   : > { %9455 = vmatprep.subr.mxu0 %v10036_v4 }
 0xb0e   : > { %9456 = vmatpush3.msra.mxu0 %v3153_v51 }
 0xb0f   : > { %9457 = vmatprep.subr.mxu0 %v10036_v4 }
 0xbcb   : > { %v3032_v60 = vpop.f32.mrf.mxu0 }
 0xbcc   : > { %9451 = vmatmul.mubr.msk.f32.vlgmr.msra.gmra.mxu1 %vm984_vm2, %v3032_v60 }
 0xbcd   : > { %v9447_v36 = vpop.f32.mrf.mxu0  ;;  %9480 = vmatprep.mubr.msk.f32.mxu1 %vm10037_vm0, %v10036_v4  ;;  %9465 = vmatpush3.msra.mxu1 %v3251_v5 }
 0xbce   : > { %9466 = vmatprep.subr.mxu1 %v10036_v4 }
 0xbcf   : > { %9467 = vmatpush3.msra.mxu1 %v3250_v7 }
 0xbd0   : > { %9468 = vmatprep.subr.mxu1 %v10036_v4 }
 0xbd1   : > { %9469 = vmatpush3.msra.mxu1 %v3249_v62 }
 0xbd2   : > { %9470 = vmatprep.subr.mxu1 %v10036_v4 }
 0xbd3   : > { %9471 = vmatpush3.msra.mxu1 %v3248_v9 }
 0xbd4   : > { %9472 = vmatprep.subr.mxu1 %v10036_v4 }
 0xbd5   : > { %9473 = vmatpush3.msra.mxu1 %v3247_v10 }
 0xbd6   : > { %9474 = vmatprep.subr.mxu1 %v10036_v4 }
 0xbd7   : > { %9475 = vmatpush3.msra.mxu1 %v3246_v11 }
 0xbd8   : > { %9476 = vmatprep.subr.mxu1 %v10036_v4 }
 0xbd9   : > { %9477 = vmatpush3.msra.mxu1 %v3245_v12 }
 0xbda   : > { %9478 = vmatprep.subr.mxu1 %v10036_v4 }
 0xbdb   : > { %9479 = vmatpush3.msra.mxu1 %v3244_v14 }
 0xbdc   : > { %9499 = vmatprep.subr.mxu1 %v10036_v4 }
 0xc8c   : > { %v3105_v37 = vpop.f32.mrf.mxu1 }
 0xc8d   : > { %v3109_v39 = vadd.f32 %v3105_v37, %v2869_v29 }
 0xc8e   : > { %v9452_v40 = vpop.f32.mrf.mxu1 }
 0xc8f   : > { %v3117_v41 = vadd.f32 %v8780_v38, %v3109_v39 }
 0xc91   : > { %v3118_v42 = vadd.f32 %v3117_v41, %v10410_v35  ;;  %v3152_v35 = vld [vmem:[%s11540_s15 + $0x8] sm:$0xff]  ;;  %v8795_v41 = vld [vmem:[%s11536_s11 + $0x38] sm:$0xff] }
 0xc92   : > { %9458 = vmatpush3.msra.mxu0 %v3152_v35  ;;  %v8791_v35 = vld [vmem:[%s11544_s19 + $0x3] ss:$0 sm:$0xff] }
 0xc93   : > { %v3123_v43 = vsel %vm3122_vm9, %v3118_v42, 0.0  ;;  %9459 = vmatprep.subr.mxu0 %v10036_v4 }
 0xc94   : > { %3124 = vadd.xlane.f32.xlu1 %v3123_v43  ;;  %9460 = vmatpush3.msra.mxu0 %v3151_v53  ;;  %v8793_v43 = vld [vmem:[%s11536_s11 + $0x28] sm:$0xff] }
 0xc95   : > { %9483 = vmatprep.subr.mxu0 %v10036_v4 }
 0xd1d   : > { %v3125_v44 = vpop.xlane.xlu1 %3124 }
 0xd1e   : > { %v3127_v45 = vmul.f32 0.03125, %v3125_v44  ;;  %v8792_v44 = vld [vmem:[%s11536_s11 + $0x20] sm:$0xff] }
 0xd20   : > { %v3128_v46 = vsub.f32 %v3118_v42, %v3127_v45  ;;  %v8794_v42 = vld [vmem:[%s11536_s11 + $0x30] sm:$0xff] }
 0xd22   : > { %v3129_v47 = vmul.f32 %v3128_v46, %v3128_v46 }
 0xd24   : > { %v3130_v48 = vsel %vm3122_vm9, %v3129_v47, 0.0 }
 0xd25   : > { %3131 = vadd.xlane.f32.xlu1 %v3130_v48 }
 0xdae   : > { %v3132_v55 = vpop.xlane.xlu1 %3131 }
 0xdaf   : > { %v3133_v57 = vmul.f32 0.03125, %v3132_v55 }
 0xdb1   : > { %v3134_v58 = vadd.f32 1e-05, %v3133_v57  ;;  %v8797_v57 = vld [vmem:[%s11537_s12 + $0x1] ss:$0 sm:$0xff] }
 0xdb3   : > { %9938 = vrsqrt.f32 %v3134_v58 }
 0xdc0   : > { %v9939_v59 = vpop.eup %9938 }
 0xdc1   : > { %v3136_v63 = vmul.f32 %v9939_v59, %v3128_v46 }
 0xdc3   : > { %v3143_v1 = vmul.f32 %v8782_v61, %v3136_v63 }
 0xdc5   : > { %v3150_v3 = vadd.f32 %v8783_v0, %v3143_v1 }
 0xdc7   : > { %9462 = vmatmul.mubr.msk.f32.vlgmr.msra.gmra.mxu0 %vm862_vm1, %v3150_v3 }
 0xdc8   : > { %9491 = vmatprep.mubr.msk.f32.mxu0 %vm10037_vm0, %v10036_v4  ;;  %9484 = vmatpush3.msra.mxu0 %v8795_v41 }
 0xdc9   : > { %9485 = vmatprep.subr.mxu0 %v10036_v4 }
 0xdca   : > { %9486 = vmatpush3.msra.mxu0 %v8794_v42 }
 0xdcb   : > { %9487 = vmatprep.subr.mxu0 %v10036_v4 }
 0xdcc   : > { %9488 = vmatpush3.msra.mxu0 %v8793_v43 }
 0xdcd   : > { %9489 = vmatprep.subr.mxu0 %v10036_v4 }
 0xdce   : > { %9490 = vmatpush3.msra.mxu0 %v8792_v44 }
 0xdcf   : > { %9494 = vmatprep.subr.mxu0 %v10036_v4 }
 0xe87   : > { %v3231_v17 = vpop.f32.mrf.mxu0 }
 0xe88   : > { %v3232_v18 = vadd.f32 %v8784_v16, %v3231_v17 }
 0xe89   : > { %v9463_v19 = vpop.f32.mrf.mxu0 }
 0xe8a   : > { %v3235_v21 = vmul.f32 %v3232_v18, %v3232_v18 }
 0xe8c   : > { %v3236_v23 = vmul.f32 %v3235_v21, %v3232_v18 }
 0xe8e   : > { %v3237_v24 = vmul.f32 0.044715, %v3236_v23 }
 0xe90   : > { %v3238_v25 = vadd.f32 %v3237_v24, %v3232_v18 }
 0xe92   : > { %v3239_v26 = vmul.f32 0.7978846, %v3238_v25 }
 0xe94   : > { %9940 = vtanh.f32 %v3239_v26 }
 0xea1   : > { %v9941_v27 = vpop.eup %9940 }
 0xea2   : > { %v3241_v28 = vadd.f32 1.0, %v9941_v27 }
 0xea4   : > { %v3242_v15 = vmul.f32 0.5, %v3241_v28 }
 0xea6   : > { %v3243_v29 = vmul.f32 %v3242_v15, %v3232_v18 }
 0xea8   : > { %9481 = vmatmul.mubr.msk.f32.vlgmr.msra.gmra.mxu1 %vm3259_vm13, %v3243_v29 }
 0xea9   : > { %9501 = vmatprep.mubr.msk.f32.mxu1 %vm10037_vm0, %v10036_v4 }
 0xf68   : > { %v3329_v31 = vpop.f32.mrf.mxu1 }
 0xf69   : > { %v3330_v32 = vadd.f32 %v8786_v20, %v3329_v31 }
 0xf6a   : > { %v9482_v33 = vpop.f32.mrf.mxu1 }
 0xf6b   : > { %v3333_v34 = vadd.f32 %v3330_v32, %v3150_v3 }
 0xf6d   : > { %v3338_v60 = vsel %vm3122_vm9, %v3333_v34, 0.0 }
 0xf6e   : > { %3339 = vadd.xlane.f32.xlu1 %v3338_v60  ;;  %v8799_v60 = vld [vmem:[%s11538_s13 + $0x20] sm:$0xff] }
 0xff7   : > { %v3340_v36 = vpop.xlane.xlu1 %3339 }
 0xff8   : > { %v3341_v37 = vmul.f32 0.03125, %v3340_v36  ;;  %v8800_v36 = vld [vmem:[%s11538_s13 + $0x28] sm:$0xff] }
 0xffa   : > { %v3342_v38 = vsub.f32 %v3333_v34, %v3341_v37 }
 0xffc   : > { %v3343_v39 = vmul.f32 %v3342_v38, %v3342_v38 }
 0xffe   : > { %v3344_v40 = vsel %vm3122_vm9, %v3343_v39, 0.0 }
 0xfff   : > { %3345 = vadd.xlane.f32.xlu1 %v3344_v40 }
0x1088   : > { %v3346_v45 = vpop.xlane.xlu1 %3345 }
0x1089   : > { %v3347_v46 = vmul.f32 0.03125, %v3346_v45 }
0x108b   : > { %v3348_v47 = vadd.f32 1e-05, %v3347_v46 }
0x108d   : > { %9942 = vrsqrt.f32 %v3348_v47 }
0x109a   : > { %v9943_v48 = vpop.eup %9942 }
0x109b   : > { %v3350_v51 = vmul.f32 %v9943_v48, %v3342_v38 }
0x109d   : > { %v3357_v53 = vmul.f32 %v8790_v50, %v3350_v51 }
0x109f   : > { %v10668_v55 = vadd.f32 %v8791_v35, %v3357_v53 }
0x10a1   : > { %9492 = vmatmul.mubr.msk.f32.vlgmr.msra.gmra.mxu0 %vm862_vm1, %v10668_v55 }
0x10a2   : > { %9496 = vmatprep.mubr.msk.f32.mxu0 %vm10037_vm0, %v10036_v4 }
0x1161   : > { %v3447_v58 = vpop.f32.mrf.mxu0 }
0x1162   : > { %v10677_v59 = vadd.f32 %v8797_v57, %v3447_v58 }
0x1163   : > { %v9493_v61 = vpop.f32.mrf.mxu0 }
0x1164   : > { %3625 = vrot.lane.b32.xlu0 %v10677_v59, %s11621_s1  ;;  %3458 = vrot.lane.b32.xlu1 %v10677_v59, %s11622_s9  ;;  %v10684_v63 = vmul.f32 0.35355338, %v10677_v59 }
0x1168   : > { %3623 = vrot.lane.b32.xlu0 %v10684_v63, %s11623_s4 }
0x11d6   : > { %v3459_v0 = vpop.permute.xlu1 %3458  ;;  %v3626_v1 = vpop.permute.xlu0 %3625 }
0x11d7   : > { %9495 = vmatpush3.xpose.msk.msra.mxu0 %vm984_vm2, %v3459_v0 }
0x11d8   : > { %9504 = vmatprep.subr.mxu0 %v10036_v4 }
0x11da   : > { %9497 = vmatmul.mubr.msk.f32.vlgmr.msra.gmra.mxu0 %vm984_vm2, %v10684_v63  ;;  %v3624_v3 = vpop.permute.xlu0 %3623 }
0x11db   : > { %9505 = vmatpush3.xpose.msk.msra.mxu0 %vm984_vm2, %v3626_v1  ;;  %9506 = vmatprep.mubr.msk.f32.mxu0 %vm10037_vm0, %v10036_v4 }
0x11dc   : > { %9514 = vmatprep.subr.mxu0 %v10036_v4 }
0x11de   : > { %9507 = vmatmul.mubr.msk.f32.vlgmr.msra.gmra.mxu0 %vm984_vm2, %v3624_v3 }
0x11df   : > { %9516 = vmatprep.mubr.msk.f32.mxu0 %vm10037_vm0, %v10036_v4  ;;  %9515 = vmatpush3.msra.mxu0 %v8800_v36 }
0x11e0   : > { %9524 = vmatprep.subr.mxu0 %v10036_v4 }
0x129a   : > { %v3531_v5 = vpop.f32.mrf.mxu0 }
0x129b   : > { %v3532_v7 = vadd.f32 %v3531_v5, %v10484_v8 }
0x129c   : > { %v9498_v62 = vpop.f32.mrf.mxu0 }
0x129d   : > { %v3535_v9 = vsel %vm2227_vm10, %v3532_v7, -inf }
0x129e   : > { %3536 = vmax.xlane.f32.xlu0 %v3535_v9  ;;  %v3697_v10 = vpop.f32.mrf.mxu0  ;;  %v8801_v9 = vld [vmem:[%s11538_s13 + $0x30] sm:$0xff] }
0x129f   : > { %v3698_v11 = vadd.f32 %v3697_v10, %v10484_v8 }
0x12a0   : > { %v9508_v12 = vpop.f32.mrf.mxu0 }
0x12a1   : > { %v3701_v14 = vsel %vm2227_vm10, %v3698_v11, -inf }
0x12a2   : > { %3702 = vmax.xlane.f32.xlu1 %v3701_v14 }
0x12b3   : > { %3712 = vrot.lane.b32.xlu1 %v10677_v59, %s11624_s29 }
0x12b7   : > { %3937 = vrot.lane.b32.xlu1 %v10677_v59, %s11625_s27 }
0x1327   : > { %v3537_v16 = vpop.xlane.xlu0 %3536 }
0x1328   : > { %v3538_v17 = vsub.f32 %v3532_v7, %v3537_v16 }
0x132a   : > { %v3539_v18 = vmul.f32 1.442695, %v3538_v17 }
0x132b   : > { %v3703_v19 = vpop.xlane.xlu1 %3702 }
0x132c   : > { %9944 = vpow2.f32 %v3539_v18  ;;  %v3704_v21 = vsub.f32 %v3698_v11, %v3703_v19 }
0x132e   : > { %v3705_v23 = vmul.f32 1.442695, %v3704_v21 }
0x132f   : > { %v3713_v32 = vpop.permute.xlu1 %3712 }
0x1330   : > { %9946 = vpow2.f32 %v3705_v23 }
0x1333   : > { %v3938_v40 = vpop.permute.xlu1 %3937 }
0x1339   : > { %v9945_v24 = vpop.eup %9944 }
0x133a   : > { %v3541_v25 = vsel %vm2227_vm10, %v9945_v24, 0.0 }
0x133b   : > { %3542 = vadd.xlane.f32.xlu0 %v3541_v25 }
0x133d   : > { %v9947_v26 = vpop.eup %9946 }
0x133e   : > { %v3707_v27 = vsel %vm2227_vm10, %v9947_v26, 0.0 }
0x133f   : > { %3708 = vadd.xlane.f32.xlu0 %v3707_v27 }
0x1355   : > { %3546 = vrot.lane.b32.xlu0 %v10677_v59, %s11626_s3 }
0x1359   : > { %3935 = vrot.lane.b32.xlu0 %v10684_v63, %s11627_s24 }
0x13c4   : > { %v3543_v28 = vpop.xlane.xlu0 %3542 }
0x13c5   : > { %9948 = vrcp.f32 %v3543_v28 }
0x13c8   : > { %v3709_v15 = vpop.xlane.xlu0 %3708 }
0x13c9   : > { %9950 = vrcp.f32 %v3709_v15 }
0x13cc   : > { %v3547_v29 = vpop.permute.xlu0 %3546 }
0x13cd   : > { %9500 = vmatpush3.msk.msra.mxu1 %vm2245_vm11, %v3547_v29 }
0x13ce   : > { %9509 = vmatprep.subr.mxu1 %v10036_v4 }
0x13d0   : > { %v3936_v42 = vpop.permute.xlu0 %3935 }
0x13d2   : > { %v9949_v20 = vpop.eup %9948 }
0x13d3   : > { %v3545_v31 = vmul.f32 %v9949_v20, %v9945_v24 }
0x13d5   : > { %9502 = vmatmul.mubr.msk.f32.vlgmr.msra.gmra.mxu1 %vm2241_vm12, %v3545_v31 }
0x13d6   : > { %v9951_v33 = vpop.eup %9950  ;;  %9510 = vmatpush3.msk.msra.mxu1 %vm2245_vm11, %v3713_v32  ;;  %9511 = vmatprep.mubr.msk.f32.mxu1 %vm10037_vm0, %v10036_v4 }
0x13d7   : > { %v3711_v34 = vmul.f32 %v9951_v33, %v9947_v26  ;;  %9519 = vmatprep.subr.mxu1 %v10036_v4  ;;  %v8824_v33 = vld [vmem:[%s11620_s14 + $0x1] ss:$0 sm:$0xff] }
0x13d9   : > { %9512 = vmatmul.mubr.msk.f32.vlgmr.msra.gmra.mxu1 %vm2241_vm12, %v3711_v34 }
0x13da   : > { %9521 = vmatprep.mubr.msk.f32.mxu1 %vm10037_vm0, %v10036_v4  ;;  %9520 = vmatpush3.msra.mxu1 %v8799_v60 }
0x13db   : > { %9529 = vmatprep.subr.mxu1 %v10036_v4 }
0x1495   : > { %v3619_v37 = vpop.f32.mrf.mxu1 }
0x1496   : > { %9522 = vmatmul.mubr.msk.f32.vlgmr.msra.gmra.mxu1 %vm984_vm2, %v3619_v37 }
0x1497   : > { %v9503_v38 = vpop.f32.mrf.mxu1  ;;  %9531 = vmatprep.mubr.msk.f32.mxu1 %vm10037_vm0, %v10036_v4 }
0x1499   : > { %v3785_v39 = vpop.f32.mrf.mxu1 }
0x149a   : > { %9517 = vmatmul.mubr.msk.f32.vlgmr.msra.gmra.mxu0 %vm984_vm2, %v3785_v39 }
0x149b   : > { %9525 = vmatpush3.xpose.msk.msra.mxu0 %vm984_vm2, %v3938_v40  ;;  %v9513_v41 = vpop.f32.mrf.mxu1  ;;  %9526 = vmatprep.mubr.msk.f32.mxu0 %vm10037_vm0, %v10036_v4 }
0x149c   : > { %9534 = vmatprep.subr.mxu0 %v10036_v4 }
0x149e   : > { %9527 = vmatmul.mubr.msk.f32.vlgmr.msra.gmra.mxu0 %vm984_vm2, %v3936_v42 }
0x149f   : > { %9536 = vmatprep.mubr.msk.f32.mxu0 %vm10037_vm0, %v10036_v4  ;;  %9535 = vmatpush3.msra.mxu0 %v8801_v9  ;;  %v8836_v9 = vld [vmem:[%s11542_s17 + $0x40] sm:$0xff] }
0x14a0   : > { %9544 = vmatprep.subr.mxu0 %v10036_v4 }
0x1556   : > { %v3931_v43 = vpop.f32.mrf.mxu1 }
0x1558   : > { %v9523_v44 = vpop.f32.mrf.mxu1 }
0x1559   : > { %v8832_v44 = vld [vmem:[%s11540_s15 + $0x38] sm:$0xff] }
0x155a   : > { %v3858_v45 = vpop.f32.mrf.mxu0 }
0x155b   : > { %v3932_v46 = vadd.f32 %v3931_v43, %v3858_v45  ;;  %v8831_v45 = vld [vmem:[%s11540_s15 + $0x30] sm:$0xff] }
0x155c   : > { %v9518_v47 = vpop.f32.mrf.mxu0 }
0x155e   : > { %v4009_v48 = vpop.f32.mrf.mxu0 }
0x155f   : > { %v4010_v50 = vadd.f32 %v4009_v48, %v10484_v8 }
0x1560   : > { %v9528_v51 = vpop.f32.mrf.mxu0 }
0x1561   : > { %v4013_v35 = vsel %vm2227_vm10, %v4010_v50, -inf }
0x1562   : > { %4014 = vmax.xlane.f32.xlu1 %v4013_v35  ;;  %v8827_v35 = vld [vmem:[%s11544_s19 + $0x4] ss:$0 sm:$0xff] }
0x1573   : > { %4177 = vrot.lane.b32.xlu1 %v10677_v59, %s11628_s25  ;;  %s11633_s25 = smov 104  }
0x1577   : > { %4175 = vrot.lane.b32.xlu1 %v10684_v63, %s11629_s6  ;;  %s11634_s6 = smov 72  }
0x15eb   : > { %v4015_v53 = vpop.xlane.xlu1 %4014 }
0x15ec   : > { %v4016_v57 = vsub.f32 %v4010_v50, %v4015_v53 }
0x15ee   : > { %v4017_v58 = vmul.f32 1.442695, %v4016_v57  ;;  %v8828_v57 = vld [vmem:[%s11544_s19 + $0x5] ss:$0 sm:$0xff] }
0x15ef   : > { %v4178_v63 = vpop.permute.xlu1 %4177 }
0x15f0   : > { %9952 = vpow2.f32 %v4017_v58 }
0x15f3   : > { %v4176_v62 = vpop.permute.xlu1 %4175 }
0x15fd   : > { %v9953_v61 = vpop.eup %9952 }
0x15fe   : > { %v4019_v0 = vsel %vm2227_vm10, %v9953_v61, 0.0 }
0x15ff   : > { %4020 = vadd.xlane.f32.xlu0 %v4019_v0  ;;  %v8843_v0 = vld [vmem:[%s11542_s17 + $0x78] sm:$0xff] }
0x1615   : > { %4024 = vrot.lane.b32.xlu0 %v10677_v59, %s11630_s26  ;;  %s11638_s26 = sld [smem:[#allocation5_spill]] }
0x1688   : > { %v4021_v1 = vpop.xlane.xlu0 %4020 }
0x1689   : > { %9954 = vrcp.f32 %v4021_v1  ;;  %v8842_v1 = vld [vmem:[%s11542_s17 + $0x70] sm:$0xff] }
0x168c   : > { %v4025_v3 = vpop.permute.xlu0 %4024 }
0x168d   : > { %9530 = vmatpush3.msk.msra.mxu1 %vm2245_vm11, %v4025_v3  ;;  %v8841_v3 = vld [vmem:[%s11542_s17 + $0x68] sm:$0xff] }
0x168e   : > { %9539 = vmatprep.subr.mxu1 %v10036_v4 }
0x1696   : > { %v9955_v5 = vpop.eup %9954 }
0x1697   : > { %v4023_v7 = vmul.f32 %v9955_v5, %v9953_v61  ;;  %v8840_v5 = vld [vmem:[%s11542_s17 + $0x60] sm:$0xff] }
0x1699   : > { %9532 = vmatmul.mubr.msk.f32.vlgmr.msra.gmra.mxu1 %vm2241_vm12, %v4023_v7  ;;  %v8838_v7 = vld [vmem:[%s11542_s17 + $0x50] sm:$0xff] }
0x169a   : > { %9540 = vmatpush3.xpose.msk.msra.mxu1 %vm984_vm2, %v4178_v63  ;;  %9541 = vmatprep.mubr.msk.f32.mxu1 %vm10037_vm0, %v10036_v4  ;;  %v8839_v63 = vld [vmem:[%s11542_s17 + $0x58] sm:$0xff] }
0x169b   : > { %9549 = vmatprep.subr.mxu1 %v10036_v4 }
0x169d   : > { %9542 = vmatmul.mubr.msk.f32.vlgmr.msra.gmra.mxu1 %vm984_vm2, %v4176_v62  ;;  %v8837_v62 = vld [vmem:[%s11542_s17 + $0x48] sm:$0xff] }
0x169e   : > { %9551 = vmatprep.mubr.msk.f32.mxu1 %vm10037_vm0, %v10036_v4 }
0x1759   : > { %v4097_v10 = vpop.f32.mrf.mxu1 }
0x175a   : > { %9537 = vmatmul.mubr.msk.f32.vlgmr.msra.gmra.mxu0 %vm984_vm2, %v4097_v10  ;;  %v8834_v10 = vld [vmem:[%s11541_s16 + $0x1] ss:$0 sm:$0xff] }
0x175b   : > { %v9533_v11 = vpop.f32.mrf.mxu1  ;;  %9546 = vmatprep.mubr.msk.f32.mxu0 %vm10037_vm0, %v10036_v4 }
0x175d   : > { %v4249_v12 = vpop.f32.mrf.mxu1 }
0x175e   : > { %v4250_v14 = vadd.f32 %v4249_v12, %v10484_v8  ;;  %v8802_v8 = vld [vmem:[%s11538_s13 + $0x38] sm:$0xff] }
0x175f   : > { %v9543_v16 = vpop.f32.mrf.mxu1  ;;  %9550 = vmatpush3.msra.mxu1 %v8802_v8 }
0x1760   : > { %v4253_v17 = vsel %vm2227_vm10, %v4250_v14, -inf  ;;  %9565 = vmatprep.subr.mxu1 %v10036_v4 }
0x1761   : > { %4254 = vmax.xlane.f32.xlu0 %v4253_v17 }
0x1777   : > { %4264 = vrot.lane.b32.xlu0 %v10677_v59, %s11631_s8  ;;  %s11632_s8 = smov 48  }
0x17ea   : > { %v4255_v18 = vpop.xlane.xlu0 %4254 }
0x17eb   : > { %v4256_v19 = vsub.f32 %v4250_v14, %v4255_v18 }
0x17ed   : > { %v4257_v21 = vmul.f32 1.442695, %v4256_v19 }
0x17ee   : > { %v4265_v23 = vpop.permute.xlu0 %4264 }
0x17ef   : > { %9956 = vpow2.f32 %v4257_v21  ;;  %9545 = vmatpush3.msk.msra.mxu0 %vm2245_vm11, %v4265_v23 }
0x17f0   : > { %9554 = vmatprep.subr.mxu0 %v10036_v4 }
0x17fc   : > { %v9957_v24 = vpop.eup %9956 }
0x17fd   : > { %v4259_v25 = vsel %vm2227_vm10, %v9957_v24, 0.0 }
0x17fe   : > { %4260 = vadd.xlane.f32.xlu1 %v4259_v25 }
0x181a   : > { %v4170_v26 = vpop.f32.mrf.mxu0 }
0x181b   : > { %v4174_v59 = vadd.f32 %v4170_v26, %v3932_v46  ;;  %v8829_v46 = vld [vmem:[%s11540_s15 + $0x20] sm:$0xff] }
0x181c   : > { %v9538_v27 = vpop.f32.mrf.mxu0  ;;  %v8845_v26 = vld [vmem:[%s11543_s18 + $0x1] ss:$0 sm:$0xff] }
0x1887   : > { %v4261_v28 = vpop.xlane.xlu1 %4260 }
0x1888   : > { %9958 = vrcp.f32 %v4261_v28 }
0x1895   : > { %v9959_v15 = vpop.eup %9958 }
0x1896   : > { %v4263_v29 = vmul.f32 %v9959_v15, %v9957_v24 }
0x1898   : > { %9547 = vmatmul.mubr.msk.f32.vlgmr.msra.gmra.mxu0 %vm2241_vm12, %v4263_v29 }
0x1899   : > { %9562 = vmatprep.mubr.msk.f32.mxu0 %vm10037_vm0, %v10036_v4  ;;  %9555 = vmatpush3.msra.mxu0 %v8832_v44 }
0x189a   : > { %9556 = vmatprep.subr.mxu0 %v10036_v4 }
0x189b   : > { %9557 = vmatpush3.msra.mxu0 %v8831_v45 }
0x189c   : > { %9558 = vmatprep.subr.mxu0 %v10036_v4 }
0x1958   : > { %v4337_v20 = vpop.f32.mrf.mxu0 }
0x1959   : > { %9552 = vmatmul.mubr.msk.f32.vlgmr.msra.gmra.mxu1 %vm984_vm2, %v4337_v20 }
0x195a   : > { %v9548_v31 = vpop.f32.mrf.mxu0  ;;  %9581 = vmatprep.mubr.msk.f32.mxu1 %vm10037_vm0, %v10036_v4  ;;  %9566 = vmatpush3.msra.mxu1 %v8843_v0 }
0x195b   : > { %9567 = vmatprep.subr.mxu1 %v10036_v4 }
0x195c   : > { %9568 = vmatpush3.msra.mxu1 %v8842_v1  ;;  %v8853_v1 = vld [vmem:[%s11545_s20 + $0x1] ss:$0 sm:$0xff] }
0x195d   : > { %9569 = vmatprep.subr.mxu1 %v10036_v4 }
0x195e   : > { %9570 = vmatpush3.msra.mxu1 %v8841_v3 }
0x195f   : > { %9571 = vmatprep.subr.mxu1 %v10036_v4 }
0x1960   : > { %9572 = vmatpush3.msra.mxu1 %v8840_v5 }
0x1961   : > { %9573 = vmatprep.subr.mxu1 %v10036_v4 }
0x1962   : > { %9574 = vmatpush3.msra.mxu1 %v8839_v63  ;;  %v8864_v63 = vld [vmem:[%s11613_s22 + $0x2] ss:$0 sm:$0xff] }
0x1963   : > { %9575 = vmatprep.subr.mxu1 %v10036_v4 }
0x1964   : > { %9576 = vmatpush3.msra.mxu1 %v8838_v7 }
0x1965   : > { %9577 = vmatprep.subr.mxu1 %v10036_v4 }
0x1966   : > { %9578 = vmatpush3.msra.mxu1 %v8837_v62 }
0x1967   : > { %9579 = vmatprep.subr.mxu1 %v10036_v4 }
0x1968   : > { %9580 = vmatpush3.msra.mxu1 %v8836_v9 }
0x1969   : > { %9600 = vmatprep.subr.mxu1 %v10036_v4 }
0x1a19   : > { %v4410_v32 = vpop.f32.mrf.mxu1 }
0x1a1a   : > { %v4414_v34 = vadd.f32 %v4410_v32, %v4174_v59 }
0x1a1b   : > { %v9553_v60 = vpop.f32.mrf.mxu1 }
0x1a1c   : > { %v4423_v36 = vadd.f32 %v8824_v33, %v4414_v34 }
0x1a1e   : > { %v4424_v37 = vadd.f32 %v4423_v36, %v10668_v55  ;;  %v8830_v55 = vld [vmem:[%s11540_s15 + $0x28] sm:$0xff] }
0x1a1f   : > { %9559 = vmatpush3.msra.mxu0 %v8830_v55 }
0x1a20   : > { %v4429_v38 = vsel %vm3122_vm9, %v4424_v37, 0.0  ;;  %9560 = vmatprep.subr.mxu0 %v10036_v4 }
0x1a21   : > { %4430 = vadd.xlane.f32.xlu1 %v4429_v38  ;;  %9561 = vmatpush3.msra.mxu0 %v8829_v46 }
0x1a22   : > { %9584 = vmatprep.subr.mxu0 %v10036_v4 }
0x1aaa   : > { %v4431_v39 = vpop.xlane.xlu1 %4430 }
0x1aab   : > { %v4432_v40 = vmul.f32 0.03125, %v4431_v39  ;;  %v8849_v39 = vld [vmem:[%s11544_s19 + $0x6] ss:$0 sm:$0xff] }
0x1aad   : > { %v4433_v41 = vsub.f32 %v4424_v37, %v4432_v40 }
0x1aaf   : > { %v4434_v42 = vmul.f32 %v4433_v41, %v4433_v41 }
0x1ab1   : > { %v4435_v43 = vsel %vm3122_vm9, %v4434_v42, 0.0 }
0x1ab2   : > { %4436 = vadd.xlane.f32.xlu1 %v4435_v43 }
0x1b3b   : > { %v4437_v47 = vpop.xlane.xlu1 %4436 }
0x1b3c   : > { %v4438_v48 = vmul.f32 0.03125, %v4437_v47 }
0x1b3e   : > { %v4439_v50 = vadd.f32 1e-05, %v4438_v48 }
0x1b40   : > { %9960 = vrsqrt.f32 %v4439_v50  ;;  %v8857_v50 = vld [vmem:[%s11609_s28 + $0x58] sm:$0xff] }
0x1b4d   : > { %v9961_v51 = vpop.eup %9960 }
0x1b4e   : > { %v4441_v53 = vmul.f32 %v9961_v51, %v4433_v41  ;;  %v8850_v41 = vld [vmem:[%s11544_s19 + $0x7] ss:$0 sm:$0xff]  ;;  %v8856_v51 = vld [vmem:[%s11609_s28 + $0x50] sm:$0xff] }
0x1b50   : > { %v4448_v58 = vmul.f32 %v8827_v35, %v4441_v53 }
0x1b52   : > { %v4455_v61 = vadd.f32 %v8828_v57, %v4448_v58 }
0x1b54   : > { %9563 = vmatmul.mubr.msk.f32.vlgmr.msra.gmra.mxu0 %vm862_vm1, %v4455_v61 }
0x1b55   : > { %9592 = vmatprep.mubr.msk.f32.mxu0 %vm10037_vm0, %v10036_v4  ;;  %9585 = vmatpush3.msra.mxu0 %v8857_v50  ;;  %v10025_v50 = vld [vmem:[%s10213_s2 + $0x18] sm:$0xff] }
0x1b56   : > { %9586 = vmatprep.subr.mxu0 %v10036_v4 }
0x1b57   : > { %9587 = vmatpush3.msra.mxu0 %v8856_v51  ;;  %v8885_v51 = vld [vmem:[%s11536_s11 + $0x58] sm:$0xff] }
0x1b58   : > { %9588 = vmatprep.subr.mxu0 %v10036_v4 }
0x1c14   : > { %v4538_v11 = vpop.f32.mrf.mxu0 }
0x1c15   : > { %v4539_v12 = vadd.f32 %v8834_v10, %v4538_v11 }
0x1c16   : > { %v9564_v14 = vpop.f32.mrf.mxu0 }
0x1c17   : > { %v4542_v16 = vmul.f32 %v4539_v12, %v4539_v12 }
0x1c19   : > { %v4543_v17 = vmul.f32 %v4542_v16, %v4539_v12 }
0x1c1b   : > { %v4544_v18 = vmul.f32 0.044715, %v4543_v17 }
0x1c1d   : > { %v4545_v19 = vadd.f32 %v4544_v18, %v4539_v12 }
0x1c1f   : > { %v4546_v21 = vmul.f32 0.7978846, %v4545_v19 }
0x1c21   : > { %9962 = vtanh.f32 %v4546_v21  ;;  %v10022_v21 = vld [vmem:[%s10213_s2] sm:$0xff] }
0x1c2e   : > { %v9963_v23 = vpop.eup %9962 }
0x1c2f   : > { %v4548_v24 = vadd.f32 1.0, %v9963_v23  ;;  %v10023_v23 = vld [vmem:[%s10213_s2 + $0x8] sm:$0xff] }
0x1c31   : > { %v4549_v25 = vmul.f32 0.5, %v4548_v24 }
0x1c33   : > { %v4550_v8 = vmul.f32 %v4549_v25, %v4539_v12 }
0x1c35   : > { %9582 = vmatmul.mubr.msk.f32.vlgmr.msra.gmra.mxu1 %vm3259_vm13, %v4550_v8 }
0x1c36   : > { %9602 = vmatprep.mubr.msk.f32.mxu1 %vm10037_vm0, %v10036_v4 }
0x1cf5   : > { %v4637_v59 = vpop.f32.mrf.mxu1 }
0x1cf6   : > { %v4638_v27 = vadd.f32 %v8845_v26, %v4637_v59 }
0x1cf7   : > { %v9583_v28 = vpop.f32.mrf.mxu1 }
0x1cf8   : > { %v4641_v15 = vadd.f32 %v4638_v27, %v4455_v61  ;;  %v8852_v61 = vld [vmem:[%s11545_s20] ss:$0 sm:$0xff] }
0x1cfa   : > { %v4646_v29 = vsel %vm3122_vm9, %v4641_v15, 0.0 }
0x1cfb   : > { %4647 = vadd.xlane.f32.xlu1 %v4646_v29 }
0x1d84   : > { %v4648_v20 = vpop.xlane.xlu1 %4647 }
0x1d85   : > { %v4649_v31 = vmul.f32 0.03125, %v4648_v20 }
0x1d87   : > { %v4650_v32 = vsub.f32 %v4641_v15, %v4649_v31 }
0x1d89   : > { %v4651_v33 = vmul.f32 %v4650_v32, %v4650_v32 }
0x1d8b   : > { %v4652_v34 = vsel %vm3122_vm9, %v4651_v33, 0.0 }
0x1d8c   : > { %4653 = vadd.xlane.f32.xlu1 %v4652_v34 }
0x1e15   : > { %v4654_v60 = vpop.xlane.xlu1 %4653 }
0x1e16   : > { %v4655_v36 = vmul.f32 0.03125, %v4654_v60 }
0x1e18   : > { %v4656_v37 = vadd.f32 1e-05, %v4655_v36 }
0x1e1a   : > { %9964 = vrsqrt.f32 %v4656_v37 }
0x1e27   : > { %v9965_v38 = vpop.eup %9964 }
0x1e28   : > { %v4658_v40 = vmul.f32 %v9965_v38, %v4650_v32 }
0x1e2a   : > { %v4665_v42 = vmul.f32 %v8849_v39, %v4658_v40 }
0x1e2c   : > { %v4672_v43 = vadd.f32 %v8850_v41, %v4665_v42 }
0x1e2e   : > { %v4676_v44 = vsel %vm3122_vm9, %v4672_v43, 0.0 }
0x1e2f   : > { %4677 = vadd.xlane.f32.xlu0 %v4676_v44 }
0x1eb8   : > { %v4678_v45 = vpop.xlane.xlu0 %4677 }
0x1eb9   : > { %v4679_v55 = vmul.f32 0.03125, %v4678_v45 }
0x1ebb   : > { %v4680_v46 = vsub.f32 %v4672_v43, %v4679_v55 }
0x1ebd   : > { %v4681_v47 = vmul.f32 %v4680_v46, %v4680_v46 }
0x1ebf   : > { %v4682_v48 = vsel %vm3122_vm9, %v4681_v47, 0.0  ;;  %v10024_v47 = vld [vmem:[%s10213_s2 + $0x10] sm:$0xff]  ;;  %s11636_s2 = sld [smem:[#allocation17_spill]] }
0x1ec0   : > { %4683 = vadd.xlane.f32.xlu1 %v4682_v48 }
0x1ed1   : > { %4821 = vrot.lane.b32.xlu1 %v10290_v30, %s11622_s9  ;;  %v8855_v30 = vld [vmem:[%s11609_s28 + $0x48] sm:$0xff] }
0x1ed2   : > { %9589 = vmatpush3.msra.mxu0 %v8855_v30  ;;  %v8884_v30 = vld [vmem:[%s11536_s11 + $0x50] sm:$0xff] }
0x1ed3   : > { %9590 = vmatprep.subr.mxu0 %v10036_v4 }
0x1ed5   : > { %4897 = vrot.lane.b32.xlu1 %v10304_v49, %s11622_s9  ;;  %v8854_v49 = vld [vmem:[%s11609_s28 + $0x40] sm:$0xff] }
0x1ed6   : > { %9591 = vmatpush3.msra.mxu0 %v8854_v49  ;;  %v8883_v49 = vld [vmem:[%s11536_s11 + $0x48] sm:$0xff] }
0x1ed7   : > { %9595 = vmatprep.subr.mxu0 %v10036_v4 }
0x1ed9   : > { %4973 = vrot.lane.b32.xlu1 %v10320_v54, %s11622_s9 }
0x1edd   : > { %5049 = vrot.lane.b32.xlu1 %v10328_v56, %s11622_s9 }
0x1f49   : > { %v4684_v54 = vpop.xlane.xlu1 %4683 }
0x1f4a   : > { %v4685_v35 = vmul.f32 0.03125, %v4684_v54  ;;  %v8881_v54 = vld [vmem:[%s11617_s10 + $0x4] sm:$0xf] }
0x1f4c   : > { %v4686_v53 = vadd.f32 1e-05, %v4685_v35  ;;  %v8882_v35 = vld [vmem:[%s11536_s11 + $0x40] sm:$0xff] }
0x1f4d   : > { %v4822_v57 = vpop.permute.xlu1 %4821 }
0x1f4e   : > { %9966 = vrsqrt.f32 %v4686_v53  ;;  %v10982_v53 = vadd.f32 %v8881_v54, %v10316_v52  ;;  %v8860_v52 = vld [vmem:[%s11609_s28 + $0x70] sm:$0xff]  ;;  %v8889_v54 = vld [vmem:[%s11538_s13 + $0x40] sm:$0xff] }
0x1f51   : > { %v4898_v58 = vpop.permute.xlu1 %4897 }
0x1f52   : > { %9601 = vmatpush3.xpose.msk.msra.mxu1 %vm862_vm1, %v4898_v58  ;;  %v8859_v58 = vld [vmem:[%s11609_s28 + $0x68] sm:$0xff] }
0x1f53   : > { %9610 = vmatprep.subr.mxu1 %v10036_v4 }
0x1f55   : > { %v4974_v10 = vpop.permute.xlu1 %4973 }
0x1f59   : > { %v5050_v17 = vpop.permute.xlu1 %5049 }
0x1f5b   : > { %v9967_v56 = vpop.eup %9966 }
0x1f5c   : > { %v4688_v0 = vmul.f32 %v9967_v56, %v4680_v46  ;;  %v8858_v56 = vld [vmem:[%s11609_s28 + $0x60] sm:$0xff] }
0x1f5e   : > { %v4695_v3 = vmul.f32 %v8852_v61, %v4688_v0 }
0x1f60   : > { %v4702_v5 = vadd.f32 %v8853_v1, %v4695_v3 }
0x1f62   : > { %9593 = vmatmul.mubr.msk.f32.vlgmr.msra.gmra.mxu0 %vm862_vm1, %v4702_v5 }
0x1f63   : > { %9596 = vmatpush3.xpose.msk.msra.mxu0 %vm862_vm1, %v4822_v57  ;;  %9597 = vmatprep.mubr.msk.f32.mxu0 %vm10037_vm0, %v10036_v4  ;;  %v8861_v57 = vld [vmem:[%s11609_s28 + $0x78] sm:$0xff] }
0x1f64   : > { %9605 = vmatprep.subr.mxu0 %v10036_v4 }
0x2022   : > { %v4792_v7 = vpop.f32.mrf.mxu0 }
0x2023   : > { %v4793_v62 = vadd.f32 %v8864_v63, %v4792_v7 }
0x2024   : > { %v9594_v9 = vpop.f32.mrf.mxu0 }
0x2025   : > { %v4803_v11 = vrot.slane %v4793_v62, %v10226_v13 }
0x2027   : > { %v4804_v12 = vcombine.high %v4803_v11, %v4803_v11  ;;  %v4811_v14 = vrot.slane %v4803_v11, %v10226_v13 }
0x2029   : > { %v4818_v16 = vrot.slane %v4804_v12, %v10226_v13  ;;  %9598 = vmatmul.mubr.msk.f32.vlgmr.msra.gmra.mxu0 %vm862_vm1, %v4811_v14  ;;  %v4819_v18 = vcombine.high %v4811_v14, %v4811_v14 }
0x202a   : > { %9606 = vmatpush3.xpose.msk.msra.mxu0 %vm862_vm1, %v4974_v10  ;;  %9607 = vmatprep.mubr.msk.f32.mxu0 %vm10037_vm0, %v10036_v4 }
0x202b   : > { %9603 = vmatmul.mubr.msk.f32.vlgmr.msra.gmra.mxu1 %vm862_vm1, %v4818_v16  ;;  %9615 = vmatprep.subr.mxu0 %v10036_v4  ;;  %v4820_v19 = vcombine.high %v4818_v16, %v4818_v16 }
0x202c   : > { %9611 = vmatpush3.xpose.msk.msra.mxu1 %vm862_vm1, %v5050_v17  ;;  %9612 = vmatprep.mubr.msk.f32.mxu1 %vm10037_vm0, %v10036_v4  ;;  %v8887_v17 = vld [vmem:[%s11537_s12 + $0x2] ss:$0 sm:$0xff] }
0x202d   : > { %9608 = vmatmul.mubr.msk.f32.vlgmr.msra.gmra.mxu0 %vm862_vm1, %v4819_v18  ;;  %9620 = vmatprep.subr.mxu1 %v10036_v4 }
0x202e   : > { %9616 = vmatpush3.msra.mxu0 %v10022_v21  ;;  %9617 = vmatprep.mubr.msk.f32.mxu0 %vm10037_vm0, %v10036_v4 }
0x202f   : > { %9613 = vmatmul.mubr.msk.f32.vlgmr.msra.gmra.mxu1 %vm862_vm1, %v4820_v19  ;;  %9625 = vmatprep.subr.mxu0 %v10036_v4 }
0x2030   : > { %9621 = vmatpush3.msra.mxu1 %v10023_v23  ;;  %9622 = vmatprep.mubr.msk.f32.mxu1 %vm10037_vm0, %v10036_v4 }
0x2031   : > { %9630 = vmatprep.subr.mxu1 %v10036_v4 }
0x20e9   : > { %v4893_v24 = vpop.f32.mrf.mxu0 }
0x20eb   : > { %v9599_v25 = vpop.f32.mrf.mxu0  ;;  %v4969_v8 = vpop.f32.mrf.mxu1 }
0x20ec   : > { %v5129_v26 = vrot.slane %v4969_v8, 7 }
0x20ed   : > { %v9604_v59 = vpop.f32.mrf.mxu1  ;;  %v5045_v27 = vpop.f32.mrf.mxu0 }
0x20ee   : > { %v5130_v28 = vsel %vm1623_vm6, %v5129_v26, %v4893_v24  ;;  %v5131_v15 = vrot.slane %v5045_v27, 6  ;;  %v8878_v26 = vld [vmem:[%s11613_s22 + $0x3] ss:$0 sm:$0xff] }
0x20ef   : > { %v9609_v29 = vpop.f32.mrf.mxu0  ;;  %v5121_v20 = vpop.f32.mrf.mxu1 }
0x20f0   : > { %v5132_v31 = vsel %vm1626_vm3, %v5131_v15, %v5130_v28  ;;  %v5133_v32 = vrot.slane %v5121_v20, 5  ;;  %v11048_v29 = vld [vmem:[%s11619_s23] sm:$0xf] }
0x20f1   : > { %v9614_v33 = vpop.f32.mrf.mxu1 }
0x20f2   : > { %v5134_v34 = vsel %vm1629_vm4, %v5133_v32, %v5132_v31 }
0x20f3   : > { %v5136_v60 = vsel %vm1617_vm7, %v5134_v34, -1e+20 }
0x20f4   : > { %v5137_v36 = vsel %vm1633_vm8, %v5136_v60, -inf  ;;  %9022 = vst.msk [vmem:[%s10354_s7 + $0x4] sm:$0xf] %vm1633_vm8, %v5136_v60 }
0x20f5   : > { %5138 = vmax.xlane.f32.xlu0 %v5137_v36 }
0x217e   : > { %v5139_v37 = vpop.xlane.xlu0 %5138 }
0x217f   : > { %v5140_v38 = vsub.f32 %v5136_v60, %v5139_v37 }
0x2181   : > { %v5141_v39 = vmul.f32 1.442695, %v5140_v38 }
0x2183   : > { %9968 = vpow2.f32 %v5141_v39 }
0x2190   : > { %v9969_v40 = vpop.eup %9968 }
0x2191   : > { %v5143_v41 = vsel %vm1633_vm8, %v9969_v40, 0.0 }
0x2192   : > { %5144 = vadd.xlane.f32.xlu1 %v5143_v41 }
0x221b   : > { %v5145_v42 = vpop.xlane.xlu1 %5144 }
0x221c   : > { %9970 = vrcp.f32 %v5145_v42 }
0x2229   : > { %v9971_v2 = vpop.eup %9970 }
0x222a   : > { %v10939_v43 = vmul.f32 %v9971_v2, %v9969_v40 }
0x222c   : > { %9024 = vst.msk [vmem:[%s10354_s7 + $0xc] sm:$0xf] %vm1633_vm8, %v10939_v43  ;;  %v5155_v44 = vrot.slane %v10939_v43, %v10226_v13 }
0x222e   : > { %v5163_v45 = vrot.slane %v5155_v44, %v10226_v13  ;;  %v5156_v55 = vcombine.high %v5155_v44, %v5155_v44 }
0x2230   : > { %9618 = vmatmul.mubr.msk.f32.vlgmr.msra.gmra.mxu0 %vm984_vm2, %v5163_v45  ;;  %v5170_v46 = vrot.slane %v5156_v55, %v10226_v13  ;;  %v5171_v48 = vcombine.high %v5163_v45, %v5163_v45 }
0x2231   : > { %9626 = vmatpush3.msra.mxu0 %v10024_v47  ;;  %9627 = vmatprep.mubr.msk.f32.mxu0 %vm10037_vm0, %v10036_v4 }
0x2232   : > { %9623 = vmatmul.mubr.msk.f32.vlgmr.msra.gmra.mxu1 %vm984_vm2, %v5170_v46  ;;  %9635 = vmatprep.subr.mxu0 %v10036_v4  ;;  %v5172_v13 = vcombine.high %v5170_v46, %v5170_v46 }
0x2233   : > { %9631 = vmatpush3.msra.mxu1 %v10025_v50  ;;  %9632 = vmatprep.mubr.msk.f32.mxu1 %vm10037_vm0, %v10036_v4 }
0x2234   : > { %9628 = vmatmul.mubr.msk.f32.vlgmr.msra.gmra.mxu0 %vm984_vm2, %v5171_v48  ;;  %9646 = vmatprep.subr.mxu1 %v10036_v4 }
0x2235   : > { %9643 = vmatprep.mubr.msk.f32.mxu0 %vm10037_vm0, %v10036_v4  ;;  %9636 = vmatpush3.msra.mxu0 %v8861_v57 }
0x2236   : > { %9633 = vmatmul.mubr.msk.f32.vlgmr.msra.gmra.mxu1 %vm984_vm2, %v5172_v13  ;;  %9637 = vmatprep.subr.mxu0 %v10036_v4 }
0x2237   : > { %9647 = vmatpush3.msra.mxu1 %v8885_v51  ;;  %9654 = vmatprep.mubr.msk.f32.mxu1 %vm10037_vm0, %v10036_v4 }
0x2238   : > { %9648 = vmatprep.subr.mxu1 %v10036_v4  ;;  %9638 = vmatpush3.msra.mxu0 %v8860_v52 }
0x2239   : > { %9649 = vmatpush3.msra.mxu1 %v8884_v30  ;;  %9639 = vmatprep.subr.mxu0 %v10036_v4 }
0x223a   : > { %9650 = vmatprep.subr.mxu1 %v10036_v4  ;;  %9640 = vmatpush3.msra.mxu0 %v8859_v58 }
0x223b   : > { %9651 = vmatpush3.msra.mxu1 %v8883_v49  ;;  %9641 = vmatprep.subr.mxu0 %v10036_v4 }
0x223c   : > { %9652 = vmatprep.subr.mxu1 %v10036_v4  ;;  %9642 = vmatpush3.msra.mxu0 %v8858_v56 }
0x223d   : > { %9653 = vmatpush3.msra.mxu1 %v8882_v35  ;;  %9657 = vmatprep.subr.mxu0 %v10036_v4  ;;  %v8890_v35 = vld [vmem:[%s11538_s13 + $0x48] sm:$0xff] }
0x223e   : > { %9655 = vmatmul.mubr.msk.f32.vlgmr.msra.gmra.mxu1 %vm862_vm1, %v10982_v53  ;;  %9662 = vmatprep.subr.mxu1 %v10036_v4 }
0x223f   : > { %9664 = vmatprep.mubr.msk.f32.mxu1 %vm10037_vm0, %v10036_v4 }
0x22f0   : > { %v5241_v61 = vpop.f32.mrf.mxu0 }
0x22f2   : > { %v9619_v0 = vpop.f32.mrf.mxu0  ;;  %v5313_v1 = vpop.f32.mrf.mxu1 }
0x22f3   : > { %v5471_v3 = vrot.slane %v5313_v1, 7 }
0x22f4   : > { %v9624_v5 = vpop.f32.mrf.mxu1  ;;  %v5385_v63 = vpop.f32.mrf.mxu0 }
0x22f5   : > { %v5472_v7 = vsel %vm1623_vm6, %v5471_v3, %v5241_v61  ;;  %v5473_v62 = vrot.slane %v5385_v63, 6 }
0x22f6   : > { %v9629_v9 = vpop.f32.mrf.mxu0  ;;  %v5457_v10 = vpop.f32.mrf.mxu1 }
0x22f7   : > { %v5474_v11 = vsel %vm1626_vm3, %v5473_v62, %v5472_v7  ;;  %v5475_v12 = vrot.slane %v5457_v10, 5 }
0x22f8   : > { %v9634_v14 = vpop.f32.mrf.mxu1 }
0x22f9   : > { %v5476_v16 = vsel %vm1629_vm4, %v5475_v12, %v5474_v11 }
0x22fa   : > { %9644 = vmatmul.mubr.msk.f32.vlgmr.msra.gmra.mxu0 %vm862_vm1, %v5476_v16 }
0x22fb   : > { %9659 = vmatprep.mubr.msk.f32.mxu0 %vm10037_vm0, %v10036_v4 }
0x22fe   : > { %v5637_v18 = vpop.f32.mrf.mxu1 }
0x22ff   : > { %v11015_v19 = vadd.f32 %v8887_v17, %v5637_v18 }
0x2300   : > { %v9656_v21 = vpop.f32.mrf.mxu1 }
0x2301   : > { %5648 = vrot.lane.b32.xlu0 %v11015_v19, %s11622_s9  ;;  %v11022_v23 = vmul.f32 0.35355338, %v11015_v19 }
0x2305   : > { %5815 = vrot.lane.b32.xlu0 %v11015_v19, %s11621_s1 }
0x2309   : > { %5813 = vrot.lane.b32.xlu0 %v11022_v23, %s11623_s4 }
0x2373   : > { %v5649_v24 = vpop.permute.xlu0 %5648 }
0x2374   : > { %9658 = vmatpush3.xpose.msk.msra.mxu0 %vm984_vm2, %v5649_v24 }
0x2375   : > { %9667 = vmatprep.subr.mxu0 %v10036_v4 }
0x2377   : > { %v5816_v25 = vpop.permute.xlu0 %5815  ;;  %9660 = vmatmul.mubr.msk.f32.vlgmr.msra.gmra.mxu0 %vm984_vm2, %v11022_v23 }
0x2378   : > { %9668 = vmatpush3.xpose.msk.msra.mxu0 %vm984_vm2, %v5816_v25  ;;  %9669 = vmatprep.mubr.msk.f32.mxu0 %vm10037_vm0, %v10036_v4 }
0x2379   : > { %9677 = vmatprep.subr.mxu0 %v10036_v4 }
0x237b   : > { %v5814_v8 = vpop.permute.xlu0 %5813 }
0x237c   : > { %9670 = vmatmul.mubr.msk.f32.vlgmr.msra.gmra.mxu0 %vm984_vm2, %v5814_v8 }
0x237d   : > { %9679 = vmatprep.mubr.msk.f32.mxu0 %vm10037_vm0, %v10036_v4  ;;  %9678 = vmatpush3.msra.mxu0 %v8890_v35 }
0x237e   : > { %9687 = vmatprep.subr.mxu0 %v10036_v4 }
0x23ba   : > { %v5545_v59 = vpop.f32.mrf.mxu0 }
0x23bb   : > { %v11040_v27 = vadd.f32 %v8878_v26, %v5545_v59  ;;  %v8891_v59 = vld [vmem:[%s11538_s13 + $0x50] sm:$0xff] }
0x23bc   : > { %v9645_v28 = vpop.f32.mrf.mxu0 }
0x23bd   : > { %9026 = vst.msk [vmem:[%s10474_s5 + $0x4] sm:$0xf] %vm3122_vm9, %v11040_v27 }
0x2437   : > { %v5721_v15 = vpop.f32.mrf.mxu0 }
0x2438   : > { %v5722_v20 = vadd.f32 %v11048_v29, %v5721_v15 }
0x2439   : > { %v9661_v31 = vpop.f32.mrf.mxu0 }
0x243a   : > { %v5725_v32 = vsel %vm2227_vm10, %v5722_v20, -inf }
0x243b   : > { %5726 = vmax.xlane.f32.xlu0 %v5725_v32 }
0x243c   : > { %v5887_v33 = vpop.f32.mrf.mxu0 }
0x243d   : > { %v5888_v34 = vadd.f32 %v11048_v29, %v5887_v33 }
0x243e   : > { %v9671_v60 = vpop.f32.mrf.mxu0 }
0x243f   : > { %v5891_v36 = vsel %vm2227_vm10, %v5888_v34, -inf }
0x2440   : > { %5892 = vmax.xlane.f32.xlu1 %v5891_v36 }
0x2451   : > { %5902 = vrot.lane.b32.xlu0 %v11015_v19, %s11624_s29 }
0x24c4   : > { %v5727_v37 = vpop.xlane.xlu0 %5726 }
0x24c5   : > { %v5728_v38 = vsub.f32 %v5722_v20, %v5727_v37 }
0x24c7   : > { %v5729_v39 = vmul.f32 1.442695, %v5728_v38 }
0x24c8   : > { %v5903_v51 = vpop.permute.xlu0 %5902 }
0x24c9   : > { %9972 = vpow2.f32 %v5729_v39  ;;  %v5893_v40 = vpop.xlane.xlu1 %5892 }
0x24ca   : > { %v5894_v41 = vsub.f32 %v5888_v34, %v5893_v40  ;;  %v8892_v40 = vld [vmem:[%s11538_s13 + $0x58] sm:$0xff] }
0x24cc   : > { %v5895_v42 = vmul.f32 1.442695, %v5894_v41 }
0x24ce   : > { %9974 = vpow2.f32 %v5895_v42 }
0x24d6   : > { %v9973_v2 = vpop.eup %9972 }
0x24d7   : > { %v5731_v44 = vsel %vm2227_vm10, %v9973_v2, 0.0 }
0x24d8   : > { %5732 = vadd.xlane.f32.xlu1 %v5731_v44 }
0x24db   : > { %v9975_v45 = vpop.eup %9974 }
0x24dc   : > { %v5897_v55 = vsel %vm2227_vm10, %v9975_v45, 0.0 }
0x24dd   : > { %5898 = vadd.xlane.f32.xlu1 %v5897_v55 }
0x24ee   : > { %5736 = vrot.lane.b32.xlu1 %v11015_v19, %s11626_s3 }
0x24f2   : > { %6127 = vrot.lane.b32.xlu1 %v11015_v19, %s11625_s27 }
0x24f6   : > { %6125 = vrot.lane.b32.xlu1 %v11022_v23, %s11627_s24 }
0x2561   : > { %v5733_v46 = vpop.xlane.xlu1 %5732 }
0x2562   : > { %9976 = vrcp.f32 %v5733_v46 }
0x2566   : > { %v5899_v47 = vpop.xlane.xlu1 %5898 }
0x2567   : > { %9978 = vrcp.f32 %v5899_v47 }
0x256a   : > { %v5737_v48 = vpop.permute.xlu1 %5736 }
0x256b   : > { %9663 = vmatpush3.msk.msra.mxu1 %vm2245_vm11, %v5737_v48  ;;  %v8914_v48 = vld [vmem:[%s11636_s2 + $0x2] ss:$0 sm:$0xff] }
0x256c   : > { %9672 = vmatprep.subr.mxu1 %v10036_v4 }
0x256e   : > { %v6128_v58 = vpop.permute.xlu1 %6127 }
0x256f   : > { %v9977_v50 = vpop.eup %9976 }
0x2570   : > { %v5735_v13 = vmul.f32 %v9977_v50, %v9973_v2 }
0x2572   : > { %9665 = vmatmul.mubr.msk.f32.vlgmr.msra.gmra.mxu1 %vm2241_vm12, %v5735_v13  ;;  %v6126_v0 = vpop.permute.xlu1 %6125 }
0x2573   : > { %9673 = vmatpush3.msk.msra.mxu1 %vm2245_vm11, %v5903_v51  ;;  %9674 = vmatprep.mubr.msk.f32.mxu1 %vm10037_vm0, %v10036_v4 }
0x2574   : > { %v9979_v30 = vpop.eup %9978  ;;  %9682 = vmatprep.subr.mxu1 %v10036_v4 }
0x2575   : > { %v5901_v49 = vmul.f32 %v9979_v30, %v9975_v45 }
0x2577   : > { %9675 = vmatmul.mubr.msk.f32.vlgmr.msra.gmra.mxu1 %vm2241_vm12, %v5901_v49 }
0x2578   : > { %9684 = vmatprep.mubr.msk.f32.mxu1 %vm10037_vm0, %v10036_v4  ;;  %9683 = vmatpush3.msra.mxu1 %v8889_v54 }
0x2579   : > { %9692 = vmatprep.subr.mxu1 %v10036_v4 }
0x2632   : > { %v5809_v57 = vpop.f32.mrf.mxu1 }
0x2633   : > { %9685 = vmatmul.mubr.msk.f32.vlgmr.msra.gmra.mxu1 %vm984_vm2, %v5809_v57 }
0x2634   : > { %v9666_v52 = vpop.f32.mrf.mxu1  ;;  %9694 = vmatprep.mubr.msk.f32.mxu1 %vm10037_vm0, %v10036_v4 }
0x2637   : > { %v5975_v56 = vpop.f32.mrf.mxu1 }
0x2638   : > { %9680 = vmatmul.mubr.msk.f32.vlgmr.msra.gmra.mxu0 %vm984_vm2, %v5975_v56  ;;  %v8922_v56 = vld [vmem:[%s11540_s15 + $0x58] sm:$0xff] }
0x2639   : > { %9688 = vmatpush3.xpose.msk.msra.mxu0 %vm984_vm2, %v6128_v58  ;;  %v9676_v61 = vpop.f32.mrf.mxu1  ;;  %9689 = vmatprep.mubr.msk.f32.mxu0 %vm10037_vm0, %v10036_v4 }
0x263a   : > { %9697 = vmatprep.subr.mxu0 %v10036_v4  ;;  %v8921_v61 = vld [vmem:[%s11540_s15 + $0x50] sm:$0xff] }
0x263c   : > { %9690 = vmatmul.mubr.msk.f32.vlgmr.msra.gmra.mxu0 %vm984_vm2, %v6126_v0  ;;  %v8919_v0 = vld [vmem:[%s11540_s15 + $0x40] sm:$0xff] }
0x263d   : > { %9699 = vmatprep.mubr.msk.f32.mxu0 %vm10037_vm0, %v10036_v4  ;;  %9698 = vmatpush3.msra.mxu0 %v8891_v59 }
0x263e   : > { %9707 = vmatprep.subr.mxu0 %v10036_v4 }
0x26f3   : > { %v6121_v1 = vpop.f32.mrf.mxu1 }
0x26f5   : > { %v9686_v3 = vpop.f32.mrf.mxu1 }
0x26f8   : > { %v6048_v5 = vpop.f32.mrf.mxu0 }
0x26f9   : > { %v6122_v63 = vadd.f32 %v6121_v1, %v6048_v5 }
0x26fa   : > { %v9681_v7 = vpop.f32.mrf.mxu0 }
0x26fb   : > { %v8917_v7 = vld [vmem:[%s11544_s19 + $0x8] ss:$0 sm:$0xff] }
0x26fc   : > { %v6199_v62 = vpop.f32.mrf.mxu0 }
0x26fd   : > { %v6200_v9 = vadd.f32 %v11048_v29, %v6199_v62 }
0x26fe   : > { %v9691_v10 = vpop.f32.mrf.mxu0 }
0x26ff   : > { %v6203_v11 = vsel %vm2227_vm10, %v6200_v9, -inf }
0x2700   : > { %6204 = vmax.xlane.f32.xlu1 %v6203_v11 }
0x2711   : > { %6214 = vrot.lane.b32.xlu1 %v11015_v19, %s11632_s8 }
0x2715   : > { %6365 = vrot.lane.b32.xlu1 %v11022_v23, %s11633_s25 }
0x2789   : > { %v6205_v12 = vpop.xlane.xlu1 %6204 }
0x278a   : > { %v6206_v14 = vsub.f32 %v6200_v9, %v6205_v12  ;;  %v8918_v9 = vld [vmem:[%s11544_s19 + $0x9] ss:$0 sm:$0xff]  ;;  %v8933_v12 = vld [vmem:[%s11542_s17 + $0xb8] sm:$0xff] }
0x278c   : > { %v6207_v16 = vmul.f32 1.442695, %v6206_v14  ;;  %v8932_v14 = vld [vmem:[%s11542_s17 + $0xb0] sm:$0xff] }
0x278d   : > { %v6215_v17 = vpop.permute.xlu1 %6214 }
0x278e   : > { %9980 = vpow2.f32 %v6207_v16  ;;  %9693 = vmatpush3.msk.msra.mxu1 %vm2245_vm11, %v6215_v17  ;;  %v8931_v16 = vld [vmem:[%s11542_s17 + $0xa8] sm:$0xff]  ;;  %v8930_v17 = vld [vmem:[%s11542_s17 + $0xa0] sm:$0xff] }
0x278f   : > { %9702 = vmatprep.subr.mxu1 %v10036_v4 }
0x2791   : > { %v6366_v26 = vpop.permute.xlu1 %6365 }
0x279b   : > { %v9981_v18 = vpop.eup %9980 }
0x279c   : > { %v6209_v21 = vsel %vm2227_vm10, %v9981_v18, 0.0 }
0x279d   : > { %6210 = vadd.xlane.f32.xlu0 %v6209_v21  ;;  %v8928_v21 = vld [vmem:[%s11542_s17 + $0x90] sm:$0xff] }
0x27b3   : > { %6367 = vrot.lane.b32.xlu0 %v11015_v19, %s11634_s6 }
0x2826   : > { %v6211_v24 = vpop.xlane.xlu0 %6210 }
0x2827   : > { %9982 = vrcp.f32 %v6211_v24  ;;  %v8927_v24 = vld [vmem:[%s11542_s17 + $0x88] sm:$0xff] }
0x282a   : > { %v6368_v8 = vpop.permute.xlu0 %6367 }
0x2834   : > { %v9983_v25 = vpop.eup %9982 }
0x2835   : > { %v6213_v23 = vmul.f32 %v9983_v25, %v9981_v18  ;;  %v8929_v18 = vld [vmem:[%s11542_s17 + $0x98] sm:$0xff]  ;;  %v8926_v25 = vld [vmem:[%s11542_s17 + $0x80] sm:$0xff] }
0x2837   : > { %9695 = vmatmul.mubr.msk.f32.vlgmr.msra.gmra.mxu1 %vm2241_vm12, %v6213_v23  ;;  %v8924_v23 = vld [vmem:[%s11541_s16 + $0x2] ss:$0 sm:$0xff] }
0x2838   : > { %9703 = vmatpush3.xpose.msk.msra.mxu1 %vm984_vm2, %v6368_v8  ;;  %9704 = vmatprep.mubr.msk.f32.mxu1 %vm10037_vm0, %v10036_v4 }
0x2839   : > { %9712 = vmatprep.subr.mxu1 %v10036_v4 }
0x283b   : > { %9705 = vmatmul.mubr.msk.f32.vlgmr.msra.gmra.mxu1 %vm984_vm2, %v6366_v26 }
0x283c   : > { %9714 = vmatprep.mubr.msk.f32.mxu1 %vm10037_vm0, %v10036_v4  ;;  %9713 = vmatpush3.msra.mxu1 %v8892_v40 }
0x283d   : > { %9728 = vmatprep.subr.mxu1 %v10036_v4 }
0x28f7   : > { %v6287_v28 = vpop.f32.mrf.mxu1 }
0x28f8   : > { %9700 = vmatmul.mubr.msk.f32.vlgmr.msra.gmra.mxu0 %vm984_vm2, %v6287_v28 }
0x28f9   : > { %v9696_v15 = vpop.f32.mrf.mxu1  ;;  %9709 = vmatprep.mubr.msk.f32.mxu0 %vm10037_vm0, %v10036_v4 }
0x28fb   : > { %v6439_v20 = vpop.f32.mrf.mxu1 }
0x28fc   : > { %v6440_v31 = vadd.f32 %v11048_v29, %v6439_v20 }
0x28fd   : > { %v9706_v32 = vpop.f32.mrf.mxu1 }
0x28fe   : > { %v6443_v33 = vsel %vm2227_vm10, %v6440_v31, -inf }
0x28ff   : > { %6444 = vmax.xlane.f32.xlu1 %v6443_v33 }
0x2910   : > { %6454 = vrot.lane.b32.xlu1 %v11015_v19, %s11635_s30 }
0x2988   : > { %v6445_v34 = vpop.xlane.xlu1 %6444 }
0x2989   : > { %v6446_v60 = vsub.f32 %v6440_v31, %v6445_v34 }
0x298b   : > { %v6447_v36 = vmul.f32 1.442695, %v6446_v60 }
0x298c   : > { %v6455_v37 = vpop.permute.xlu1 %6454 }
0x298d   : > { %9984 = vpow2.f32 %v6447_v36  ;;  %9708 = vmatpush3.msk.msra.mxu0 %vm2245_vm11, %v6455_v37  ;;  %v8935_v37 = vld [vmem:[%s11543_s18 + $0x2] ss:$0 sm:$0xff] }
0x298e   : > { %9717 = vmatprep.subr.mxu0 %v10036_v4 }
0x299a   : > { %v9985_v38 = vpop.eup %9984 }
0x299b   : > { %v6449_v39 = vsel %vm2227_vm10, %v9985_v38, 0.0 }
0x299c   : > { %6450 = vadd.xlane.f32.xlu0 %v6449_v39 }
0x29b8   : > { %v6360_v41 = vpop.f32.mrf.mxu0 }
0x29b9   : > { %v6364_v19 = vadd.f32 %v6360_v41, %v6122_v63 }
0x29ba   : > { %v9701_v42 = vpop.f32.mrf.mxu0 }
0x2a25   : > { %v6451_v2 = vpop.xlane.xlu0 %6450 }
0x2a26   : > { %9986 = vrcp.f32 %v6451_v2 }
0x2a33   : > { %v9987_v44 = vpop.eup %9986 }
0x2a34   : > { %v6453_v45 = vmul.f32 %v9987_v44, %v9985_v38 }
0x2a36   : > { %9710 = vmatmul.mubr.msk.f32.vlgmr.msra.gmra.mxu0 %vm2241_vm12, %v6453_v45 }
0x2a37   : > { %9725 = vmatprep.mubr.msk.f32.mxu0 %vm10037_vm0, %v10036_v4  ;;  %9718 = vmatpush3.msra.mxu0 %v8922_v56  ;;  %v8946_v56 = vld [vmem:[%s11537_s12 + $0x3] ss:$0 sm:$0xff] }
0x2a38   : > { %9719 = vmatprep.subr.mxu0 %v10036_v4 }
0x2a39   : > { %9720 = vmatpush3.msra.mxu0 %v8921_v61 }
0x2a3a   : > { %9721 = vmatprep.subr.mxu0 %v10036_v4 }
0x2af6   : > { %v6527_v55 = vpop.f32.mrf.mxu0 }
0x2af7   : > { %9715 = vmatmul.mubr.msk.f32.vlgmr.msra.gmra.mxu1 %vm984_vm2, %v6527_v55 }
0x2af8   : > { %v9711_v46 = vpop.f32.mrf.mxu0  ;;  %9744 = vmatprep.mubr.msk.f32.mxu1 %vm10037_vm0, %v10036_v4  ;;  %9729 = vmatpush3.msra.mxu1 %v8933_v12 }
0x2af9   : > { %9730 = vmatprep.subr.mxu1 %v10036_v4  ;;  %v8944_v46 = vld [vmem:[%s11536_s11 + $0x78] sm:$0xff] }
0x2afa   : > { %9731 = vmatpush3.msra.mxu1 %v8932_v14 }
0x2afb   : > { %9732 = vmatprep.subr.mxu1 %v10036_v4 }
0x2afc   : > { %9733 = vmatpush3.msra.mxu1 %v8931_v16 }
0x2afd   : > { %9734 = vmatprep.subr.mxu1 %v10036_v4 }
0x2afe   : > { %9735 = vmatpush3.msra.mxu1 %v8930_v17 }
0x2aff   : > { %9736 = vmatprep.subr.mxu1 %v10036_v4 }
0x2b00   : > { %9737 = vmatpush3.msra.mxu1 %v8929_v18 }
0x2b01   : > { %9738 = vmatprep.subr.mxu1 %v10036_v4 }
0x2b02   : > { %9739 = vmatpush3.msra.mxu1 %v8928_v21 }
0x2b03   : > { %9740 = vmatprep.subr.mxu1 %v10036_v4 }
0x2b04   : > { %9741 = vmatpush3.msra.mxu1 %v8927_v24 }
0x2b05   : > { %9742 = vmatprep.subr.mxu1 %v10036_v4 }
0x2b06   : > { %9743 = vmatpush3.msra.mxu1 %v8926_v25 }
0x2b07   : > { %9763 = vmatprep.subr.mxu1 %v10036_v4 }
0x2bb7   : > { %v6600_v47 = vpop.f32.mrf.mxu1 }
0x2bb8   : > { %v6604_v50 = vadd.f32 %v6600_v47, %v6364_v19  ;;  %v8943_v47 = vld [vmem:[%s11536_s11 + $0x70] sm:$0xff] }
0x2bb9   : > { %v9716_v13 = vpop.f32.mrf.mxu1 }
0x2bba   : > { %v6613_v51 = vadd.f32 %v8914_v48, %v6604_v50  ;;  %v8942_v48 = vld [vmem:[%s11536_s11 + $0x68] sm:$0xff]  ;;  %v8941_v50 = vld [vmem:[%s11536_s11 + $0x60] sm:$0xff] }
0x2bbc   : > { %v6614_v30 = vadd.f32 %v6613_v51, %v10982_v53  ;;  %v8920_v53 = vld [vmem:[%s11540_s15 + $0x48] sm:$0xff] }
0x2bbd   : > { %9722 = vmatpush3.msra.mxu0 %v8920_v53 }
0x2bbe   : > { %v6619_v49 = vsel %vm3122_vm9, %v6614_v30, 0.0  ;;  %9723 = vmatprep.subr.mxu0 %v10036_v4 }
0x2bbf   : > { %6620 = vadd.xlane.f32.xlu0 %v6619_v49  ;;  %9724 = vmatpush3.msra.mxu0 %v8919_v0 }
0x2bc0   : > { %9747 = vmatprep.subr.mxu0 %v10036_v4 }
0x2c48   : > { %v6621_v54 = vpop.xlane.xlu0 %6620 }
0x2c49   : > { %v6622_v35 = vmul.f32 0.03125, %v6621_v54  ;;  %v8939_v54 = vld [vmem:[%s11544_s19 + $0xa] ss:$0 sm:$0xff] }
0x2c4b   : > { %v6623_v57 = vsub.f32 %v6614_v30, %v6622_v35 }
0x2c4d   : > { %v6624_v52 = vmul.f32 %v6623_v57, %v6623_v57 }
0x2c4f   : > { %v6625_v58 = vsel %vm3122_vm9, %v6624_v52, 0.0 }
0x2c50   : > { %6626 = vadd.xlane.f32.xlu0 %v6625_v58 }
0x2cd9   : > { %v6627_v1 = vpop.xlane.xlu0 %6626 }
0x2cda   : > { %v6628_v3 = vmul.f32 0.03125, %v6627_v1 }
0x2cdc   : > { %v6629_v5 = vadd.f32 1e-05, %v6628_v3 }
0x2cde   : > { %9988 = vrsqrt.f32 %v6629_v5 }
0x2ceb   : > { %v9989_v63 = vpop.eup %9988 }
0x2cec   : > { %v6631_v62 = vmul.f32 %v9989_v63, %v6623_v57  ;;  %v8940_v57 = vld [vmem:[%s11544_s19 + $0xb] ss:$0 sm:$0xff] }
0x2cee   : > { %v6638_v10 = vmul.f32 %v8917_v7, %v6631_v62 }
0x2cf0   : > { %v6645_v11 = vadd.f32 %v8918_v9, %v6638_v10 }
0x2cf2   : > { %9726 = vmatmul.mubr.msk.f32.vlgmr.msra.gmra.mxu0 %vm862_vm1, %v6645_v11 }
0x2cf3   : > { %9755 = vmatprep.mubr.msk.f32.mxu0 %vm10037_vm0, %v10036_v4  ;;  %9748 = vmatpush3.msra.mxu0 %v8944_v46 }
0x2cf4   : > { %9749 = vmatprep.subr.mxu0 %v10036_v4 }
0x2cf5   : > { %9750 = vmatpush3.msra.mxu0 %v8943_v47 }
0x2cf6   : > { %9751 = vmatprep.subr.mxu0 %v10036_v4 }
0x2cf7   : > { %9752 = vmatpush3.msra.mxu0 %v8942_v48 }
0x2cf8   : > { %9753 = vmatprep.subr.mxu0 %v10036_v4 }
0x2cf9   : > { %9754 = vmatpush3.msra.mxu0 %v8941_v50 }
0x2cfa   : > { %9758 = vmatprep.subr.mxu0 %v10036_v4 }
0x2db2   : > { %v6728_v8 = vpop.f32.mrf.mxu0 }
0x2db3   : > { %v6729_v26 = vadd.f32 %v8924_v23, %v6728_v8 }
0x2db4   : > { %v9727_v59 = vpop.f32.mrf.mxu0 }
0x2db5   : > { %v6732_v28 = vmul.f32 %v6729_v26, %v6729_v26 }
0x2db7   : > { %v6733_v15 = vmul.f32 %v6732_v28, %v6729_v26 }
0x2db9   : > { %v6734_v20 = vmul.f32 0.044715, %v6733_v15 }
0x2dbb   : > { %v6735_v31 = vadd.f32 %v6734_v20, %v6729_v26 }
0x2dbd   : > { %v6736_v32 = vmul.f32 0.7978846, %v6735_v31 }
0x2dbf   : > { %9990 = vtanh.f32 %v6736_v32 }
0x2dcc   : > { %v9991_v33 = vpop.eup %9990 }
0x2dcd   : > { %v6738_v34 = vadd.f32 1.0, %v9991_v33 }
0x2dcf   : > { %v6739_v60 = vmul.f32 0.5, %v6738_v34 }
0x2dd1   : > { %v6740_v36 = vmul.f32 %v6739_v60, %v6729_v26 }
0x2dd3   : > { %9745 = vmatmul.mubr.msk.f32.vlgmr.msra.gmra.mxu1 %vm3259_vm13, %v6740_v36 }
0x2dd4   : > { %9765 = vmatprep.mubr.msk.f32.mxu1 %vm10037_vm0, %v10036_v4 }
0x2e93   : > { %v6827_v38 = vpop.f32.mrf.mxu1 }
0x2e94   : > { %v6828_v39 = vadd.f32 %v8935_v37, %v6827_v38  ;;  %v8948_v37 = vld [vmem:[%s11538_s13 + $0x60] sm:$0xff]  ;;  %v8949_v38 = vld [vmem:[%s11538_s13 + $0x68] sm:$0xff] }
0x2e95   : > { %v9746_v40 = vpop.f32.mrf.mxu1 }
0x2e96   : > { %v6831_v41 = vadd.f32 %v6828_v39, %v6645_v11 }
0x2e98   : > { %v6836_v19 = vsel %vm3122_vm9, %v6831_v41, 0.0 }
0x2e99   : > { %6837 = vadd.xlane.f32.xlu0 %v6836_v19 }
0x2f22   : > { %v6838_v42 = vpop.xlane.xlu0 %6837 }
0x2f23   : > { %v6839_v2 = vmul.f32 0.03125, %v6838_v42 }
0x2f25   : > { %v6840_v44 = vsub.f32 %v6831_v41, %v6839_v2 }
0x2f27   : > { %v6841_v45 = vmul.f32 %v6840_v44, %v6840_v44 }
0x2f29   : > { %v6842_v55 = vsel %vm3122_vm9, %v6841_v45, 0.0 }
0x2f2a   : > { %6843 = vadd.xlane.f32.xlu0 %v6842_v55 }
0x2fb3   : > { %v6844_v13 = vpop.xlane.xlu0 %6843 }
0x2fb4   : > { %v6845_v51 = vmul.f32 0.03125, %v6844_v13 }
0x2fb6   : > { %v6846_v30 = vadd.f32 1e-05, %v6845_v51 }
0x2fb8   : > { %9992 = vrsqrt.f32 %v6846_v30 }
0x2fc5   : > { %v9993_v49 = vpop.eup %9992 }
0x2fc6   : > { %v6848_v35 = vmul.f32 %v9993_v49, %v6840_v44 }
0x2fc8   : > { %v6855_v52 = vmul.f32 %v8939_v54, %v6848_v35 }
0x2fca   : > { %v11232_v58 = vadd.f32 %v8940_v57, %v6855_v52 }
0x2fcc   : > { %9756 = vmatmul.mubr.msk.f32.vlgmr.msra.gmra.mxu0 %vm862_vm1, %v11232_v58 }
0x2fcd   : > { %9760 = vmatprep.mubr.msk.f32.mxu0 %vm10037_vm0, %v10036_v4 }
0x308c   : > { %v6945_v61 = vpop.f32.mrf.mxu0 }
0x308d   : > { %v11241_v53 = vadd.f32 %v8946_v56, %v6945_v61 }
0x308e   : > { %v9757_v0 = vpop.f32.mrf.mxu0 }
0x308f   : > { %7123 = vrot.lane.b32.xlu0 %v11241_v53, %s11621_s1  ;;  %6956 = vrot.lane.b32.xlu1 %v11241_v53, %s11622_s9  ;;  %v11248_v1 = vmul.f32 0.35355338, %v11241_v53 }
0x3093   : > { %7121 = vrot.lane.b32.xlu1 %v11248_v1, %s11623_s4  ;;  %s11637_s4 = sld [smem:[#allocation18_spill]] }
0x3101   : > { %v6957_v3 = vpop.permute.xlu1 %6956  ;;  %v7124_v5 = vpop.permute.xlu0 %7123 }
0x3102   : > { %9759 = vmatpush3.xpose.msk.msra.mxu0 %vm984_vm2, %v6957_v3 }
0x3103   : > { %9768 = vmatprep.subr.mxu0 %v10036_v4 }
0x3105   : > { %9761 = vmatmul.mubr.msk.f32.vlgmr.msra.gmra.mxu0 %vm984_vm2, %v11248_v1  ;;  %v7122_v63 = vpop.permute.xlu1 %7121 }
0x3106   : > { %9769 = vmatpush3.xpose.msk.msra.mxu0 %vm984_vm2, %v7124_v5  ;;  %9770 = vmatprep.mubr.msk.f32.mxu0 %vm10037_vm0, %v10036_v4  ;;  %v8950_v5 = vld [vmem:[%s11538_s13 + $0x70] sm:$0xff] }
0x3107   : > { %9778 = vmatprep.subr.mxu0 %v10036_v4 }
0x3109   : > { %9771 = vmatmul.mubr.msk.f32.vlgmr.msra.gmra.mxu0 %vm984_vm2, %v7122_v63 }
0x310a   : > { %9780 = vmatprep.mubr.msk.f32.mxu0 %vm10037_vm0, %v10036_v4  ;;  %9779 = vmatpush3.msra.mxu0 %v8949_v38 }
0x310b   : > { %9788 = vmatprep.subr.mxu0 %v10036_v4 }
0x31c5   : > { %v7029_v7 = vpop.f32.mrf.mxu0 }
0x31c6   : > { %v7030_v62 = vadd.f32 %v11048_v29, %v7029_v7 }
0x31c7   : > { %v9762_v9 = vpop.f32.mrf.mxu0 }
0x31c8   : > { %v7033_v10 = vsel %vm2227_vm10, %v7030_v62, -inf }
0x31c9   : > { %7034 = vmax.xlane.f32.xlu1 %v7033_v10  ;;  %v7195_v11 = vpop.f32.mrf.mxu0 }
0x31ca   : > { %v7196_v12 = vadd.f32 %v11048_v29, %v7195_v11 }
0x31cb   : > { %v9772_v14 = vpop.f32.mrf.mxu0 }
0x31cc   : > { %v7199_v16 = vsel %vm2227_vm10, %v7196_v12, -inf }
0x31cd   : > { %7200 = vmax.xlane.f32.xlu0 %v7199_v16 }
0x31e3   : > { %7210 = vrot.lane.b32.xlu0 %v11241_v53, %s11624_s29 }
0x3252   : > { %v7035_v17 = vpop.xlane.xlu1 %7034 }
0x3253   : > { %v7036_v18 = vsub.f32 %v7030_v62, %v7035_v17 }
0x3255   : > { %v7037_v21 = vmul.f32 1.442695, %v7036_v18 }
0x3256   : > { %v7201_v24 = vpop.xlane.xlu0 %7200 }
0x3257   : > { %9994 = vpow2.f32 %v7037_v21  ;;  %v7202_v25 = vsub.f32 %v7196_v12, %v7201_v24  ;;  %v8951_v21 = vld [vmem:[%s11538_s13 + $0x78] sm:$0xff] }
0x3259   : > { %v7203_v23 = vmul.f32 1.442695, %v7202_v25 }
0x325a   : > { %v7211_v34 = vpop.permute.xlu0 %7210 }
0x325b   : > { %9996 = vpow2.f32 %v7203_v23 }
0x3264   : > { %v9995_v8 = vpop.eup %9994 }
0x3265   : > { %v7039_v26 = vsel %vm2227_vm10, %v9995_v8, 0.0 }
0x3266   : > { %7040 = vadd.xlane.f32.xlu1 %v7039_v26 }
0x3268   : > { %v9997_v59 = vpop.eup %9996 }
0x3269   : > { %v7205_v28 = vsel %vm2227_vm10, %v9997_v59, 0.0 }
0x326a   : > { %7206 = vadd.xlane.f32.xlu1 %v7205_v28 }
0x327b   : > { %7044 = vrot.lane.b32.xlu1 %v11241_v53, %s11626_s3 }
0x327f   : > { %7435 = vrot.lane.b32.xlu1 %v11241_v53, %s11625_s27 }
0x3283   : > { %7433 = vrot.lane.b32.xlu1 %v11248_v1, %s11627_s24  ;;  %s11639_s24 = sld [smem:[#allocation4_spill]] }
0x32ef   : > { %v7041_v15 = vpop.xlane.xlu1 %7040 }
0x32f0   : > { %9998 = vrcp.f32 %v7041_v15 }
0x32f3   : > { %v7207_v20 = vpop.xlane.xlu1 %7206 }
0x32f4   : > { %10000 = vrcp.f32 %v7207_v20  ;;  %v8973_v20 = vld [vmem:[%s11636_s2 + $0x3] ss:$0 sm:$0xff] }
0x32f7   : > { %v7045_v31 = vpop.permute.xlu1 %7044 }
0x32f8   : > { %9764 = vmatpush3.msk.msra.mxu1 %vm2245_vm11, %v7045_v31 }
0x32f9   : > { %9773 = vmatprep.subr.mxu1 %v10036_v4 }
0x32fb   : > { %v7436_v40 = vpop.permute.xlu1 %7435 }
0x32fd   : > { %v9999_v32 = vpop.eup %9998 }
0x32fe   : > { %v7043_v33 = vmul.f32 %v9999_v32, %v9995_v8 }
0x32ff   : > { %v7434_v2 = vpop.permute.xlu1 %7433 }
0x3300   : > { %9766 = vmatmul.mubr.msk.f32.vlgmr.msra.gmra.mxu1 %vm2241_vm12, %v7043_v33 }
0x3301   : > { %v10001_v60 = vpop.eup %10000  ;;  %9774 = vmatpush3.msk.msra.mxu1 %vm2245_vm11, %v7211_v34  ;;  %9775 = vmatprep.mubr.msk.f32.mxu1 %vm10037_vm0, %v10036_v4 }
0x3302   : > { %v7209_v36 = vmul.f32 %v10001_v60, %v9997_v59  ;;  %9783 = vmatprep.subr.mxu1 %v10036_v4 }
0x3304   : > { %9776 = vmatmul.mubr.msk.f32.vlgmr.msra.gmra.mxu1 %vm2241_vm12, %v7209_v36 }
0x3305   : > { %9785 = vmatprep.mubr.msk.f32.mxu1 %vm10037_vm0, %v10036_v4  ;;  %9784 = vmatpush3.msra.mxu1 %v8948_v37 }
0x3306   : > { %9793 = vmatprep.subr.mxu1 %v10036_v4 }
0x33c0   : > { %v7117_v39 = vpop.f32.mrf.mxu1 }
0x33c1   : > { %9786 = vmatmul.mubr.msk.f32.vlgmr.msra.gmra.mxu1 %vm984_vm2, %v7117_v39 }
0x33c2   : > { %v9767_v41 = vpop.f32.mrf.mxu1  ;;  %9795 = vmatprep.mubr.msk.f32.mxu1 %vm10037_vm0, %v10036_v4 }
0x33c3   : > { %v8981_v41 = vld [vmem:[%s11540_s15 + $0x78] sm:$0xff] }
0x33c4   : > { %v7283_v19 = vpop.f32.mrf.mxu1 }
0x33c5   : > { %9781 = vmatmul.mubr.msk.f32.vlgmr.msra.gmra.mxu0 %vm984_vm2, %v7283_v19  ;;  %v8980_v19 = vld [vmem:[%s11540_s15 + $0x70] sm:$0xff] }
0x33c6   : > { %9789 = vmatpush3.xpose.msk.msra.mxu0 %vm984_vm2, %v7436_v40  ;;  %v9777_v42 = vpop.f32.mrf.mxu1  ;;  %9790 = vmatprep.mubr.msk.f32.mxu0 %vm10037_vm0, %v10036_v4 }
0x33c7   : > { %9798 = vmatprep.subr.mxu0 %v10036_v4  ;;  %v8978_v42 = vld [vmem:[%s11540_s15 + $0x60] sm:$0xff] }
0x33c9   : > { %9791 = vmatmul.mubr.msk.f32.vlgmr.msra.gmra.mxu0 %vm984_vm2, %v7434_v2 }
0x33ca   : > { %9800 = vmatprep.mubr.msk.f32.mxu0 %vm10037_vm0, %v10036_v4  ;;  %9799 = vmatpush3.msra.mxu0 %v8950_v5 }
0x33cb   : > { %9808 = vmatprep.subr.mxu0 %v10036_v4 }
0x3481   : > { %v7429_v44 = vpop.f32.mrf.mxu1 }
0x3483   : > { %v9787_v45 = vpop.f32.mrf.mxu1 }
0x3485   : > { %v7356_v55 = vpop.f32.mrf.mxu0 }
0x3486   : > { %v7430_v46 = vadd.f32 %v7429_v44, %v7356_v55 }
0x3487   : > { %v9782_v47 = vpop.f32.mrf.mxu0 }
0x3489   : > { %v7507_v48 = vpop.f32.mrf.mxu0 }
0x348a   : > { %v7508_v50 = vadd.f32 %v11048_v29, %v7507_v48  ;;  %v8977_v48 = vld [vmem:[%s11544_s19 + $0xd] ss:$0 sm:$0xff] }
0x348b   : > { %v9792_v13 = vpop.f32.mrf.mxu0 }
0x348c   : > { %v7511_v51 = vsel %vm2227_vm10, %v7508_v50, -inf }
0x348d   : > { %7512 = vmax.xlane.f32.xlu0 %v7511_v51  ;;  %v8992_v51 = vld [vmem:[%s11542_s17 + $0xf8] sm:$0xff] }
0x34a3   : > { %7522 = vrot.lane.b32.xlu0 %v11241_v53, %s11632_s8  ;;  %s11640_s8 = sshll.u32 %s11639_s24, 3 }
0x34a7   : > { %7673 = vrot.lane.b32.xlu0 %v11248_v1, %s11633_s25 }
0x3516   : > { %v7513_v30 = vpop.xlane.xlu0 %7512 }
0x3517   : > { %v7514_v49 = vsub.f32 %v7508_v50, %v7513_v30  ;;  %v8991_v30 = vld [vmem:[%s11542_s17 + $0xf0] sm:$0xff] }
0x3519   : > { %v7515_v54 = vmul.f32 1.442695, %v7514_v49  ;;  %v8990_v49 = vld [vmem:[%s11542_s17 + $0xe8] sm:$0xff] }
0x351a   : > { %v7523_v35 = vpop.permute.xlu0 %7522 }
0x351b   : > { %10002 = vpow2.f32 %v7515_v54  ;;  %9794 = vmatpush3.msk.msra.mxu1 %vm2245_vm11, %v7523_v35  ;;  %v8989_v54 = vld [vmem:[%s11542_s17 + $0xe0] sm:$0xff]  ;;  %v8988_v35 = vld [vmem:[%s11542_s17 + $0xd8] sm:$0xff] }
0x351c   : > { %9803 = vmatprep.subr.mxu1 %v10036_v4 }
0x351e   : > { %v7674_v3 = vpop.permute.xlu0 %7673 }
0x3528   : > { %v10003_v57 = vpop.eup %10002 }
0x3529   : > { %v7517_v52 = vsel %vm2227_vm10, %v10003_v57, 0.0 }
0x352a   : > { %7518 = vadd.xlane.f32.xlu1 %v7517_v52  ;;  %v8986_v52 = vld [vmem:[%s11542_s17 + $0xc8] sm:$0xff] }
0x353b   : > { %7675 = vrot.lane.b32.xlu1 %v11241_v53, %s11634_s6 }
0x35b3   : > { %v7519_v56 = vpop.xlane.xlu1 %7518 }
0x35b4   : > { %10004 = vrcp.f32 %v7519_v56  ;;  %v8985_v56 = vld [vmem:[%s11542_s17 + $0xc0] sm:$0xff] }
0x35b7   : > { %v7676_v1 = vpop.permute.xlu1 %7675 }
0x35c1   : > { %v10005_v61 = vpop.eup %10004 }
0x35c2   : > { %v7521_v0 = vmul.f32 %v10005_v61, %v10003_v57  ;;  %v8987_v57 = vld [vmem:[%s11542_s17 + $0xd0] sm:$0xff]  ;;  %v8983_v61 = vld [vmem:[%s11541_s16 + $0x3] ss:$0 sm:$0xff] }
0x35c4   : > { %9796 = vmatmul.mubr.msk.f32.vlgmr.msra.gmra.mxu1 %vm2241_vm12, %v7521_v0 }
0x35c5   : > { %9804 = vmatpush3.xpose.msk.msra.mxu1 %vm984_vm2, %v7676_v1  ;;  %9805 = vmatprep.mubr.msk.f32.mxu1 %vm10037_vm0, %v10036_v4 }
0x35c6   : > { %9813 = vmatprep.subr.mxu1 %v10036_v4 }
0x35c8   : > { %9806 = vmatmul.mubr.msk.f32.vlgmr.msra.gmra.mxu1 %vm984_vm2, %v7674_v3 }
0x35c9   : > { %9815 = vmatprep.mubr.msk.f32.mxu1 %vm10037_vm0, %v10036_v4  ;;  %9814 = vmatpush3.msra.mxu1 %v8951_v21  ;;  %v9010_v21 = vld [vmem:[%s11637_s4 + $0x40] sm:$0xff] }
0x35ca   : > { %9829 = vmatprep.subr.mxu1 %v10036_v4 }
0x3684   : > { %v7595_v63 = vpop.f32.mrf.mxu1 }
0x3685   : > { %9801 = vmatmul.mubr.msk.f32.vlgmr.msra.gmra.mxu0 %vm984_vm2, %v7595_v63 }
0x3686   : > { %v9797_v7 = vpop.f32.mrf.mxu1  ;;  %9810 = vmatprep.mubr.msk.f32.mxu0 %vm10037_vm0, %v10036_v4 }
0x3688   : > { %v7747_v62 = vpop.f32.mrf.mxu1 }
0x3689   : > { %v7748_v9 = vadd.f32 %v11048_v29, %v7747_v62 }
0x368a   : > { %v9807_v10 = vpop.f32.mrf.mxu1 }
0x368b   : > { %v7751_v11 = vsel %vm2227_vm10, %v7748_v9, -inf }
0x368c   : > { %7752 = vmax.xlane.f32.xlu1 %v7751_v11 }
0x3715   : > { %v7753_v12 = vpop.xlane.xlu1 %7752 }
0x3716   : > { %v7754_v14 = vsub.f32 %v7748_v9, %v7753_v12 }
0x3718   : > { %v7755_v16 = vmul.f32 1.442695, %v7754_v14 }
0x371a   : > { %10006 = vpow2.f32 %v7755_v16  ;;  %v9013_v16 = vld [vmem:[%s11637_s4 + $0x58] sm:$0xff] }
0x3727   : > { %v10007_v17 = vpop.eup %10006 }
0x3728   : > { %v7757_v18 = vsel %vm2227_vm10, %v10007_v17, 0.0 }
0x3729   : > { %7758 = vadd.xlane.f32.xlu0 %v7757_v18  ;;  %v9011_v18 = vld [vmem:[%s11637_s4 + $0x48] sm:$0xff] }
0x373f   : > { %7762 = vrot.lane.b32.xlu0 %v11241_v53, %s11635_s30  ;;  %s11641_s30 = sld [smem:[#allocation21_spill]] }
0x3745   : > { %v7668_v29 = vpop.f32.mrf.mxu0  ;;  %s842_s14 = scalar_lea.vmem %s11641_s30, %s11640_s8 }
0x3746   : > { %v7672_v24 = vadd.f32 %v7668_v29, %v7430_v46  ;;  %v8976_v46 = vld [vmem:[%s11544_s19 + $0xc] ss:$0 sm:$0xff]  ;;  %v8994_v29 = vld [vmem:[%s11543_s18 + $0x3] ss:$0 sm:$0xff] }
0x3747   : > { %v9802_v25 = vpop.f32.mrf.mxu0 }
0x37b2   : > { %v7759_v23 = vpop.xlane.xlu0 %7758 }
0x37b3   : > { %10008 = vrcp.f32 %v7759_v23 }
0x37b6   : > { %v7763_v8 = vpop.permute.xlu0 %7762 }
0x37b7   : > { %9809 = vmatpush3.msk.msra.mxu0 %vm2245_vm11, %v7763_v8 }
0x37b8   : > { %9818 = vmatprep.subr.mxu0 %v10036_v4 }
0x37c0   : > { %v10009_v26 = vpop.eup %10008 }
0x37c1   : > { %v7761_v59 = vmul.f32 %v10009_v26, %v10007_v17  ;;  %v9012_v17 = vld [vmem:[%s11637_s4 + $0x50] sm:$0xff] }
0x37c3   : > { %9811 = vmatmul.mubr.msk.f32.vlgmr.msra.gmra.mxu0 %vm2241_vm12, %v7761_v59 }
0x37c4   : > { %9826 = vmatprep.mubr.msk.f32.mxu0 %vm10037_vm0, %v10036_v4  ;;  %9819 = vmatpush3.msra.mxu0 %v8981_v41 }
0x37c5   : > { %9820 = vmatprep.subr.mxu0 %v10036_v4 }
0x37c6   : > { %9821 = vmatpush3.msra.mxu0 %v8980_v19 }
0x37c7   : > { %9822 = vmatprep.subr.mxu0 %v10036_v4 }
0x3883   : > { %v7835_v53 = vpop.f32.mrf.mxu0 }
0x3884   : > { %9816 = vmatmul.mubr.msk.f32.vlgmr.msra.gmra.mxu1 %vm984_vm2, %v7835_v53 }
0x3885   : > { %v9812_v28 = vpop.f32.mrf.mxu0  ;;  %9845 = vmatprep.mubr.msk.f32.mxu1 %vm10037_vm0, %v10036_v4  ;;  %9830 = vmatpush3.msra.mxu1 %v8992_v51  ;;  %v8203_v51 = vld [vmem:[%s11637_s4 + $0x8] sm:$0xff] }
0x3886   : > { %9831 = vmatprep.subr.mxu1 %v10036_v4 }
0x3887   : > { %9832 = vmatpush3.msra.mxu1 %v8991_v30  ;;  %v8202_v30 = vld [vmem:[%s11637_s4] sm:$0xff] }
0x3888   : > { %9833 = vmatprep.subr.mxu1 %v10036_v4 }
0x3889   : > { %9834 = vmatpush3.msra.mxu1 %v8990_v49 }
0x388a   : > { %9835 = vmatprep.subr.mxu1 %v10036_v4 }
0x388b   : > { %9836 = vmatpush3.msra.mxu1 %v8989_v54 }
0x388c   : > { %9837 = vmatprep.subr.mxu1 %v10036_v4 }
0x388d   : > { %9838 = vmatpush3.msra.mxu1 %v8988_v35 }
0x388e   : > { %9839 = vmatprep.subr.mxu1 %v10036_v4 }
0x388f   : > { %9840 = vmatpush3.msra.mxu1 %v8987_v57 }
0x3890   : > { %9841 = vmatprep.subr.mxu1 %v10036_v4 }
0x3891   : > { %9842 = vmatpush3.msra.mxu1 %v8986_v52  ;;  %v9002_v52 = vld [vmem:[%s11545_s20 + $0x2] ss:$0 sm:$0xff] }
0x3892   : > { %9843 = vmatprep.subr.mxu1 %v10036_v4 }
0x3893   : > { %9844 = vmatpush3.msra.mxu1 %v8985_v56 }
0x3894   : > { %9870 = vmatprep.subr.mxu1 %v10036_v4 }
0x3944   : > { %v7908_v15 = vpop.f32.mrf.mxu1 }
0x3945   : > { %v7912_v31 = vadd.f32 %v7908_v15, %v7672_v24 }
0x3946   : > { %v9817_v32 = vpop.f32.mrf.mxu1 }
0x3947   : > { %v7921_v33 = vadd.f32 %v8973_v20, %v7912_v31 }
0x3949   : > { %v7922_v34 = vadd.f32 %v7921_v33, %v11232_v58  ;;  %v8979_v58 = vld [vmem:[%s11540_s15 + $0x68] sm:$0xff] }
0x394a   : > { %9823 = vmatpush3.msra.mxu0 %v8979_v58 }
0x394b   : > { %v7927_v60 = vsel %vm3122_vm9, %v7922_v34, 0.0  ;;  %9824 = vmatprep.subr.mxu0 %v10036_v4 }
0x394c   : > { %7928 = vadd.xlane.f32.xlu1 %v7927_v60  ;;  %9825 = vmatpush3.msra.mxu0 %v8978_v42 }
0x394d   : > { %9848 = vmatprep.subr.mxu0 %v10036_v4 }
0x39d5   : > { %v7929_v36 = vpop.xlane.xlu1 %7928 }
0x39d6   : > { %v7930_v37 = vmul.f32 0.03125, %v7929_v36  ;;  %v8998_v36 = vld [vmem:[%s11544_s19 + $0xe] ss:$0 sm:$0xff] }
0x39d8   : > { %v7931_v38 = vsub.f32 %v7922_v34, %v7930_v37 }
0x39da   : > { %v7932_v39 = vmul.f32 %v7931_v38, %v7931_v38 }
0x39dc   : > { %v7933_v40 = vsel %vm3122_vm9, %v7932_v39, 0.0 }
0x39dd   : > { %7934 = vadd.xlane.f32.xlu1 %v7933_v40 }
0x3a66   : > { %v7935_v2 = vpop.xlane.xlu1 %7934 }
0x3a67   : > { %v7936_v44 = vmul.f32 0.03125, %v7935_v2 }
0x3a69   : > { %v7937_v45 = vadd.f32 1e-05, %v7936_v44 }
0x3a6b   : > { %10010 = vrsqrt.f32 %v7937_v45  ;;  %v9007_v45 = vld [vmem:[%s11637_s4 + $0x38] sm:$0xff] }
0x3a78   : > { %v10011_v55 = vpop.eup %10010 }
0x3a79   : > { %v7939_v47 = vmul.f32 %v10011_v55, %v7931_v38  ;;  %v8999_v38 = vld [vmem:[%s11544_s19 + $0xf] ss:$0 sm:$0xff]  ;;  %v9006_v55 = vld [vmem:[%s11637_s4 + $0x30] sm:$0xff] }
0x3a7b   : > { %v7946_v50 = vmul.f32 %v8976_v46, %v7939_v47  ;;  %v9005_v46 = vld [vmem:[%s11637_s4 + $0x28] sm:$0xff]  ;;  %v9004_v47 = vld [vmem:[%s11637_s4 + $0x20] sm:$0xff] }
0x3a7d   : > { %v7953_v13 = vadd.f32 %v8977_v48, %v7946_v50  ;;  %v10027_v48 = vld [vmem:[%s11638_s26] sm:$0xf]  ;;  %v8205_v50 = vld [vmem:[%s11637_s4 + $0x18] sm:$0xff] }
0x3a7f   : > { %9827 = vmatmul.mubr.msk.f32.vlgmr.msra.gmra.mxu0 %vm862_vm1, %v7953_v13 }
0x3a80   : > { %9856 = vmatprep.mubr.msk.f32.mxu0 %vm10037_vm0, %v10036_v4  ;;  %9849 = vmatpush3.msra.mxu0 %v9007_v45 }
0x3a81   : > { %9850 = vmatprep.subr.mxu0 %v10036_v4 }
0x3a82   : > { %9851 = vmatpush3.msra.mxu0 %v9006_v55 }
0x3a83   : > { %9852 = vmatprep.subr.mxu0 %v10036_v4 }
0x3a84   : > { %9853 = vmatpush3.msra.mxu0 %v9005_v46 }
0x3a85   : > { %9854 = vmatprep.subr.mxu0 %v10036_v4 }
0x3a86   : > { %9855 = vmatpush3.msra.mxu0 %v9004_v47 }
0x3a87   : > { %9857 = vmatmul.mubr.msk.f32.vlgmr.msra.gmra.mxu0 %vm862_vm1, %v10027_v48  ;;  %9859 = vmatprep.subr.mxu0 %v10036_v4 }
0x3a88   : > { %9867 = vmatprep.mubr.msk.f32.mxu0 %vm10037_vm0, %v10036_v4  ;;  %9860 = vmatpush3.msra.mxu0 %v8205_v50 }
0x3a89   : > { %9861 = vmatprep.subr.mxu0 %v10036_v4 }
0x3b3f   : > { %v8036_v0 = vpop.f32.mrf.mxu0 }
0x3b40   : > { %v8037_v1 = vadd.f32 %v8983_v61, %v8036_v0  ;;  %v9003_v61 = vld [vmem:[%s11545_s20 + $0x3] ss:$0 sm:$0xff] }
0x3b41   : > { %v9828_v3 = vpop.f32.mrf.mxu0 }
0x3b42   : > { %v8040_v5 = vmul.f32 %v8037_v1, %v8037_v1  ;;  %v9018_v3 = vld [vmem:[%s11637_s4 + $0x78] sm:$0xff] }
0x3b44   : > { %v8041_v63 = vmul.f32 %v8040_v5, %v8037_v1  ;;  %v9017_v5 = vld [vmem:[%s11637_s4 + $0x70] sm:$0xff] }
0x3b46   : > { %v8042_v7 = vmul.f32 0.044715, %v8041_v63  ;;  %v9016_v63 = vld [vmem:[%s11637_s4 + $0x68] sm:$0xff] }
0x3b48   : > { %v8043_v62 = vadd.f32 %v8042_v7, %v8037_v1  ;;  %v9015_v7 = vld [vmem:[%s11637_s4 + $0x60] sm:$0xff] }
0x3b4a   : > { %v8044_v9 = vmul.f32 0.7978846, %v8043_v62  ;;  %v8277_v62 = vpop.f32.mrf.mxu0 }
0x3b4c   : > { %10012 = vtanh.f32 %v8044_v9  ;;  %v9858_v9 = vpop.f32.mrf.mxu0 }
0x3b59   : > { %v10013_v10 = vpop.eup %10012 }
0x3b5a   : > { %v8046_v11 = vadd.f32 1.0, %v10013_v10  ;;  %v10050_v10 = vmov 0  }
0x3b5b   : > { %9916 = vset.pattern.permute.xlu1 %v10050_v10  ;;  %9917 = vset.pattern.permute.xlu0 %v10050_v10 }
0x3b5c   : > { %v8047_v12 = vmul.f32 0.5, %v8046_v11 }
0x3b5e   : > { %v8048_v14 = vmul.f32 %v8047_v12, %v8037_v1 }
0x3b60   : > { %9846 = vmatmul.mubr.msk.f32.vlgmr.msra.gmra.mxu1 %vm3259_vm13, %v8048_v14 }
0x3b61   : > { %9871 = vmatpush3.msra.mxu1 %v9013_v16  ;;  %9878 = vmatprep.mubr.msk.f32.mxu1 %vm10037_vm0, %v10036_v4 }
0x3b62   : > { %9872 = vmatprep.subr.mxu1 %v10036_v4 }
0x3b63   : > { %9873 = vmatpush3.msra.mxu1 %v9012_v17 }
0x3b64   : > { %9874 = vmatprep.subr.mxu1 %v10036_v4 }
0x3b65   : > { %9875 = vmatpush3.msra.mxu1 %v9011_v18  ;;  %v9020_v18 = vld [vmem:[#allocation2] ss:$0 sm:$0xff] }
0x3b66   : > { %9876 = vmatprep.subr.mxu1 %v10036_v4 }
0x3b67   : > { %9877 = vmatpush3.msra.mxu1 %v9010_v21 }
0x3b68   : > { %9879 = vmatmul.mubr.msk.f32.vlgmr.msra.gmra.mxu1 %vm862_vm1, %v10476_v6 }
0x3c20   : > { %v8135_v24 = vpop.f32.mrf.mxu1 }
0x3c21   : > { %v8136_v25 = vadd.f32 %v8994_v29, %v8135_v24 }
0x3c22   : > { %v9847_v23 = vpop.f32.mrf.mxu1 }
0x3c23   : > { %v8139_v8 = vadd.f32 %v8136_v25, %v7953_v13  ;;  %v8204_v13 = vld [vmem:[%s11637_s4 + $0x10] sm:$0xff] }
0x3c24   : > { %9862 = vmatpush3.msra.mxu0 %v8204_v13 }
0x3c25   : > { %v8144_v26 = vsel %vm3122_vm9, %v8139_v8, 0.0  ;;  %9863 = vmatprep.subr.mxu0 %v10036_v4 }
0x3c26   : > { %8145 = vadd.xlane.f32.xlu1 %v8144_v26  ;;  %9864 = vmatpush3.msra.mxu0 %v8203_v51 }
0x3c27   : > { %9865 = vmatprep.subr.mxu0 %v10036_v4 }
0x3c28   : > { %v11439_v59 = vpop.f32.mrf.mxu1  ;;  %9866 = vmatpush3.msra.mxu0 %v8202_v30 }
0x3c29   : > { %9881 = vmatprep.subr.mxu0 %v10036_v4 }
0x3c2a   : > { %v9880_v53 = vpop.f32.mrf.mxu1 }
0x3caf   : > { %v8146_v28 = vpop.xlane.xlu1 %8145 }
0x3cb0   : > { %v8147_v15 = vmul.f32 0.03125, %v8146_v28 }
0x3cb2   : > { %v8148_v20 = vsub.f32 %v8139_v8, %v8147_v15 }
0x3cb4   : > { %v8149_v31 = vmul.f32 %v8148_v20, %v8148_v20 }
0x3cb6   : > { %v8150_v6 = vsel %vm3122_vm9, %v8149_v31, 0.0 }
0x3cb7   : > { %8151 = vadd.xlane.f32.xlu1 %v8150_v6 }
0x3d40   : > { %v8152_v32 = vpop.xlane.xlu1 %8151 }
0x3d41   : > { %v8153_v33 = vmul.f32 0.03125, %v8152_v32 }
0x3d43   : > { %v8154_v34 = vadd.f32 1e-05, %v8153_v33 }
0x3d45   : > { %10014 = vrsqrt.f32 %v8154_v34 }
0x3d52   : > { %v10015_v60 = vpop.eup %10014 }
0x3d53   : > { %v8156_v37 = vmul.f32 %v10015_v60, %v8148_v20 }
0x3d55   : > { %v8163_v39 = vmul.f32 %v8998_v36, %v8156_v37 }
0x3d57   : > { %v8170_v40 = vadd.f32 %v8999_v38, %v8163_v39 }
0x3d59   : > { %v8175_v41 = vsel %vm3122_vm9, %v8170_v40, 0.0 }
0x3d5a   : > { %8176 = vadd.xlane.f32.xlu1 %v8175_v41 }
0x3de3   : > { %v8177_v19 = vpop.xlane.xlu1 %8176 }
0x3de4   : > { %v8178_v58 = vmul.f32 0.03125, %v8177_v19 }
0x3de6   : > { %v8179_v42 = vsub.f32 %v8170_v40, %v8178_v58 }
0x3de8   : > { %v8180_v2 = vmul.f32 %v8179_v42, %v8179_v42 }
0x3dea   : > { %v8181_v44 = vsel %vm3122_vm9, %v8180_v2, 0.0 }
0x3deb   : > { %8182 = vadd.xlane.f32.xlu0 %v8181_v44 }
0x3e74   : > { %v8183_v49 = vpop.xlane.xlu0 %8182 }
0x3e75   : > { %v8184_v54 = vmul.f32 0.03125, %v8183_v49 }
0x3e77   : > { %v8185_v35 = vadd.f32 1e-05, %v8184_v54 }
0x3e79   : > { %10016 = vrsqrt.f32 %v8185_v35 }
0x3e86   : > { %v10017_v57 = vpop.eup %10016 }
0x3e87   : > { %v8187_v56 = vmul.f32 %v10017_v57, %v8179_v42 }
0x3e89   : > { %v8194_v0 = vmul.f32 %v9002_v52, %v8187_v56 }
0x3e8b   : > { %v8201_v1 = vadd.f32 %v9003_v61, %v8194_v0 }
0x3e8d   : > { %9868 = vmatmul.mubr.msk.f32.vlgmr.msra.gmra.mxu0 %vm862_vm1, %v8201_v1 }
0x3e8e   : > { %9882 = vmatpush3.msra.mxu0 %v9018_v3  ;;  %9889 = vmatprep.mubr.msk.f32.mxu0 %vm10037_vm0, %v10036_v4 }
0x3e8f   : > { %9883 = vmatprep.subr.mxu0 %v10036_v4 }
0x3e90   : > { %9884 = vmatpush3.msra.mxu0 %v9017_v5 }
0x3e91   : > { %9885 = vmatprep.subr.mxu0 %v10036_v4 }
0x3e92   : > { %9886 = vmatpush3.msra.mxu0 %v9016_v63 }
0x3e93   : > { %9887 = vmatprep.subr.mxu0 %v10036_v4 }
0x3e94   : > { %9888 = vmatpush3.msra.mxu0 %v9015_v7 }
0x3e95   : > { %9890 = vmatmul.mubr.msk.f32.vlgmr.msra.gmra.mxu0 %vm862_vm1, %v11040_v27 }
0x3f4d   : > { %v8350_v11 = vpop.f32.mrf.mxu0 }
0x3f4e   : > { %v8351_v14 = vadd.f32 %v8350_v11, %v8277_v62 }
0x3f4f   : > { %v9869_v12 = vpop.f32.mrf.mxu0 }
0x3f50   : > { %v8432_v16 = vadd.f32 %v11439_v59, %v8351_v14 }
0x3f55   : > { %v8507_v17 = vpop.f32.mrf.mxu0 }
0x3f56   : > { %v8511_v21 = vadd.f32 %v8507_v17, %v8432_v16 }
0x3f57   : > { %v9891_v4 = vpop.f32.mrf.mxu0 }
0x3f58   : > { %v8519_v27 = vadd.f32 %v9020_v18, %v8511_v21 }
0x3f5a   : > { %v9021_v29 = vmul.f32 -1.442695, %v8519_v27  ;;  %9027 = vst.msk [vmem:[%s842_s14 + $0x4] sm:$0xf] %vm8552_vm14, %v8519_v27 }
0x3f5c   : > { %10018 = vpow2.f32 %v9021_v29 }
0x3f69   : > { %v10019_v24 = vpop.eup %10018 }
0x3f6a   : > { %v8523_v25 = vadd.f32 1.0, %v10019_v24 }
0x3f6c   : > { %10020 = vrcp.f32 %v8523_v25 }
0x3f79   : > { %v10021_v23 = vpop.eup %10020 }
0x3f7a   : > { %8553 = vst.msk [vmem:[%s842_s14] sm:$0xf] %vm8552_vm14, %v10021_v23  ;;  %8528 = vperm.xlu1 %9916, %v10021_v23   ;;  %v8532_v8 = vsub.f32 1.0, %v10021_v23 }
0x3f7e   : > { %8535 = vperm.xlu1 %9916, %v8532_v8  }
0x3ff5   : > { %v8529_v26 = vpop.permute.xlu1 %8528 }
0x3ff6   : > { %v8531_v53 = vmul.f32 %v8529_v26, %v10363_v22 }
0x3ff9   : > { %v8536_v59 = vpop.permute.xlu1 %8535 }
0x3ffa   : > { %v8538_v28 = vmul.f32 %v8536_v59, %v10939_v43 }
0x3ffc   : > { %v8539_v15 = vadd.f32 %v8538_v28, %v8531_v53 }
0x3ffe   : > { %9025 = vst.msk [vmem:[%s10354_s7 + $0x10] sm:$0xf] %vm1633_vm8, %v8539_v15 }
0x3fff PF: > { %s11642_s2 = sld [smem:[#allocation3_spill]] }
0x4005   : > { %s38_s6 = sadd.s32 1, %s11642_s2  }
0x4006   : > { %p35_p4 = scmp.ge.s32.totalorder %s38_s6, 4  }
0x4008   :  { %37 = sbr.rel (!%p35_p4) target bundleno = 17 (0x11), region = 234 }

</bundles_post_ra>
